<compile_context>
chip_gen: v6e
topology: v6e:2x2x1
jax: 0.10.0
libtpu: 0.0.40
codegen_flags: <defaults>
</compile_context>

<pallas_src>
import functools
import math

import jax
import jax.numpy as jnp
from jax import lax
from jax.experimental import pallas as pl
from jax.experimental.pallas import tpu as pltpu


def _decoder_layer_kernel(trg_ref, enc_ref, tpad_ref, smask_ref,
                          sw_ref, sb_ref, ew_ref, eb_ref,
                          lng_ref, lnb_ref,
                          w1_ref, b1_ref, w2_ref, b2_ref,
                          out_ref, *rest, n_heads, store_attn):
    if store_attn:
        attn_ref, ks_ref, vs_ref, kc_ref, vc_ref = rest
    else:
        attn_ref = None
        ks_ref, vs_ref, kc_ref, vc_ref = rest

    T = trg_ref.shape[1]
    H = trg_ref.shape[2]
    TQ = out_ref.shape[1]
    d = H // n_heads
    inv_scale = 1.0 / math.sqrt(float(d))

    q_blk = pl.program_id(1)
    q0 = pl.multiple_of(q_blk * TQ, TQ)

    # ---- K/V projections: computed once per batch (first q-tile), reused by
    # every query tile via persistent head-major VMEM scratch. ----
    @pl.when(q_blk == 0)
    def _():
        def project_kv(x, w_ref, b_ref, k_dst, v_dst):
            k = (jnp.dot(x, w_ref[1], preferred_element_type=jnp.float32)
                 + b_ref[1:2, :]).astype(k_dst.dtype)
            v = (jnp.dot(x, w_ref[2], preferred_element_type=jnp.float32)
                 + b_ref[2:3, :]).astype(v_dst.dtype)
            for h in range(n_heads):            # head split: once per batch
                k_dst[h] = k[:, h * d:(h + 1) * d]
                v_dst[h] = v[:, h * d:(h + 1) * d]
        project_kv(trg_ref[0], sw_ref, sb_ref, ks_ref, vs_ref)
        project_kv(enc_ref[0], ew_ref, eb_ref, kc_ref, vc_ref)

    x_q = trg_ref[0, pl.ds(q0, TQ), :]                      # (TQ, H) bf16

    # masks -> additive biases (f32), computed once, shared by all heads;
    # the causal part is generated in-kernel (no (B,T,T) mask DMA).
    row_ids = q0 + lax.broadcasted_iota(jnp.int32, (TQ, T), 0)
    col_ids = lax.broadcasted_iota(jnp.int32, (TQ, T), 1)
    keep_self = (row_ids >= col_ids) & (tpad_ref[0] != 0.0)
    self_bias = jnp.where(keep_self, 0.0, -1e10).astype(jnp.float32)     # (TQ, T)
    cross_bias = jnp.where(smask_ref[0] != 0.0, 0.0,
                           -1e10).astype(jnp.float32)                    # (1, S)

    def layer_norm(v, g_row, b_row):
        mu = jnp.mean(v, axis=-1, keepdims=True)
        var = jnp.mean((v - mu) ** 2, axis=-1, keepdims=True)
        return (v - mu) * lax.rsqrt(var + 1e-5) * g_row + b_row

    def attend(xq, w_ref, b_ref, k_scr, v_scr, bias, write_attn):
        # Only the Q projection is per-tile; K/V come from scratch.
        q = jnp.dot(xq.astype(jnp.bfloat16), w_ref[0],
                    preferred_element_type=jnp.float32) + b_ref[0:1, :]
        q = (q * inv_scale).astype(jnp.bfloat16)            # scale folded into Q
        qh = jnp.stack([q[:, h * d:(h + 1) * d]
                        for h in range(n_heads)])           # (nh, TQ, d) bf16
        e = jnp.einsum("hqd,hkd->hqk", qh, k_scr[...],
                       preferred_element_type=jnp.float32)  # (nh, TQ, Skv)
        e = e + bias[None]
        m = jnp.max(e, axis=-1, keepdims=True)
        p = jnp.exp(e - m)
        denom = jnp.sum(p, axis=-1, keepdims=True)
        # Exact divide for the attention tensor that is written back to HBM;
        # EUP-approx reciprocal when the probabilities only feed the MXU.
        a = p * pl.reciprocal(denom, approx=not write_attn)
        if write_attn:
            attn_ref[0] = a.astype(attn_ref.dtype)
        ctx = jnp.einsum("hqk,hkd->hqd", a.astype(jnp.bfloat16), v_scr[...],
                         preferred_element_type=jnp.float32)  # (nh, TQ, d)
        concat = jnp.concatenate([ctx[h] for h in range(n_heads)], axis=-1)
        return (jnp.dot(concat.astype(jnp.bfloat16), w_ref[3],
                        preferred_element_type=jnp.float32) + b_ref[3:4, :])

    # --- masked self attention + residual + LN ---
    sa = attend(x_q, sw_ref, sb_ref, ks_ref, vs_ref, self_bias, False)
    x1 = layer_norm(x_q.astype(jnp.float32) + sa,
                    lng_ref[0:1, :], lnb_ref[0:1, :])

    # --- encoder (cross) attention + residual + LN ---
    ca = attend(x1, ew_ref, eb_ref, kc_ref, vc_ref, cross_bias, store_attn)
    x2 = layer_norm(x1 + ca, lng_ref[1:2, :], lnb_ref[1:2, :])

    # --- position-wise feedforward + residual + LN ---
    hdn = jnp.maximum(
        jnp.dot(x2.astype(jnp.bfloat16), w1_ref[...],
                preferred_element_type=jnp.float32) + b1_ref[...], 0.0)
    ff = jnp.dot(hdn.astype(jnp.bfloat16), w2_ref[...],
                 preferred_element_type=jnp.float32) + b2_ref[...]
    x3 = layer_norm(x2 + ff, lng_ref[2:3, :], lnb_ref[2:3, :])

    out_ref[0] = x3.astype(out_ref.dtype)


def prepare_decoder_params(params):
    """One-time cast of the large weight matrices to bf16 (MXU feed dtype)."""
    p = dict(params)
    for name in ("sw", "ew", "w1", "w2"):
        p[name] = jnp.asarray(params[name], jnp.bfloat16)
    return p


def _vmem_budget_bytes():
    try:
        cap = int(pltpu.get_tpu_info().vmem_capacity_bytes)
    except Exception:
        cap = 128 * 1024 * 1024
    # ~96 MiB on v5e/v6e (128 MiB physical), ~48 MiB on v7x (64 MiB physical)
    return cap * 3 // 4


def decoder_layer(trg, enc_src, trg_pad_mask, src_mask, params, n_heads,
                  *, block_q=None, return_attention=True,
                  single_buffer_weights=True):
    B, T, H = trg.shape
    S = enc_src.shape[1]
    PF = params["w1"].shape[1]
    assert H % n_heads == 0
    d = H // n_heads

    vmem_budget = _vmem_budget_bytes()
    if block_q is None:
        cap = 128 if vmem_budget < (64 << 20) else 256   # smaller q-tile on v7x
        block_q = cap if T % cap == 0 else T
    assert T % block_q == 0, "T must be divisible by the query tile size"
    assert block_q % 8 == 0 or block_q == T, "query tile must be sublane aligned"
    nq = T // block_q

    # Activations enter the kernel as bf16 (half the DMA / VMEM); masks stay f32.
    trg_b = trg.astype(jnp.bfloat16)
    enc_b = enc_src.astype(jnp.bfloat16)

    # Weights should already be bf16 (prepare_decoder_params); cast defensively.
    def as_bf16(x):
        return x if x.dtype == jnp.bfloat16 else x.astype(jnp.bfloat16)
    sw, ew, w1, w2 = (as_bf16(params["sw"]), as_bf16(params["ew"]),
                      as_bf16(params["w1"]), as_bf16(params["w2"]))

    kernel = functools.partial(_decoder_layer_kernel, n_heads=n_heads,
                               store_attn=return_attention)

    out_shape = [jax.ShapeDtypeStruct((B, T, H), jnp.float32)]
    if return_attention:
        out_shape.append(jax.ShapeDtypeStruct((B, n_heads, T, S), jnp.bfloat16))

    scratch_shapes = [
        pltpu.VMEM((n_heads, T, d), jnp.bfloat16),   # self-attn K (per batch)
        pltpu.VMEM((n_heads, T, d), jnp.bfloat16),   # self-attn V
        pltpu.VMEM((n_heads, S, d), jnp.bfloat16),   # cross-attn K
        pltpu.VMEM((n_heads, S, d), jnp.bfloat16),   # cross-attn V
    ]

    def build_and_call(single_buf):
        def const_spec(shape):
            zeros = (0,) * len(shape)
            idx = lambda b, q: zeros
            if single_buf:
                # Never-changing blocks: one VMEM buffer instead of two.
                return pl.BlockSpec(shape, idx, pipeline_mode=pl.Buffered(1))
            return pl.BlockSpec(shape, idx)

        in_specs = [
            pl.BlockSpec((1, T, H), lambda b, q: (b, 0, 0)),   # trg (bf16)
            pl.BlockSpec((1, S, H), lambda b, q: (b, 0, 0)),   # enc_src (bf16)
            pl.BlockSpec((1, 1, T), lambda b, q: (b, 0, 0)),   # trg pad mask
            pl.BlockSpec((1, 1, S), lambda b, q: (b, 0, 0)),   # src pad mask
            const_spec((4, H, H)),                             # self-attn W
            const_spec((4, H)),                                # self-attn b
            const_spec((4, H, H)),                             # cross-attn W
            const_spec((4, H)),                                # cross-attn b
            const_spec((3, H)),                                # LN gammas
            const_spec((3, H)),                                # LN betas
            const_spec((H, PF)),                               # ffn w1
            const_spec((1, PF)),                               # ffn b1
            const_spec((PF, H)),                               # ffn w2
            const_spec((1, H)),                                # ffn b2
        ]
        out_specs = [pl.BlockSpec((1, block_q, H), lambda b, q: (b, q, 0))]
        if return_attention:
            out_specs.append(
                pl.BlockSpec((1, n_heads, block_q, S), lambda b, q: (b, 0, q, 0)))

        return pl.pallas_call(
            kernel,
            grid=(B, nq),
            in_specs=in_specs,
            out_specs=out_specs,
            out_shape=out_shape,
            scratch_shapes=scratch_shapes,
            compiler_params=pltpu.CompilerParams(
                # q axis must be sequential ("arbitrary") so the per-batch K/V
                # scratch computed at q == 0 is visible to every query tile.
                dimension_semantics=("parallel", "arbitrary"),
                vmem_limit_bytes=vmem_budget),
        )(trg_b, enc_b, trg_pad_mask, src_mask,
          sw, params["sb"], ew, params["eb"],
          params["ln_g"], params["ln_b"],
          w1, params["b1"], w2, params["b2"])

    if single_buffer_weights:
        try:
            res = build_and_call(True)
        except Exception:
            # pipeline_mode=pl.Buffered(1) not supported by this jax build:
            # fall back to default (double-buffered) weight blocks.
            res = build_and_call(False)
    else:
        res = build_and_call(False)

    if return_attention:
        return res[0], res[1]
    return res[0]


# ---------------- pure-JAX f32 reference (for correctness check) ------------

def _ref_mha(x_q, x_kv, W, Bb, mask, n_heads):
    Bs, _, H = x_q.shape
    d = H // n_heads
    Q = x_q @ W[0] + Bb[0]
    K = x_kv @ W[1] + Bb[1]
    V = x_kv @ W[2] + Bb[2]
    Q = Q.reshape(Bs, -1, n_heads, d).transpose(0, 2, 1, 3)
    K = K.reshape(Bs, -1, n_heads, d).transpose(0, 2, 1, 3)
    V = V.reshape(Bs, -1, n_heads, d).transpose(0, 2, 1, 3)
    e = jnp.einsum("bhtd,bhsd->bhts", Q, K) / math.sqrt(float(d))
    e = jnp.where(mask[:, None] == 0, -1e10, e)
    a = jax.nn.softmax(e, axis=-1)
    o = jnp.einsum("bhts,bhsd->bhtd", a, V)
    o = o.transpose(0, 2, 1, 3).reshape(Bs, -1, H)
    return o @ W[3] + Bb[3], a


def _ref_ln(x, g, b):
    mu = jnp.mean(x, -1, keepdims=True)
    var = jnp.mean((x - mu) ** 2, -1, keepdims=True)
    return (x - mu) * lax.rsqrt(var + 1e-5) * g + b


def decoder_layer_ref(trg, enc_src, trg_pad_mask, src_mask, p, n_heads):
    _, T, _ = trg.shape
    causal = jnp.tril(jnp.ones((T, T), jnp.float32))[None]       # (1, T, T)
    trg_mask = jnp.where((trg_pad_mask != 0) & (causal != 0), 1.0, 0.0)
    sa, _ = _ref_mha(trg, trg, p["sw"], p["sb"], trg_mask, n_heads)
    x1 = _ref_ln(trg + sa, p["ln_g"][0], p["ln_b"][0])
    ca, attn = _ref_mha(x1, enc_src, p["ew"], p["eb"], src_mask, n_heads)
    x2 = _ref_ln(x1 + ca, p["ln_g"][1], p["ln_b"][1])
    h = jnp.maximum(x2 @ p["w1"] + p["b1"][0], 0.0)
    ff = h @ p["w2"] + p["b2"][0]
    x3 = _ref_ln(x2 + ff, p["ln_g"][2], p["ln_b"][2])
    return x3, attn


if __name__ == "__main__":
    # Small shapes consistent with the module.
    B, T, S, H, NH, PF = 2, 16, 16, 32, 4, 64

    key = jax.random.PRNGKey(0)
    keys = jax.random.split(key, 12)
    sc = 0.1

    raw_params = {
        "sw": sc * jax.random.normal(keys[0], (4, H, H), jnp.float32),
        "sb": sc * jax.random.normal(keys[1], (4, H), jnp.float32),
        "ew": sc * jax.random.normal(keys[2], (4, H, H), jnp.float32),
        "eb": sc * jax.random.normal(keys[3], (4, H), jnp.float32),
        "ln_g": jnp.ones((3, H), jnp.float32)
                + 0.01 * jax.random.normal(keys[4], (3, H), jnp.float32),
        "ln_b": 0.01 * jax.random.normal(keys[5], (3, H), jnp.float32),
        "w1": sc * jax.random.normal(keys[6], (H, PF), jnp.float32),
        "b1": sc * jax.random.normal(keys[7], (1, PF), jnp.float32),
        "w2": sc * jax.random.normal(keys[8], (PF, H), jnp.float32),
        "b2": sc * jax.random.normal(keys[9], (1, H), jnp.float32),
    }
    params = prepare_decoder_params(raw_params)   # one-time bf16 weight cast

    trg = jax.random.normal(keys[10], (B, T, H), jnp.float32)
    enc_src = jax.random.normal(keys[11], (B, S, H), jnp.float32)

    # padding masks (1 = keep); the causal structure is built in-kernel.
    trg_pad_mask = jnp.ones((B, 1, T), jnp.float32).at[:, :, -1].set(0.0)
    src_mask = jnp.ones((B, 1, S), jnp.float32).at[:, :, -2:].set(0.0)

    # block_q=8 -> 2 query tiles per batch: exercises the per-batch K/V
    # scratch hoisting / reuse across tiles.
    out, attn = decoder_layer(trg, enc_src, trg_pad_mask, src_mask,
                              params, NH, block_q=8, return_attention=True)
    jax.block_until_ready((out, attn))

    out_ref, attn_ref = decoder_layer_ref(trg, enc_src, trg_pad_mask,
                                          src_mask, raw_params, NH)
    # bf16 MXU operands / bf16 activations -> loosened tolerances.
    assert jnp.allclose(out, out_ref, atol=5e-2, rtol=5e-2)
    assert jnp.allclose(attn.astype(jnp.float32), attn_ref, atol=2e-2, rtol=2e-2)

    # Output-only variant (no (B, nh, T, S) attention writeback).
    out2 = decoder_layer(trg, enc_src, trg_pad_mask, src_mask,
                         params, NH, block_q=8, return_attention=False)
    jax.block_until_ready(out2)
    assert jnp.allclose(out2, out_ref, atol=5e-2, rtol=5e-2)

    print("KERNEL_OK")
</pallas_src>

<mosaic_0001>
module attributes {stable_mosaic.version = 11 : i64} {
  func.func @_decoder_layer_kernel(%arg0: i32, %arg1: i32, %arg2: memref<1x16x32xbf16, #tpu.memory_space<vmem>>, %arg3: memref<1x16x32xbf16, #tpu.memory_space<vmem>>, %arg4: memref<1x1x16xf32, #tpu.memory_space<vmem>>, %arg5: memref<1x1x16xf32, #tpu.memory_space<vmem>>, %arg6: memref<4x32x32xbf16, #tpu.memory_space<vmem>>, %arg7: memref<4x32xf32, #tpu.memory_space<vmem>>, %arg8: memref<4x32x32xbf16, #tpu.memory_space<vmem>>, %arg9: memref<4x32xf32, #tpu.memory_space<vmem>>, %arg10: memref<3x32xf32, #tpu.memory_space<vmem>>, %arg11: memref<3x32xf32, #tpu.memory_space<vmem>>, %arg12: memref<32x64xbf16, #tpu.memory_space<vmem>>, %arg13: memref<1x64xf32, #tpu.memory_space<vmem>>, %arg14: memref<64x32xbf16, #tpu.memory_space<vmem>>, %arg15: memref<1x32xf32, #tpu.memory_space<vmem>>, %arg16: memref<1x8x32xf32, #tpu.memory_space<vmem>>, %arg17: memref<1x4x8x16xbf16, #tpu.memory_space<vmem>>, %arg18: memref<4x16x8xbf16, #tpu.memory_space<vmem>>, %arg19: memref<4x16x8xbf16, #tpu.memory_space<vmem>>, %arg20: memref<4x16x8xbf16, #tpu.memory_space<vmem>>, %arg21: memref<4x16x8xbf16, #tpu.memory_space<vmem>>) attributes {dimension_semantics = [#tpu.dimension_semantics<parallel>, #tpu.dimension_semantics<arbitrary>], iteration_bounds = array<i64: 2, 2>, scalar_prefetch = 0 : i64, scratch_operands = 4 : i64, tpu.core_type = #tpu.core_type<tc>, window_params = [{transform_indices = @transform_0, window_bounds = array<i64: 1, 16, 32>}, {transform_indices = @transform_1, window_bounds = array<i64: 1, 16, 32>}, {transform_indices = @transform_2, window_bounds = array<i64: 1, 1, 16>}, {transform_indices = @transform_3, window_bounds = array<i64: 1, 1, 16>}, {pipeline_mode = #tpu.pipeline_mode<synchronous>, transform_indices = @transform_4, window_bounds = array<i64: 4, 32, 32>}, {pipeline_mode = #tpu.pipeline_mode<synchronous>, transform_indices = @transform_5, window_bounds = array<i64: 4, 32>}, {pipeline_mode = #tpu.pipeline_mode<synchronous>, transform_indices = @transform_6, window_bounds = array<i64: 4, 32, 32>}, {pipeline_mode = #tpu.pipeline_mode<synchronous>, transform_indices = @transform_7, window_bounds = array<i64: 4, 32>}, {pipeline_mode = #tpu.pipeline_mode<synchronous>, transform_indices = @transform_8, window_bounds = array<i64: 3, 32>}, {pipeline_mode = #tpu.pipeline_mode<synchronous>, transform_indices = @transform_9, window_bounds = array<i64: 3, 32>}, {pipeline_mode = #tpu.pipeline_mode<synchronous>, transform_indices = @transform_10, window_bounds = array<i64: 32, 64>}, {pipeline_mode = #tpu.pipeline_mode<synchronous>, transform_indices = @transform_11, window_bounds = array<i64: 1, 64>}, {pipeline_mode = #tpu.pipeline_mode<synchronous>, transform_indices = @transform_12, window_bounds = array<i64: 64, 32>}, {pipeline_mode = #tpu.pipeline_mode<synchronous>, transform_indices = @transform_13, window_bounds = array<i64: 1, 32>}, {transform_indices = @transform_14, window_bounds = array<i64: 1, 8, 32>}, {transform_indices = @transform_15, window_bounds = array<i64: 1, 4, 8, 16>}]} {
    %c8_i32 = arith.constant 8 : i32
    %0 = arith.muli %arg1, %c8_i32 : i32
    %1 = tpu.assume_multiple %0, 8 : i32
    %c0_i32 = arith.constant 0 : i32
    %2 = arith.cmpi eq, %arg1, %c0_i32 : i32
    %3 = arith.extui %2 : i1 to i32
    %c0_i32_0 = arith.constant 0 : i32
    %4 = arith.cmpi ne, %3, %c0_i32_0 : i32
    scf.if %4 {
      %c0_101 = arith.constant 0 : index
      %c0_102 = arith.constant 0 : index
      %c0_103 = arith.constant 0 : index
      %231 = vector.load %arg2[%c0_101, %c0_102, %c0_103] : memref<1x16x32xbf16, #tpu.memory_space<vmem>>, vector<1x16x32xbf16>
      %232 = vector.shape_cast %231 : vector<1x16x32xbf16> to vector<16x32xbf16>
      %c1_104 = arith.constant 1 : index
      %c0_105 = arith.constant 0 : index
      %c0_106 = arith.constant 0 : index
      %233 = vector.load %arg6[%c1_104, %c0_105, %c0_106] : memref<4x32x32xbf16, #tpu.memory_space<vmem>>, vector<1x32x32xbf16>
      %234 = vector.shape_cast %233 : vector<1x32x32xbf16> to vector<32x32xbf16>
      %cst_107 = arith.constant dense<0.000000e+00> : vector<16x32xf32>
      %235 = tpu.matmul %232, %234, %cst_107 {dimension_numbers = #tpu.dot_dimension_numbers<[1], [0], [0], [1], [0, 0, 1, 1], [], []>} : vector<16x32xbf16>, vector<32x32xbf16>, vector<16x32xf32> -> vector<16x32xf32>
      %c1_108 = arith.constant 1 : index
      %c0_109 = arith.constant 0 : index
      %236 = vector.load %arg7[%c1_108, %c0_109] : memref<4x32xf32, #tpu.memory_space<vmem>>, vector<1x32xf32>
      %237 = vector.broadcast %236 : vector<1x32xf32> to vector<16x32xf32>
      %238 = arith.addf %235, %237 : vector<16x32xf32>
      %239 = arith.truncf %238 : vector<16x32xf32> to vector<16x32xbf16>
      %c2_110 = arith.constant 2 : index
      %c0_111 = arith.constant 0 : index
      %c0_112 = arith.constant 0 : index
      %240 = vector.load %arg6[%c2_110, %c0_111, %c0_112] : memref<4x32x32xbf16, #tpu.memory_space<vmem>>, vector<1x32x32xbf16>
      %241 = vector.shape_cast %240 : vector<1x32x32xbf16> to vector<32x32xbf16>
      %cst_113 = arith.constant dense<0.000000e+00> : vector<16x32xf32>
      %242 = tpu.matmul %232, %241, %cst_113 {dimension_numbers = #tpu.dot_dimension_numbers<[1], [0], [0], [1], [0, 0, 1, 1], [], []>} : vector<16x32xbf16>, vector<32x32xbf16>, vector<16x32xf32> -> vector<16x32xf32>
      %c2_114 = arith.constant 2 : index
      %c0_115 = arith.constant 0 : index
      %243 = vector.load %arg7[%c2_114, %c0_115] : memref<4x32xf32, #tpu.memory_space<vmem>>, vector<1x32xf32>
      %244 = vector.broadcast %243 : vector<1x32xf32> to vector<16x32xf32>
      %245 = arith.addf %242, %244 : vector<16x32xf32>
      %246 = arith.truncf %245 : vector<16x32xf32> to vector<16x32xbf16>
      %247 = vector.extract_strided_slice %239 {offsets = [0, 0], sizes = [16, 8], strides = [1, 1]} : vector<16x32xbf16> to vector<16x8xbf16>
      %c0_116 = arith.constant 0 : index
      %c0_117 = arith.constant 0 : index
      %c0_118 = arith.constant 0 : index
      %248 = vector.load %arg18[%c0_116, %c0_117, %c0_118] : memref<4x16x8xbf16, #tpu.memory_space<vmem>>, vector<1x16x8xbf16>
      %249 = vector.shape_cast %248 : vector<1x16x8xbf16> to vector<16x8xbf16>
      %250 = vector.shape_cast %247 : vector<16x8xbf16> to vector<1x16x8xbf16>
      tpu.vector_store %arg18[%c0_116, %c0_117, %c0_118], %250 {strides = array<i32>} : memref<4x16x8xbf16, #tpu.memory_space<vmem>>, vector<1x16x8xbf16>,
      %251 = vector.extract_strided_slice %246 {offsets = [0, 0], sizes = [16, 8], strides = [1, 1]} : vector<16x32xbf16> to vector<16x8xbf16>
      %c0_119 = arith.constant 0 : index
      %c0_120 = arith.constant 0 : index
      %c0_121 = arith.constant 0 : index
      %252 = vector.load %arg19[%c0_119, %c0_120, %c0_121] : memref<4x16x8xbf16, #tpu.memory_space<vmem>>, vector<1x16x8xbf16>
      %253 = vector.shape_cast %252 : vector<1x16x8xbf16> to vector<16x8xbf16>
      %254 = vector.shape_cast %251 : vector<16x8xbf16> to vector<1x16x8xbf16>
      tpu.vector_store %arg19[%c0_119, %c0_120, %c0_121], %254 {strides = array<i32>} : memref<4x16x8xbf16, #tpu.memory_space<vmem>>, vector<1x16x8xbf16>,
      %255 = vector.extract_strided_slice %239 {offsets = [0, 8], sizes = [16, 8], strides = [1, 1]} : vector<16x32xbf16> to vector<16x8xbf16>
      %c1_122 = arith.constant 1 : index
      %c0_123 = arith.constant 0 : index
      %c0_124 = arith.constant 0 : index
      %256 = vector.load %arg18[%c1_122, %c0_123, %c0_124] : memref<4x16x8xbf16, #tpu.memory_space<vmem>>, vector<1x16x8xbf16>
      %257 = vector.shape_cast %256 : vector<1x16x8xbf16> to vector<16x8xbf16>
      %258 = vector.shape_cast %255 : vector<16x8xbf16> to vector<1x16x8xbf16>
      tpu.vector_store %arg18[%c1_122, %c0_123, %c0_124], %258 {strides = array<i32>} : memref<4x16x8xbf16, #tpu.memory_space<vmem>>, vector<1x16x8xbf16>,
      %259 = vector.extract_strided_slice %246 {offsets = [0, 8], sizes = [16, 8], strides = [1, 1]} : vector<16x32xbf16> to vector<16x8xbf16>
      %c1_125 = arith.constant 1 : index
      %c0_126 = arith.constant 0 : index
      %c0_127 = arith.constant 0 : index
      %260 = vector.load %arg19[%c1_125, %c0_126, %c0_127] : memref<4x16x8xbf16, #tpu.memory_space<vmem>>, vector<1x16x8xbf16>
      %261 = vector.shape_cast %260 : vector<1x16x8xbf16> to vector<16x8xbf16>
      %262 = vector.shape_cast %259 : vector<16x8xbf16> to vector<1x16x8xbf16>
      tpu.vector_store %arg19[%c1_125, %c0_126, %c0_127], %262 {strides = array<i32>} : memref<4x16x8xbf16, #tpu.memory_space<vmem>>, vector<1x16x8xbf16>,
      %263 = vector.extract_strided_slice %239 {offsets = [0, 16], sizes = [16, 8], strides = [1, 1]} : vector<16x32xbf16> to vector<16x8xbf16>
      %c2_128 = arith.constant 2 : index
      %c0_129 = arith.constant 0 : index
      %c0_130 = arith.constant 0 : index
      %264 = vector.load %arg18[%c2_128, %c0_129, %c0_130] : memref<4x16x8xbf16, #tpu.memory_space<vmem>>, vector<1x16x8xbf16>
      %265 = vector.shape_cast %264 : vector<1x16x8xbf16> to vector<16x8xbf16>
      %266 = vector.shape_cast %263 : vector<16x8xbf16> to vector<1x16x8xbf16>
      tpu.vector_store %arg18[%c2_128, %c0_129, %c0_130], %266 {strides = array<i32>} : memref<4x16x8xbf16, #tpu.memory_space<vmem>>, vector<1x16x8xbf16>,
      %267 = vector.extract_strided_slice %246 {offsets = [0, 16], sizes = [16, 8], strides = [1, 1]} : vector<16x32xbf16> to vector<16x8xbf16>
      %c2_131 = arith.constant 2 : index
      %c0_132 = arith.constant 0 : index
      %c0_133 = arith.constant 0 : index
      %268 = vector.load %arg19[%c2_131, %c0_132, %c0_133] : memref<4x16x8xbf16, #tpu.memory_space<vmem>>, vector<1x16x8xbf16>
      %269 = vector.shape_cast %268 : vector<1x16x8xbf16> to vector<16x8xbf16>
      %270 = vector.shape_cast %267 : vector<16x8xbf16> to vector<1x16x8xbf16>
      tpu.vector_store %arg19[%c2_131, %c0_132, %c0_133], %270 {strides = array<i32>} : memref<4x16x8xbf16, #tpu.memory_space<vmem>>, vector<1x16x8xbf16>,
      %271 = vector.extract_strided_slice %239 {offsets = [0, 24], sizes = [16, 8], strides = [1, 1]} : vector<16x32xbf16> to vector<16x8xbf16>
      %c3_134 = arith.constant 3 : index
      %c0_135 = arith.constant 0 : index
      %c0_136 = arith.constant 0 : index
      %272 = vector.load %arg18[%c3_134, %c0_135, %c0_136] : memref<4x16x8xbf16, #tpu.memory_space<vmem>>, vector<1x16x8xbf16>
      %273 = vector.shape_cast %272 : vector<1x16x8xbf16> to vector<16x8xbf16>
      %274 = vector.shape_cast %271 : vector<16x8xbf16> to vector<1x16x8xbf16>
      tpu.vector_store %arg18[%c3_134, %c0_135, %c0_136], %274 {strides = array<i32>} : memref<4x16x8xbf16, #tpu.memory_space<vmem>>, vector<1x16x8xbf16>,
      %275 = vector.extract_strided_slice %246 {offsets = [0, 24], sizes = [16, 8], strides = [1, 1]} : vector<16x32xbf16> to vector<16x8xbf16>
      %c3_137 = arith.constant 3 : index
      %c0_138 = arith.constant 0 : index
      %c0_139 = arith.constant 0 : index
      %276 = vector.load %arg19[%c3_137, %c0_138, %c0_139] : memref<4x16x8xbf16, #tpu.memory_space<vmem>>, vector<1x16x8xbf16>
      %277 = vector.shape_cast %276 : vector<1x16x8xbf16> to vector<16x8xbf16>
      %278 = vector.shape_cast %275 : vector<16x8xbf16> to vector<1x16x8xbf16>
      tpu.vector_store %arg19[%c3_137, %c0_138, %c0_139], %278 {strides = array<i32>} : memref<4x16x8xbf16, #tpu.memory_space<vmem>>, vector<1x16x8xbf16>,
      %c0_140 = arith.constant 0 : index
      %c0_141 = arith.constant 0 : index
      %c0_142 = arith.constant 0 : index
      %279 = vector.load %arg3[%c0_140, %c0_141, %c0_142] : memref<1x16x32xbf16, #tpu.memory_space<vmem>>, vector<1x16x32xbf16>
      %280 = vector.shape_cast %279 : vector<1x16x32xbf16> to vector<16x32xbf16>
      %c1_143 = arith.constant 1 : index
      %c0_144 = arith.constant 0 : index
      %c0_145 = arith.constant 0 : index
      %281 = vector.load %arg8[%c1_143, %c0_144, %c0_145] : memref<4x32x32xbf16, #tpu.memory_space<vmem>>, vector<1x32x32xbf16>
      %282 = vector.shape_cast %281 : vector<1x32x32xbf16> to vector<32x32xbf16>
      %cst_146 = arith.constant dense<0.000000e+00> : vector<16x32xf32>
      %283 = tpu.matmul %280, %282, %cst_146 {dimension_numbers = #tpu.dot_dimension_numbers<[1], [0], [0], [1], [0, 0, 1, 1], [], []>} : vector<16x32xbf16>, vector<32x32xbf16>, vector<16x32xf32> -> vector<16x32xf32>
      %c1_147 = arith.constant 1 : index
      %c0_148 = arith.constant 0 : index
      %284 = vector.load %arg9[%c1_147, %c0_148] : memref<4x32xf32, #tpu.memory_space<vmem>>, vector<1x32xf32>
      %285 = vector.broadcast %284 : vector<1x32xf32> to vector<16x32xf32>
      %286 = arith.addf %283, %285 : vector<16x32xf32>
      %287 = arith.truncf %286 : vector<16x32xf32> to vector<16x32xbf16>
      %c2_149 = arith.constant 2 : index
      %c0_150 = arith.constant 0 : index
      %c0_151 = arith.constant 0 : index
      %288 = vector.load %arg8[%c2_149, %c0_150, %c0_151] : memref<4x32x32xbf16, #tpu.memory_space<vmem>>, vector<1x32x32xbf16>
      %289 = vector.shape_cast %288 : vector<1x32x32xbf16> to vector<32x32xbf16>
      %cst_152 = arith.constant dense<0.000000e+00> : vector<16x32xf32>
      %290 = tpu.matmul %280, %289, %cst_152 {dimension_numbers = #tpu.dot_dimension_numbers<[1], [0], [0], [1], [0, 0, 1, 1], [], []>} : vector<16x32xbf16>, vector<32x32xbf16>, vector<16x32xf32> -> vector<16x32xf32>
      %c2_153 = arith.constant 2 : index
      %c0_154 = arith.constant 0 : index
      %291 = vector.load %arg9[%c2_153, %c0_154] : memref<4x32xf32, #tpu.memory_space<vmem>>, vector<1x32xf32>
      %292 = vector.broadcast %291 : vector<1x32xf32> to vector<16x32xf32>
      %293 = arith.addf %290, %292 : vector<16x32xf32>
      %294 = arith.truncf %293 : vector<16x32xf32> to vector<16x32xbf16>
      %295 = vector.extract_strided_slice %287 {offsets = [0, 0], sizes = [16, 8], strides = [1, 1]} : vector<16x32xbf16> to vector<16x8xbf16>
      %c0_155 = arith.constant 0 : index
      %c0_156 = arith.constant 0 : index
      %c0_157 = arith.constant 0 : index
      %296 = vector.load %arg20[%c0_155, %c0_156, %c0_157] : memref<4x16x8xbf16, #tpu.memory_space<vmem>>, vector<1x16x8xbf16>
      %297 = vector.shape_cast %296 : vector<1x16x8xbf16> to vector<16x8xbf16>
      %298 = vector.shape_cast %295 : vector<16x8xbf16> to vector<1x16x8xbf16>
      tpu.vector_store %arg20[%c0_155, %c0_156, %c0_157], %298 {strides = array<i32>} : memref<4x16x8xbf16, #tpu.memory_space<vmem>>, vector<1x16x8xbf16>,
      %299 = vector.extract_strided_slice %294 {offsets = [0, 0], sizes = [16, 8], strides = [1, 1]} : vector<16x32xbf16> to vector<16x8xbf16>
      %c0_158 = arith.constant 0 : index
      %c0_159 = arith.constant 0 : index
      %c0_160 = arith.constant 0 : index
      %300 = vector.load %arg21[%c0_158, %c0_159, %c0_160] : memref<4x16x8xbf16, #tpu.memory_space<vmem>>, vector<1x16x8xbf16>
      %301 = vector.shape_cast %300 : vector<1x16x8xbf16> to vector<16x8xbf16>
      %302 = vector.shape_cast %299 : vector<16x8xbf16> to vector<1x16x8xbf16>
      tpu.vector_store %arg21[%c0_158, %c0_159, %c0_160], %302 {strides = array<i32>} : memref<4x16x8xbf16, #tpu.memory_space<vmem>>, vector<1x16x8xbf16>,
      %303 = vector.extract_strided_slice %287 {offsets = [0, 8], sizes = [16, 8], strides = [1, 1]} : vector<16x32xbf16> to vector<16x8xbf16>
      %c1_161 = arith.constant 1 : index
      %c0_162 = arith.constant 0 : index
      %c0_163 = arith.constant 0 : index
      %304 = vector.load %arg20[%c1_161, %c0_162, %c0_163] : memref<4x16x8xbf16, #tpu.memory_space<vmem>>, vector<1x16x8xbf16>
      %305 = vector.shape_cast %304 : vector<1x16x8xbf16> to vector<16x8xbf16>
      %306 = vector.shape_cast %303 : vector<16x8xbf16> to vector<1x16x8xbf16>
      tpu.vector_store %arg20[%c1_161, %c0_162, %c0_163], %306 {strides = array<i32>} : memref<4x16x8xbf16, #tpu.memory_space<vmem>>, vector<1x16x8xbf16>,
      %307 = vector.extract_strided_slice %294 {offsets = [0, 8], sizes = [16, 8], strides = [1, 1]} : vector<16x32xbf16> to vector<16x8xbf16>
      %c1_164 = arith.constant 1 : index
      %c0_165 = arith.constant 0 : index
      %c0_166 = arith.constant 0 : index
      %308 = vector.load %arg21[%c1_164, %c0_165, %c0_166] : memref<4x16x8xbf16, #tpu.memory_space<vmem>>, vector<1x16x8xbf16>
      %309 = vector.shape_cast %308 : vector<1x16x8xbf16> to vector<16x8xbf16>
      %310 = vector.shape_cast %307 : vector<16x8xbf16> to vector<1x16x8xbf16>
      tpu.vector_store %arg21[%c1_164, %c0_165, %c0_166], %310 {strides = array<i32>} : memref<4x16x8xbf16, #tpu.memory_space<vmem>>, vector<1x16x8xbf16>,
      %311 = vector.extract_strided_slice %287 {offsets = [0, 16], sizes = [16, 8], strides = [1, 1]} : vector<16x32xbf16> to vector<16x8xbf16>
      %c2_167 = arith.constant 2 : index
      %c0_168 = arith.constant 0 : index
      %c0_169 = arith.constant 0 : index
      %312 = vector.load %arg20[%c2_167, %c0_168, %c0_169] : memref<4x16x8xbf16, #tpu.memory_space<vmem>>, vector<1x16x8xbf16>
      %313 = vector.shape_cast %312 : vector<1x16x8xbf16> to vector<16x8xbf16>
      %314 = vector.shape_cast %311 : vector<16x8xbf16> to vector<1x16x8xbf16>
      tpu.vector_store %arg20[%c2_167, %c0_168, %c0_169], %314 {strides = array<i32>} : memref<4x16x8xbf16, #tpu.memory_space<vmem>>, vector<1x16x8xbf16>,
      %315 = vector.extract_strided_slice %294 {offsets = [0, 16], sizes = [16, 8], strides = [1, 1]} : vector<16x32xbf16> to vector<16x8xbf16>
      %c2_170 = arith.constant 2 : index
      %c0_171 = arith.constant 0 : index
      %c0_172 = arith.constant 0 : index
      %316 = vector.load %arg21[%c2_170, %c0_171, %c0_172] : memref<4x16x8xbf16, #tpu.memory_space<vmem>>, vector<1x16x8xbf16>
      %317 = vector.shape_cast %316 : vector<1x16x8xbf16> to vector<16x8xbf16>
      %318 = vector.shape_cast %315 : vector<16x8xbf16> to vector<1x16x8xbf16>
      tpu.vector_store %arg21[%c2_170, %c0_171, %c0_172], %318 {strides = array<i32>} : memref<4x16x8xbf16, #tpu.memory_space<vmem>>, vector<1x16x8xbf16>,
      %319 = vector.extract_strided_slice %287 {offsets = [0, 24], sizes = [16, 8], strides = [1, 1]} : vector<16x32xbf16> to vector<16x8xbf16>
      %c3_173 = arith.constant 3 : index
      %c0_174 = arith.constant 0 : index
      %c0_175 = arith.constant 0 : index
      %320 = vector.load %arg20[%c3_173, %c0_174, %c0_175] : memref<4x16x8xbf16, #tpu.memory_space<vmem>>, vector<1x16x8xbf16>
      %321 = vector.shape_cast %320 : vector<1x16x8xbf16> to vector<16x8xbf16>
      %322 = vector.shape_cast %319 : vector<16x8xbf16> to vector<1x16x8xbf16>
      tpu.vector_store %arg20[%c3_173, %c0_174, %c0_175], %322 {strides = array<i32>} : memref<4x16x8xbf16, #tpu.memory_space<vmem>>, vector<1x16x8xbf16>,
      %323 = vector.extract_strided_slice %294 {offsets = [0, 24], sizes = [16, 8], strides = [1, 1]} : vector<16x32xbf16> to vector<16x8xbf16>
      %c3_176 = arith.constant 3 : index
      %c0_177 = arith.constant 0 : index
      %c0_178 = arith.constant 0 : index
      %324 = vector.load %arg21[%c3_176, %c0_177, %c0_178] : memref<4x16x8xbf16, #tpu.memory_space<vmem>>, vector<1x16x8xbf16>
      %325 = vector.shape_cast %324 : vector<1x16x8xbf16> to vector<16x8xbf16>
      %326 = vector.shape_cast %323 : vector<16x8xbf16> to vector<1x16x8xbf16>
      tpu.vector_store %arg21[%c3_176, %c0_177, %c0_178], %326 {strides = array<i32>} : memref<4x16x8xbf16, #tpu.memory_space<vmem>>, vector<1x16x8xbf16>,
    } else {
    }
    %c0 = arith.constant 0 : index
    %5 = arith.index_cast %1 : i32 to index
    %c0_1 = arith.constant 0 : index
    %6 = vector.load %arg2[%c0, %5, %c0_1] : memref<1x16x32xbf16, #tpu.memory_space<vmem>>, vector<1x8x32xbf16>
    %7 = vector.shape_cast %6 : vector<1x8x32xbf16> to vector<8x32xbf16>
    %8 = tpu.iota {dimensions = array<i32: 0>} : vector<8x16xi32>
    %9 = vector.broadcast %1 : i32 to vector<8x16xi32>
    %10 = arith.addi %9, %8 : vector<8x16xi32>
    %11 = tpu.iota {dimensions = array<i32: 1>} : vector<8x16xi32>
    %12 = arith.cmpi sge, %10, %11 : vector<8x16xi32>
    %c0_2 = arith.constant 0 : index
    %c0_3 = arith.constant 0 : index
    %c0_4 = arith.constant 0 : index
    %13 = vector.load %arg4[%c0_2, %c0_3, %c0_4] : memref<1x1x16xf32, #tpu.memory_space<vmem>>, vector<1x1x16xf32>
    %14 = vector.shape_cast %13 : vector<1x1x16xf32> to vector<1x16xf32>
    %cst = arith.constant 0.000000e+00 : f32
    %15 = vector.broadcast %cst : f32 to vector<1x16xf32>
    %16 = arith.cmpf one, %14, %15 : vector<1x16xf32>
    %17 = vector.broadcast %16 : vector<1x16xi1> to vector<8x16xi1>
    %18 = arith.andi %12, %17 : vector<8x16xi1>
    %cst_5 = arith.constant 0.000000e+00 : f32
    %cst_6 = arith.constant -1.000000e+10 : f32
    %19 = vector.broadcast %cst_5 : f32 to vector<8x16xf32>
    %20 = vector.broadcast %cst_6 : f32 to vector<8x16xf32>
    %21 = arith.select %18, %19, %20 : vector<8x16xi1>, vector<8x16xf32>
    %c0_7 = arith.constant 0 : index
    %c0_8 = arith.constant 0 : index
    %c0_9 = arith.constant 0 : index
    %22 = vector.load %arg5[%c0_7, %c0_8, %c0_9] : memref<1x1x16xf32, #tpu.memory_space<vmem>>, vector<1x1x16xf32>
    %23 = vector.shape_cast %22 : vector<1x1x16xf32> to vector<1x16xf32>
    %cst_10 = arith.constant 0.000000e+00 : f32
    %24 = vector.broadcast %cst_10 : f32 to vector<1x16xf32>
    %25 = arith.cmpf one, %23, %24 : vector<1x16xf32>
    %cst_11 = arith.constant 0.000000e+00 : f32
    %cst_12 = arith.constant -1.000000e+10 : f32
    %26 = vector.broadcast %cst_11 : f32 to vector<1x16xf32>
    %27 = vector.broadcast %cst_12 : f32 to vector<1x16xf32>
    %28 = arith.select %25, %26, %27 : vector<1x16xi1>, vector<1x16xf32>
    %c0_13 = arith.constant 0 : index
    %c0_14 = arith.constant 0 : index
    %c0_15 = arith.constant 0 : index
    %29 = vector.load %arg6[%c0_13, %c0_14, %c0_15] : memref<4x32x32xbf16, #tpu.memory_space<vmem>>, vector<1x32x32xbf16>
    %30 = vector.shape_cast %29 : vector<1x32x32xbf16> to vector<32x32xbf16>
    %cst_16 = arith.constant dense<0.000000e+00> : vector<8x32xf32>
    %31 = tpu.matmul %7, %30, %cst_16 {dimension_numbers = #tpu.dot_dimension_numbers<[1], [0], [0], [1], [0, 0, 1, 1], [], []>} : vector<8x32xbf16>, vector<32x32xbf16>, vector<8x32xf32> -> vector<8x32xf32>
    %c0_17 = arith.constant 0 : index
    %c0_18 = arith.constant 0 : index
    %32 = vector.load %arg7[%c0_17, %c0_18] : memref<4x32xf32, #tpu.memory_space<vmem>>, vector<1x32xf32>
    %33 = vector.broadcast %32 : vector<1x32xf32> to vector<8x32xf32>
    %34 = arith.addf %31, %33 : vector<8x32xf32>
    %cst_19 = arith.constant 0.353553385 : f32
    %35 = vector.broadcast %cst_19 : f32 to vector<8x32xf32>
    %36 = arith.mulf %34, %35 : vector<8x32xf32>
    %37 = arith.truncf %36 : vector<8x32xf32> to vector<8x32xbf16>
    %38 = vector.extract_strided_slice %37 {offsets = [0, 0], sizes = [8, 8], strides = [1, 1]} : vector<8x32xbf16> to vector<8x8xbf16>
    %39 = vector.extract_strided_slice %37 {offsets = [0, 8], sizes = [8, 8], strides = [1, 1]} : vector<8x32xbf16> to vector<8x8xbf16>
    %40 = vector.extract_strided_slice %37 {offsets = [0, 16], sizes = [8, 8], strides = [1, 1]} : vector<8x32xbf16> to vector<8x8xbf16>
    %41 = vector.extract_strided_slice %37 {offsets = [0, 24], sizes = [8, 8], strides = [1, 1]} : vector<8x32xbf16> to vector<8x8xbf16>
    %42 = vector.shape_cast %38 : vector<8x8xbf16> to vector<1x8x8xbf16>
    %43 = vector.shape_cast %39 : vector<8x8xbf16> to vector<1x8x8xbf16>
    %44 = vector.shape_cast %40 : vector<8x8xbf16> to vector<1x8x8xbf16>
    %45 = vector.shape_cast %41 : vector<8x8xbf16> to vector<1x8x8xbf16>
    %46 = tpu.concatenate %42, %43, %44, %45 in 0 : vector<1x8x8xbf16>, vector<1x8x8xbf16>, vector<1x8x8xbf16>, vector<1x8x8xbf16> -> vector<4x8x8xbf16>
    %c0_20 = arith.constant 0 : index
    %c0_21 = arith.constant 0 : index
    %c0_22 = arith.constant 0 : index
    %47 = vector.load %arg18[%c0_20, %c0_21, %c0_22] : memref<4x16x8xbf16, #tpu.memory_space<vmem>>, vector<4x16x8xbf16>
    "tpu.trace_start"() <{level = 10 : i32, message = "hqd,hkd->hqk"}> : () -> ()
    %cst_23 = arith.constant dense<0.000000e+00> : vector<4x8x16xf32>
    %48 = tpu.matmul %46, %47, %cst_23 {dimension_numbers = #tpu.dot_dimension_numbers<[2], [2], [1], [1], [0, 0, 0, 1, 1, 1], [0], [0]>} : vector<4x8x8xbf16>, vector<4x16x8xbf16>, vector<4x8x16xf32> -> vector<4x8x16xf32>
    "tpu.trace_stop"() : () -> ()
    %49 = vector.shape_cast %21 : vector<8x16xf32> to vector<1x8x16xf32>
    %50 = vector.broadcast %49 : vector<1x8x16xf32> to vector<4x8x16xf32>
    %51 = arith.addf %48, %50 : vector<4x8x16xf32>
    %cst_24 = arith.constant dense<0xFF800000> : vector<4x8xf32>
    %52 = vector.multi_reduction <maximumf>, %51, %cst_24 [2] : vector<4x8x16xf32> to vector<4x8xf32>
    %53 = vector.shape_cast %52 : vector<4x8xf32> to vector<4x8x1xf32>
    %54 = vector.broadcast %53 : vector<4x8x1xf32> to vector<4x8x16xf32>
    %55 = arith.subf %51, %54 : vector<4x8x16xf32>
    %56 = math.exp %55 : vector<4x8x16xf32>
    %cst_25 = arith.constant dense<0.000000e+00> : vector<4x8xf32>
    %57 = vector.multi_reduction <add>, %56, %cst_25 [2] : vector<4x8x16xf32> to vector<4x8xf32>
    %58 = vector.shape_cast %57 : vector<4x8xf32> to vector<4x8x1xf32>
    %59 = tpu.reciprocal %58 {approx = true} : vector<4x8x1xf32> -> vector<4x8x1xf32>
    %60 = vector.broadcast %59 : vector<4x8x1xf32> to vector<4x8x16xf32>
    %61 = arith.mulf %56, %60 : vector<4x8x16xf32>
    %62 = arith.truncf %61 : vector<4x8x16xf32> to vector<4x8x16xbf16>
    %c0_26 = arith.constant 0 : index
    %c0_27 = arith.constant 0 : index
    %c0_28 = arith.constant 0 : index
    %63 = vector.load %arg19[%c0_26, %c0_27, %c0_28] : memref<4x16x8xbf16, #tpu.memory_space<vmem>>, vector<4x16x8xbf16>
    "tpu.trace_start"() <{level = 10 : i32, message = "hqk,hkd->hqd"}> : () -> ()
    %cst_29 = arith.constant dense<0.000000e+00> : vector<4x8x8xf32>
    %64 = tpu.matmul %62, %63, %cst_29 {dimension_numbers = #tpu.dot_dimension_numbers<[2], [1], [1], [2], [0, 0, 0, 1, 1, 2], [0], [0]>} : vector<4x8x16xbf16>, vector<4x16x8xbf16>, vector<4x8x8xf32> -> vector<4x8x8xf32>
    "tpu.trace_stop"() : () -> ()
    %65 = vector.extract_strided_slice %64 {offsets = [0, 0, 0], sizes = [1, 8, 8], strides = [1, 1, 1]} : vector<4x8x8xf32> to vector<1x8x8xf32>
    %66 = vector.shape_cast %65 : vector<1x8x8xf32> to vector<8x8xf32>
    %67 = vector.extract_strided_slice %64 {offsets = [1, 0, 0], sizes = [1, 8, 8], strides = [1, 1, 1]} : vector<4x8x8xf32> to vector<1x8x8xf32>
    %68 = vector.shape_cast %67 : vector<1x8x8xf32> to vector<8x8xf32>
    %69 = vector.extract_strided_slice %64 {offsets = [2, 0, 0], sizes = [1, 8, 8], strides = [1, 1, 1]} : vector<4x8x8xf32> to vector<1x8x8xf32>
    %70 = vector.shape_cast %69 : vector<1x8x8xf32> to vector<8x8xf32>
    %71 = vector.extract_strided_slice %64 {offsets = [3, 0, 0], sizes = [1, 8, 8], strides = [1, 1, 1]} : vector<4x8x8xf32> to vector<1x8x8xf32>
    %72 = vector.shape_cast %71 : vector<1x8x8xf32> to vector<8x8xf32>
    %73 = tpu.concatenate %66, %68, %70, %72 in 1 : vector<8x8xf32>, vector<8x8xf32>, vector<8x8xf32>, vector<8x8xf32> -> vector<8x32xf32>
    %74 = arith.truncf %73 : vector<8x32xf32> to vector<8x32xbf16>
    %c3 = arith.constant 3 : index
    %c0_30 = arith.constant 0 : index
    %c0_31 = arith.constant 0 : index
    %75 = vector.load %arg6[%c3, %c0_30, %c0_31] : memref<4x32x32xbf16, #tpu.memory_space<vmem>>, vector<1x32x32xbf16>
    %76 = vector.shape_cast %75 : vector<1x32x32xbf16> to vector<32x32xbf16>
    %cst_32 = arith.constant dense<0.000000e+00> : vector<8x32xf32>
    %77 = tpu.matmul %74, %76, %cst_32 {dimension_numbers = #tpu.dot_dimension_numbers<[1], [0], [0], [1], [0, 0, 1, 1], [], []>} : vector<8x32xbf16>, vector<32x32xbf16>, vector<8x32xf32> -> vector<8x32xf32>
    %c3_33 = arith.constant 3 : index
    %c0_34 = arith.constant 0 : index
    %78 = vector.load %arg7[%c3_33, %c0_34] : memref<4x32xf32, #tpu.memory_space<vmem>>, vector<1x32xf32>
    %79 = vector.broadcast %78 : vector<1x32xf32> to vector<8x32xf32>
    %80 = arith.addf %77, %79 : vector<8x32xf32>
    %81 = arith.extf %7 : vector<8x32xbf16> to vector<8x32xf32>
    %82 = arith.addf %81, %80 : vector<8x32xf32>
    %c0_35 = arith.constant 0 : index
    %c0_36 = arith.constant 0 : index
    %83 = vector.load %arg10[%c0_35, %c0_36] : memref<3x32xf32, #tpu.memory_space<vmem>>, vector<1x32xf32>
    %c0_37 = arith.constant 0 : index
    %c0_38 = arith.constant 0 : index
    %84 = vector.load %arg11[%c0_37, %c0_38] : memref<3x32xf32, #tpu.memory_space<vmem>>, vector<1x32xf32>
    %cst_39 = arith.constant dense<0.000000e+00> : vector<8xf32>
    %85 = vector.multi_reduction <add>, %82, %cst_39 [1] : vector<8x32xf32> to vector<8xf32>
    %86 = vector.shape_cast %85 : vector<8xf32> to vector<8x1xf32>
    %cst_40 = arith.constant 3.200000e+01 : f32
    %87 = vector.broadcast %cst_40 : f32 to vector<8x1xf32>
    %88 = arith.divf %86, %87 : vector<8x1xf32>
    %89 = vector.broadcast %88 : vector<8x1xf32> to vector<8x32xf32>
    %90 = arith.subf %82, %89 : vector<8x32xf32>
    %91 = arith.mulf %90, %90 : vector<8x32xf32>
    %cst_41 = arith.constant dense<0.000000e+00> : vector<8xf32>
    %92 = vector.multi_reduction <add>, %91, %cst_41 [1] : vector<8x32xf32> to vector<8xf32>
    %93 = vector.shape_cast %92 : vector<8xf32> to vector<8x1xf32>
    %cst_42 = arith.constant 3.200000e+01 : f32
    %94 = vector.broadcast %cst_42 : f32 to vector<8x1xf32>
    %95 = arith.divf %93, %94 : vector<8x1xf32>
    %96 = vector.broadcast %88 : vector<8x1xf32> to vector<8x32xf32>
    %97 = arith.subf %82, %96 : vector<8x32xf32>
    %cst_43 = arith.constant 9.99999974E-6 : f32
    %98 = vector.broadcast %cst_43 : f32 to vector<8x1xf32>
    %99 = arith.addf %95, %98 : vector<8x1xf32>
    %100 = math.rsqrt %99 : vector<8x1xf32>
    %101 = vector.broadcast %100 : vector<8x1xf32> to vector<8x32xf32>
    %102 = arith.mulf %97, %101 : vector<8x32xf32>
    %103 = vector.broadcast %83 : vector<1x32xf32> to vector<8x32xf32>
    %104 = arith.mulf %102, %103 : vector<8x32xf32>
    %105 = vector.broadcast %84 : vector<1x32xf32> to vector<8x32xf32>
    %106 = arith.addf %104, %105 : vector<8x32xf32>
    %107 = arith.truncf %106 : vector<8x32xf32> to vector<8x32xbf16>
    %c0_44 = arith.constant 0 : index
    %c0_45 = arith.constant 0 : index
    %c0_46 = arith.constant 0 : index
    %108 = vector.load %arg8[%c0_44, %c0_45, %c0_46] : memref<4x32x32xbf16, #tpu.memory_space<vmem>>, vector<1x32x32xbf16>
    %109 = vector.shape_cast %108 : vector<1x32x32xbf16> to vector<32x32xbf16>
    %cst_47 = arith.constant dense<0.000000e+00> : vector<8x32xf32>
    %110 = tpu.matmul %107, %109, %cst_47 {dimension_numbers = #tpu.dot_dimension_numbers<[1], [0], [0], [1], [0, 0, 1, 1], [], []>} : vector<8x32xbf16>, vector<32x32xbf16>, vector<8x32xf32> -> vector<8x32xf32>
    %c0_48 = arith.constant 0 : index
    %c0_49 = arith.constant 0 : index
    %111 = vector.load %arg9[%c0_48, %c0_49] : memref<4x32xf32, #tpu.memory_space<vmem>>, vector<1x32xf32>
    %112 = vector.broadcast %111 : vector<1x32xf32> to vector<8x32xf32>
    %113 = arith.addf %110, %112 : vector<8x32xf32>
    %cst_50 = arith.constant 0.353553385 : f32
    %114 = vector.broadcast %cst_50 : f32 to vector<8x32xf32>
    %115 = arith.mulf %113, %114 : vector<8x32xf32>
    %116 = arith.truncf %115 : vector<8x32xf32> to vector<8x32xbf16>
    %117 = vector.extract_strided_slice %116 {offsets = [0, 0], sizes = [8, 8], strides = [1, 1]} : vector<8x32xbf16> to vector<8x8xbf16>
    %118 = vector.extract_strided_slice %116 {offsets = [0, 8], sizes = [8, 8], strides = [1, 1]} : vector<8x32xbf16> to vector<8x8xbf16>
    %119 = vector.extract_strided_slice %116 {offsets = [0, 16], sizes = [8, 8], strides = [1, 1]} : vector<8x32xbf16> to vector<8x8xbf16>
    %120 = vector.extract_strided_slice %116 {offsets = [0, 24], sizes = [8, 8], strides = [1, 1]} : vector<8x32xbf16> to vector<8x8xbf16>
    %121 = vector.shape_cast %117 : vector<8x8xbf16> to vector<1x8x8xbf16>
    %122 = vector.shape_cast %118 : vector<8x8xbf16> to vector<1x8x8xbf16>
    %123 = vector.shape_cast %119 : vector<8x8xbf16> to vector<1x8x8xbf16>
    %124 = vector.shape_cast %120 : vector<8x8xbf16> to vector<1x8x8xbf16>
    %125 = tpu.concatenate %121, %122, %123, %124 in 0 : vector<1x8x8xbf16>, vector<1x8x8xbf16>, vector<1x8x8xbf16>, vector<1x8x8xbf16> -> vector<4x8x8xbf16>
    %c0_51 = arith.constant 0 : index
    %c0_52 = arith.constant 0 : index
    %c0_53 = arith.constant 0 : index
    %126 = vector.load %arg20[%c0_51, %c0_52, %c0_53] : memref<4x16x8xbf16, #tpu.memory_space<vmem>>, vector<4x16x8xbf16>
    "tpu.trace_start"() <{level = 10 : i32, message = "hqd,hkd->hqk"}> : () -> ()
    %cst_54 = arith.constant dense<0.000000e+00> : vector<4x8x16xf32>
    %127 = tpu.matmul %125, %126, %cst_54 {dimension_numbers = #tpu.dot_dimension_numbers<[2], [2], [1], [1], [0, 0, 0, 1, 1, 1], [0], [0]>} : vector<4x8x8xbf16>, vector<4x16x8xbf16>, vector<4x8x16xf32> -> vector<4x8x16xf32>
    "tpu.trace_stop"() : () -> ()
    %128 = vector.shape_cast %28 : vector<1x16xf32> to vector<1x1x16xf32>
    %129 = vector.broadcast %128 : vector<1x1x16xf32> to vector<4x8x16xf32>
    %130 = arith.addf %127, %129 : vector<4x8x16xf32>
    %cst_55 = arith.constant dense<0xFF800000> : vector<4x8xf32>
    %131 = vector.multi_reduction <maximumf>, %130, %cst_55 [2] : vector<4x8x16xf32> to vector<4x8xf32>
    %132 = vector.shape_cast %131 : vector<4x8xf32> to vector<4x8x1xf32>
    %133 = vector.broadcast %132 : vector<4x8x1xf32> to vector<4x8x16xf32>
    %134 = arith.subf %130, %133 : vector<4x8x16xf32>
    %135 = math.exp %134 : vector<4x8x16xf32>
    %cst_56 = arith.constant dense<0.000000e+00> : vector<4x8xf32>
    %136 = vector.multi_reduction <add>, %135, %cst_56 [2] : vector<4x8x16xf32> to vector<4x8xf32>
    %137 = vector.shape_cast %136 : vector<4x8xf32> to vector<4x8x1xf32>
    %138 = tpu.reciprocal %137 : vector<4x8x1xf32> -> vector<4x8x1xf32>
    %139 = vector.broadcast %138 : vector<4x8x1xf32> to vector<4x8x16xf32>
    %140 = arith.mulf %135, %139 : vector<4x8x16xf32>
    %141 = arith.truncf %140 : vector<4x8x16xf32> to vector<4x8x16xbf16>
    %c0_57 = arith.constant 0 : index
    %c0_58 = arith.constant 0 : index
    %c0_59 = arith.constant 0 : index
    %c0_60 = arith.constant 0 : index
    %142 = vector.load %arg17[%c0_57, %c0_58, %c0_59, %c0_60] : memref<1x4x8x16xbf16, #tpu.memory_space<vmem>>, vector<1x4x8x16xbf16>
    %143 = vector.shape_cast %142 : vector<1x4x8x16xbf16> to vector<4x8x16xbf16>
    %144 = vector.shape_cast %141 : vector<4x8x16xbf16> to vector<1x4x8x16xbf16>
    tpu.vector_store %arg17[%c0_57, %c0_58, %c0_59, %c0_60], %144 {strides = array<i32>} : memref<1x4x8x16xbf16, #tpu.memory_space<vmem>>, vector<1x4x8x16xbf16>,
    %145 = arith.truncf %140 : vector<4x8x16xf32> to vector<4x8x16xbf16>
    %c0_61 = arith.constant 0 : index
    %c0_62 = arith.constant 0 : index
    %c0_63 = arith.constant 0 : index
    %146 = vector.load %arg21[%c0_61, %c0_62, %c0_63] : memref<4x16x8xbf16, #tpu.memory_space<vmem>>, vector<4x16x8xbf16>
    "tpu.trace_start"() <{level = 10 : i32, message = "hqk,hkd->hqd"}> : () -> ()
    %cst_64 = arith.constant dense<0.000000e+00> : vector<4x8x8xf32>
    %147 = tpu.matmul %145, %146, %cst_64 {dimension_numbers = #tpu.dot_dimension_numbers<[2], [1], [1], [2], [0, 0, 0, 1, 1, 2], [0], [0]>} : vector<4x8x16xbf16>, vector<4x16x8xbf16>, vector<4x8x8xf32> -> vector<4x8x8xf32>
    "tpu.trace_stop"() : () -> ()
    %148 = vector.extract_strided_slice %147 {offsets = [0, 0, 0], sizes = [1, 8, 8], strides = [1, 1, 1]} : vector<4x8x8xf32> to vector<1x8x8xf32>
    %149 = vector.shape_cast %148 : vector<1x8x8xf32> to vector<8x8xf32>
    %150 = vector.extract_strided_slice %147 {offsets = [1, 0, 0], sizes = [1, 8, 8], strides = [1, 1, 1]} : vector<4x8x8xf32> to vector<1x8x8xf32>
    %151 = vector.shape_cast %150 : vector<1x8x8xf32> to vector<8x8xf32>
    %152 = vector.extract_strided_slice %147 {offsets = [2, 0, 0], sizes = [1, 8, 8], strides = [1, 1, 1]} : vector<4x8x8xf32> to vector<1x8x8xf32>
    %153 = vector.shape_cast %152 : vector<1x8x8xf32> to vector<8x8xf32>
    %154 = vector.extract_strided_slice %147 {offsets = [3, 0, 0], sizes = [1, 8, 8], strides = [1, 1, 1]} : vector<4x8x8xf32> to vector<1x8x8xf32>
    %155 = vector.shape_cast %154 : vector<1x8x8xf32> to vector<8x8xf32>
    %156 = tpu.concatenate %149, %151, %153, %155 in 1 : vector<8x8xf32>, vector<8x8xf32>, vector<8x8xf32>, vector<8x8xf32> -> vector<8x32xf32>
    %157 = arith.truncf %156 : vector<8x32xf32> to vector<8x32xbf16>
    %c3_65 = arith.constant 3 : index
    %c0_66 = arith.constant 0 : index
    %c0_67 = arith.constant 0 : index
    %158 = vector.load %arg8[%c3_65, %c0_66, %c0_67] : memref<4x32x32xbf16, #tpu.memory_space<vmem>>, vector<1x32x32xbf16>
    %159 = vector.shape_cast %158 : vector<1x32x32xbf16> to vector<32x32xbf16>
    %cst_68 = arith.constant dense<0.000000e+00> : vector<8x32xf32>
    %160 = tpu.matmul %157, %159, %cst_68 {dimension_numbers = #tpu.dot_dimension_numbers<[1], [0], [0], [1], [0, 0, 1, 1], [], []>} : vector<8x32xbf16>, vector<32x32xbf16>, vector<8x32xf32> -> vector<8x32xf32>
    %c3_69 = arith.constant 3 : index
    %c0_70 = arith.constant 0 : index
    %161 = vector.load %arg9[%c3_69, %c0_70] : memref<4x32xf32, #tpu.memory_space<vmem>>, vector<1x32xf32>
    %162 = vector.broadcast %161 : vector<1x32xf32> to vector<8x32xf32>
    %163 = arith.addf %160, %162 : vector<8x32xf32>
    %164 = arith.addf %106, %163 : vector<8x32xf32>
    %c1 = arith.constant 1 : index
    %c0_71 = arith.constant 0 : index
    %165 = vector.load %arg10[%c1, %c0_71] : memref<3x32xf32, #tpu.memory_space<vmem>>, vector<1x32xf32>
    %c1_72 = arith.constant 1 : index
    %c0_73 = arith.constant 0 : index
    %166 = vector.load %arg11[%c1_72, %c0_73] : memref<3x32xf32, #tpu.memory_space<vmem>>, vector<1x32xf32>
    %cst_74 = arith.constant dense<0.000000e+00> : vector<8xf32>
    %167 = vector.multi_reduction <add>, %164, %cst_74 [1] : vector<8x32xf32> to vector<8xf32>
    %168 = vector.shape_cast %167 : vector<8xf32> to vector<8x1xf32>
    %cst_75 = arith.constant 3.200000e+01 : f32
    %169 = vector.broadcast %cst_75 : f32 to vector<8x1xf32>
    %170 = arith.divf %168, %169 : vector<8x1xf32>
    %171 = vector.broadcast %170 : vector<8x1xf32> to vector<8x32xf32>
    %172 = arith.subf %164, %171 : vector<8x32xf32>
    %173 = arith.mulf %172, %172 : vector<8x32xf32>
    %cst_76 = arith.constant dense<0.000000e+00> : vector<8xf32>
    %174 = vector.multi_reduction <add>, %173, %cst_76 [1] : vector<8x32xf32> to vector<8xf32>
    %175 = vector.shape_cast %174 : vector<8xf32> to vector<8x1xf32>
    %cst_77 = arith.constant 3.200000e+01 : f32
    %176 = vector.broadcast %cst_77 : f32 to vector<8x1xf32>
    %177 = arith.divf %175, %176 : vector<8x1xf32>
    %178 = vector.broadcast %170 : vector<8x1xf32> to vector<8x32xf32>
    %179 = arith.subf %164, %178 : vector<8x32xf32>
    %cst_78 = arith.constant 9.99999974E-6 : f32
    %180 = vector.broadcast %cst_78 : f32 to vector<8x1xf32>
    %181 = arith.addf %177, %180 : vector<8x1xf32>
    %182 = math.rsqrt %181 : vector<8x1xf32>
    %183 = vector.broadcast %182 : vector<8x1xf32> to vector<8x32xf32>
    %184 = arith.mulf %179, %183 : vector<8x32xf32>
    %185 = vector.broadcast %165 : vector<1x32xf32> to vector<8x32xf32>
    %186 = arith.mulf %184, %185 : vector<8x32xf32>
    %187 = vector.broadcast %166 : vector<1x32xf32> to vector<8x32xf32>
    %188 = arith.addf %186, %187 : vector<8x32xf32>
    %189 = arith.truncf %188 : vector<8x32xf32> to vector<8x32xbf16>
    %c0_79 = arith.constant 0 : index
    %c0_80 = arith.constant 0 : index
    %190 = vector.load %arg12[%c0_79, %c0_80] : memref<32x64xbf16, #tpu.memory_space<vmem>>, vector<32x64xbf16>
    %cst_81 = arith.constant dense<0.000000e+00> : vector<8x64xf32>
    %191 = tpu.matmul %189, %190, %cst_81 {dimension_numbers = #tpu.dot_dimension_numbers<[1], [0], [0], [1], [0, 0, 1, 1], [], []>} : vector<8x32xbf16>, vector<32x64xbf16>, vector<8x64xf32> -> vector<8x64xf32>
    %c0_82 = arith.constant 0 : index
    %c0_83 = arith.constant 0 : index
    %192 = vector.load %arg13[%c0_82, %c0_83] : memref<1x64xf32, #tpu.memory_space<vmem>>, vector<1x64xf32>
    %193 = vector.broadcast %192 : vector<1x64xf32> to vector<8x64xf32>
    %194 = arith.addf %191, %193 : vector<8x64xf32>
    %cst_84 = arith.constant 0.000000e+00 : f32
    %195 = vector.broadcast %cst_84 : f32 to vector<8x64xf32>
    %196 = arith.maximumf %194, %195 : vector<8x64xf32>
    %197 = arith.truncf %196 : vector<8x64xf32> to vector<8x64xbf16>
    %c0_85 = arith.constant 0 : index
    %c0_86 = arith.constant 0 : index
    %198 = vector.load %arg14[%c0_85, %c0_86] : memref<64x32xbf16, #tpu.memory_space<vmem>>, vector<64x32xbf16>
    %cst_87 = arith.constant dense<0.000000e+00> : vector<8x32xf32>
    %199 = tpu.matmul %197, %198, %cst_87 {dimension_numbers = #tpu.dot_dimension_numbers<[1], [0], [0], [1], [0, 0, 1, 1], [], []>} : vector<8x64xbf16>, vector<64x32xbf16>, vector<8x32xf32> -> vector<8x32xf32>
    %c0_88 = arith.constant 0 : index
    %c0_89 = arith.constant 0 : index
    %200 = vector.load %arg15[%c0_88, %c0_89] : memref<1x32xf32, #tpu.memory_space<vmem>>, vector<1x32xf32>
    %201 = vector.broadcast %200 : vector<1x32xf32> to vector<8x32xf32>
    %202 = arith.addf %199, %201 : vector<8x32xf32>
    %203 = arith.addf %188, %202 : vector<8x32xf32>
    %c2 = arith.constant 2 : index
    %c0_90 = arith.constant 0 : index
    %204 = vector.load %arg10[%c2, %c0_90] : memref<3x32xf32, #tpu.memory_space<vmem>>, vector<1x32xf32>
    %c2_91 = arith.constant 2 : index
    %c0_92 = arith.constant 0 : index
    %205 = vector.load %arg11[%c2_91, %c0_92] : memref<3x32xf32, #tpu.memory_space<vmem>>, vector<1x32xf32>
    %cst_93 = arith.constant dense<0.000000e+00> : vector<8xf32>
    %206 = vector.multi_reduction <add>, %203, %cst_93 [1] : vector<8x32xf32> to vector<8xf32>
    %207 = vector.shape_cast %206 : vector<8xf32> to vector<8x1xf32>
    %cst_94 = arith.constant 3.200000e+01 : f32
    %208 = vector.broadcast %cst_94 : f32 to vector<8x1xf32>
    %209 = arith.divf %207, %208 : vector<8x1xf32>
    %210 = vector.broadcast %209 : vector<8x1xf32> to vector<8x32xf32>
    %211 = arith.subf %203, %210 : vector<8x32xf32>
    %212 = arith.mulf %211, %211 : vector<8x32xf32>
    %cst_95 = arith.constant dense<0.000000e+00> : vector<8xf32>
    %213 = vector.multi_reduction <add>, %212, %cst_95 [1] : vector<8x32xf32> to vector<8xf32>
    %214 = vector.shape_cast %213 : vector<8xf32> to vector<8x1xf32>
    %cst_96 = arith.constant 3.200000e+01 : f32
    %215 = vector.broadcast %cst_96 : f32 to vector<8x1xf32>
    %216 = arith.divf %214, %215 : vector<8x1xf32>
    %217 = vector.broadcast %209 : vector<8x1xf32> to vector<8x32xf32>
    %218 = arith.subf %203, %217 : vector<8x32xf32>
    %cst_97 = arith.constant 9.99999974E-6 : f32
    %219 = vector.broadcast %cst_97 : f32 to vector<8x1xf32>
    %220 = arith.addf %216, %219 : vector<8x1xf32>
    %221 = math.rsqrt %220 : vector<8x1xf32>
    %222 = vector.broadcast %221 : vector<8x1xf32> to vector<8x32xf32>
    %223 = arith.mulf %218, %222 : vector<8x32xf32>
    %224 = vector.broadcast %204 : vector<1x32xf32> to vector<8x32xf32>
    %225 = arith.mulf %223, %224 : vector<8x32xf32>
    %226 = vector.broadcast %205 : vector<1x32xf32> to vector<8x32xf32>
    %227 = arith.addf %225, %226 : vector<8x32xf32>
    %c0_98 = arith.constant 0 : index
    %c0_99 = arith.constant 0 : index
    %c0_100 = arith.constant 0 : index
    %228 = vector.load %arg16[%c0_98, %c0_99, %c0_100] : memref<1x8x32xf32, #tpu.memory_space<vmem>>, vector<1x8x32xf32>
    %229 = vector.shape_cast %228 : vector<1x8x32xf32> to vector<8x32xf32>
    %230 = vector.shape_cast %227 : vector<8x32xf32> to vector<1x8x32xf32>
    tpu.vector_store %arg16[%c0_98, %c0_99, %c0_100], %230 {strides = array<i32>} : memref<1x8x32xf32, #tpu.memory_space<vmem>>, vector<1x8x32xf32>,
    return
  }
  func.func @transform_0(%arg0: i32, %arg1: i32) -> (i32, i32, i32) {
    %c0_i32 = arith.constant 0 : i32
    %c0_i32_0 = arith.constant 0 : i32
    %c0_i32_1 = arith.constant 0 : i32
    return %arg0, %c0_i32, %c0_i32_0 : i32, i32, i32
  }
  func.func @transform_1(%arg0: i32, %arg1: i32) -> (i32, i32, i32) {
    %c0_i32 = arith.constant 0 : i32
    %c0_i32_0 = arith.constant 0 : i32
    %c0_i32_1 = arith.constant 0 : i32
    return %arg0, %c0_i32, %c0_i32_0 : i32, i32, i32
  }
  func.func @transform_2(%arg0: i32, %arg1: i32) -> (i32, i32, i32) {
    %c0_i32 = arith.constant 0 : i32
    %c0_i32_0 = arith.constant 0 : i32
    %c0_i32_1 = arith.constant 0 : i32
    return %arg0, %c0_i32, %c0_i32_0 : i32, i32, i32
  }
  func.func @transform_3(%arg0: i32, %arg1: i32) -> (i32, i32, i32) {
    %c0_i32 = arith.constant 0 : i32
    %c0_i32_0 = arith.constant 0 : i32
    %c0_i32_1 = arith.constant 0 : i32
    return %arg0, %c0_i32, %c0_i32_0 : i32, i32, i32
  }
  func.func @transform_4(%arg0: i32, %arg1: i32) -> (i32, i32, i32) {
    %c0_i32 = arith.constant 0 : i32
    %c0_i32_0 = arith.constant 0 : i32
    %c0_i32_1 = arith.constant 0 : i32
    %c0_i32_2 = arith.constant 0 : i32
    return %c0_i32, %c0_i32_0, %c0_i32_1 : i32, i32, i32
  }
  func.func @transform_5(%arg0: i32, %arg1: i32) -> (i32, i32) {
    %c0_i32 = arith.constant 0 : i32
    %c0_i32_0 = arith.constant 0 : i32
    %c0_i32_1 = arith.constant 0 : i32
    return %c0_i32, %c0_i32_0 : i32, i32
  }
  func.func @transform_6(%arg0: i32, %arg1: i32) -> (i32, i32, i32) {
    %c0_i32 = arith.constant 0 : i32
    %c0_i32_0 = arith.constant 0 : i32
    %c0_i32_1 = arith.constant 0 : i32
    %c0_i32_2 = arith.constant 0 : i32
    return %c0_i32, %c0_i32_0, %c0_i32_1 : i32, i32, i32
  }
  func.func @transform_7(%arg0: i32, %arg1: i32) -> (i32, i32) {
    %c0_i32 = arith.constant 0 : i32
    %c0_i32_0 = arith.constant 0 : i32
    %c0_i32_1 = arith.constant 0 : i32
    return %c0_i32, %c0_i32_0 : i32, i32
  }
  func.func @transform_8(%arg0: i32, %arg1: i32) -> (i32, i32) {
    %c0_i32 = arith.constant 0 : i32
    %c0_i32_0 = arith.constant 0 : i32
    %c0_i32_1 = arith.constant 0 : i32
    return %c0_i32, %c0_i32_0 : i32, i32
  }
  func.func @transform_9(%arg0: i32, %arg1: i32) -> (i32, i32) {
    %c0_i32 = arith.constant 0 : i32
    %c0_i32_0 = arith.constant 0 : i32
    %c0_i32_1 = arith.constant 0 : i32
    return %c0_i32, %c0_i32_0 : i32, i32
  }
  func.func @transform_10(%arg0: i32, %arg1: i32) -> (i32, i32) {
    %c0_i32 = arith.constant 0 : i32
    %c0_i32_0 = arith.constant 0 : i32
    %c0_i32_1 = arith.constant 0 : i32
    return %c0_i32, %c0_i32_0 : i32, i32
  }
  func.func @transform_11(%arg0: i32, %arg1: i32) -> (i32, i32) {
    %c0_i32 = arith.constant 0 : i32
    %c0_i32_0 = arith.constant 0 : i32
    %c0_i32_1 = arith.constant 0 : i32
    return %c0_i32, %c0_i32_0 : i32, i32
  }
  func.func @transform_12(%arg0: i32, %arg1: i32) -> (i32, i32) {
    %c0_i32 = arith.constant 0 : i32
    %c0_i32_0 = arith.constant 0 : i32
    %c0_i32_1 = arith.constant 0 : i32
    return %c0_i32, %c0_i32_0 : i32, i32
  }
  func.func @transform_13(%arg0: i32, %arg1: i32) -> (i32, i32) {
    %c0_i32 = arith.constant 0 : i32
    %c0_i32_0 = arith.constant 0 : i32
    %c0_i32_1 = arith.constant 0 : i32
    return %c0_i32, %c0_i32_0 : i32, i32
  }
  func.func @transform_14(%arg0: i32, %arg1: i32) -> (i32, i32, i32) {
    %c0_i32 = arith.constant 0 : i32
    %c0_i32_0 = arith.constant 0 : i32
    return %arg0, %arg1, %c0_i32 : i32, i32, i32
  }
  func.func @transform_15(%arg0: i32, %arg1: i32) -> (i32, i32, i32, i32) {
    %c0_i32 = arith.constant 0 : i32
    %c0_i32_0 = arith.constant 0 : i32
    %c0_i32_1 = arith.constant 0 : i32
    return %arg0, %c0_i32, %arg1, %c0_i32_0 : i32, i32, i32, i32
  }
}

module attributes {stable_mosaic.version = 11 : i64} {
  func.func @_decoder_layer_kernel(%arg0: i32, %arg1: i32, %arg2: memref<1x16x32xbf16, #tpu.memory_space<vmem>>, %arg3: memref<1x16x32xbf16, #tpu.memory_space<vmem>>, %arg4: memref<1x1x16xf32, #tpu.memory_space<vmem>>, %arg5: memref<1x1x16xf32, #tpu.memory_space<vmem>>, %arg6: memref<4x32x32xbf16, #tpu.memory_space<vmem>>, %arg7: memref<4x32xf32, #tpu.memory_space<vmem>>, %arg8: memref<4x32x32xbf16, #tpu.memory_space<vmem>>, %arg9: memref<4x32xf32, #tpu.memory_space<vmem>>, %arg10: memref<3x32xf32, #tpu.memory_space<vmem>>, %arg11: memref<3x32xf32, #tpu.memory_space<vmem>>, %arg12: memref<32x64xbf16, #tpu.memory_space<vmem>>, %arg13: memref<1x64xf32, #tpu.memory_space<vmem>>, %arg14: memref<64x32xbf16, #tpu.memory_space<vmem>>, %arg15: memref<1x32xf32, #tpu.memory_space<vmem>>, %arg16: memref<1x8x32xf32, #tpu.memory_space<vmem>>, %arg17: memref<1x4x8x16xbf16, #tpu.memory_space<vmem>>, %arg18: memref<4x16x8xbf16, #tpu.memory_space<vmem>>, %arg19: memref<4x16x8xbf16, #tpu.memory_space<vmem>>, %arg20: memref<4x16x8xbf16, #tpu.memory_space<vmem>>, %arg21: memref<4x16x8xbf16, #tpu.memory_space<vmem>>) attributes {dimension_semantics = [#tpu.dimension_semantics<parallel>, #tpu.dimension_semantics<arbitrary>], iteration_bounds = array<i64: 2, 2>, scalar_prefetch = 0 : i64, scratch_operands = 4 : i64, tpu.core_type = #tpu.core_type<tc>, window_params = [{transform_indices = @transform_0, window_bounds = array<i64: 1, 16, 32>}, {transform_indices = @transform_1, window_bounds = array<i64: 1, 16, 32>}, {transform_indices = @transform_2, window_bounds = array<i64: 1, 1, 16>}, {transform_indices = @transform_3, window_bounds = array<i64: 1, 1, 16>}, {pipeline_mode = #tpu.pipeline_mode<synchronous>, transform_indices = @transform_4, window_bounds = array<i64: 4, 32, 32>}, {pipeline_mode = #tpu.pipeline_mode<synchronous>, transform_indices = @transform_5, window_bounds = array<i64: 4, 32>}, {pipeline_mode = #tpu.pipeline_mode<synchronous>, transform_indices = @transform_6, window_bounds = array<i64: 4, 32, 32>}, {pipeline_mode = #tpu.pipeline_mode<synchronous>, transform_indices = @transform_7, window_bounds = array<i64: 4, 32>}, {pipeline_mode = #tpu.pipeline_mode<synchronous>, transform_indices = @transform_8, window_bounds = array<i64: 3, 32>}, {pipeline_mode = #tpu.pipeline_mode<synchronous>, transform_indices = @transform_9, window_bounds = array<i64: 3, 32>}, {pipeline_mode = #tpu.pipeline_mode<synchronous>, transform_indices = @transform_10, window_bounds = array<i64: 32, 64>}, {pipeline_mode = #tpu.pipeline_mode<synchronous>, transform_indices = @transform_11, window_bounds = array<i64: 1, 64>}, {pipeline_mode = #tpu.pipeline_mode<synchronous>, transform_indices = @transform_12, window_bounds = array<i64: 64, 32>}, {pipeline_mode = #tpu.pipeline_mode<synchronous>, transform_indices = @transform_13, window_bounds = array<i64: 1, 32>}, {transform_indices = @transform_14, window_bounds = array<i64: 1, 8, 32>}, {transform_indices = @transform_15, window_bounds = array<i64: 1, 4, 8, 16>}]} {
    %c8_i32 = arith.constant 8 : i32
    %0 = arith.muli %arg1, %c8_i32 : i32
    %1 = tpu.assume_multiple %0, 8 : i32
    %c0_i32 = arith.constant 0 : i32
    %2 = arith.cmpi eq, %arg1, %c0_i32 : i32
    %3 = arith.extui %2 : i1 to i32
    %c0_i32_0 = arith.constant 0 : i32
    %4 = arith.cmpi ne, %3, %c0_i32_0 : i32
    scf.if %4 {
      %c0_101 = arith.constant 0 : index
      %c0_102 = arith.constant 0 : index
      %c0_103 = arith.constant 0 : index
      %231 = vector.load %arg2[%c0_101, %c0_102, %c0_103] : memref<1x16x32xbf16, #tpu.memory_space<vmem>>, vector<1x16x32xbf16>
      %232 = vector.shape_cast %231 : vector<1x16x32xbf16> to vector<16x32xbf16>
      %c1_104 = arith.constant 1 : index
      %c0_105 = arith.constant 0 : index
      %c0_106 = arith.constant 0 : index
      %233 = vector.load %arg6[%c1_104, %c0_105, %c0_106] : memref<4x32x32xbf16, #tpu.memory_space<vmem>>, vector<1x32x32xbf16>
      %234 = vector.shape_cast %233 : vector<1x32x32xbf16> to vector<32x32xbf16>
      %cst_107 = arith.constant dense<0.000000e+00> : vector<16x32xf32>
      %235 = tpu.matmul %232, %234, %cst_107 {dimension_numbers = #tpu.dot_dimension_numbers<[1], [0], [0], [1], [0, 0, 1, 1], [], []>} : vector<16x32xbf16>, vector<32x32xbf16>, vector<16x32xf32> -> vector<16x32xf32>
      %c1_108 = arith.constant 1 : index
      %c0_109 = arith.constant 0 : index
      %236 = vector.load %arg7[%c1_108, %c0_109] : memref<4x32xf32, #tpu.memory_space<vmem>>, vector<1x32xf32>
      %237 = vector.broadcast %236 : vector<1x32xf32> to vector<16x32xf32>
      %238 = arith.addf %235, %237 : vector<16x32xf32>
      %239 = arith.truncf %238 : vector<16x32xf32> to vector<16x32xbf16>
      %c2_110 = arith.constant 2 : index
      %c0_111 = arith.constant 0 : index
      %c0_112 = arith.constant 0 : index
      %240 = vector.load %arg6[%c2_110, %c0_111, %c0_112] : memref<4x32x32xbf16, #tpu.memory_space<vmem>>, vector<1x32x32xbf16>
      %241 = vector.shape_cast %240 : vector<1x32x32xbf16> to vector<32x32xbf16>
      %cst_113 = arith.constant dense<0.000000e+00> : vector<16x32xf32>
      %242 = tpu.matmul %232, %241, %cst_113 {dimension_numbers = #tpu.dot_dimension_numbers<[1], [0], [0], [1], [0, 0, 1, 1], [], []>} : vector<16x32xbf16>, vector<32x32xbf16>, vector<16x32xf32> -> vector<16x32xf32>
      %c2_114 = arith.constant 2 : index
      %c0_115 = arith.constant 0 : index
      %243 = vector.load %arg7[%c2_114, %c0_115] : memref<4x32xf32, #tpu.memory_space<vmem>>, vector<1x32xf32>
      %244 = vector.broadcast %243 : vector<1x32xf32> to vector<16x32xf32>
      %245 = arith.addf %242, %244 : vector<16x32xf32>
      %246 = arith.truncf %245 : vector<16x32xf32> to vector<16x32xbf16>
      %247 = vector.extract_strided_slice %239 {offsets = [0, 0], sizes = [16, 8], strides = [1, 1]} : vector<16x32xbf16> to vector<16x8xbf16>
      %c0_116 = arith.constant 0 : index
      %c0_117 = arith.constant 0 : index
      %c0_118 = arith.constant 0 : index
      %248 = vector.load %arg18[%c0_116, %c0_117, %c0_118] : memref<4x16x8xbf16, #tpu.memory_space<vmem>>, vector<1x16x8xbf16>
      %249 = vector.shape_cast %248 : vector<1x16x8xbf16> to vector<16x8xbf16>
      %250 = vector.shape_cast %247 : vector<16x8xbf16> to vector<1x16x8xbf16>
      tpu.vector_store %arg18[%c0_116, %c0_117, %c0_118], %250 {strides = array<i32>} : memref<4x16x8xbf16, #tpu.memory_space<vmem>>, vector<1x16x8xbf16>,
      %251 = vector.extract_strided_slice %246 {offsets = [0, 0], sizes = [16, 8], strides = [1, 1]} : vector<16x32xbf16> to vector<16x8xbf16>
      %c0_119 = arith.constant 0 : index
      %c0_120 = arith.constant 0 : index
      %c0_121 = arith.constant 0 : index
      %252 = vector.load %arg19[%c0_119, %c0_120, %c0_121] : memref<4x16x8xbf16, #tpu.memory_space<vmem>>, vector<1x16x8xbf16>
      %253 = vector.shape_cast %252 : vector<1x16x8xbf16> to vector<16x8xbf16>
      %254 = vector.shape_cast %251 : vector<16x8xbf16> to vector<1x16x8xbf16>
      tpu.vector_store %arg19[%c0_119, %c0_120, %c0_121], %254 {strides = array<i32>} : memref<4x16x8xbf16, #tpu.memory_space<vmem>>, vector<1x16x8xbf16>,
      %255 = vector.extract_strided_slice %239 {offsets = [0, 8], sizes = [16, 8], strides = [1, 1]} : vector<16x32xbf16> to vector<16x8xbf16>
      %c1_122 = arith.constant 1 : index
      %c0_123 = arith.constant 0 : index
      %c0_124 = arith.constant 0 : index
      %256 = vector.load %arg18[%c1_122, %c0_123, %c0_124] : memref<4x16x8xbf16, #tpu.memory_space<vmem>>, vector<1x16x8xbf16>
      %257 = vector.shape_cast %256 : vector<1x16x8xbf16> to vector<16x8xbf16>
      %258 = vector.shape_cast %255 : vector<16x8xbf16> to vector<1x16x8xbf16>
      tpu.vector_store %arg18[%c1_122, %c0_123, %c0_124], %258 {strides = array<i32>} : memref<4x16x8xbf16, #tpu.memory_space<vmem>>, vector<1x16x8xbf16>,
      %259 = vector.extract_strided_slice %246 {offsets = [0, 8], sizes = [16, 8], strides = [1, 1]} : vector<16x32xbf16> to vector<16x8xbf16>
      %c1_125 = arith.constant 1 : index
      %c0_126 = arith.constant 0 : index
      %c0_127 = arith.constant 0 : index
      %260 = vector.load %arg19[%c1_125, %c0_126, %c0_127] : memref<4x16x8xbf16, #tpu.memory_space<vmem>>, vector<1x16x8xbf16>
      %261 = vector.shape_cast %260 : vector<1x16x8xbf16> to vector<16x8xbf16>
      %262 = vector.shape_cast %259 : vector<16x8xbf16> to vector<1x16x8xbf16>
      tpu.vector_store %arg19[%c1_125, %c0_126, %c0_127], %262 {strides = array<i32>} : memref<4x16x8xbf16, #tpu.memory_space<vmem>>, vector<1x16x8xbf16>,
      %263 = vector.extract_strided_slice %239 {offsets = [0, 16], sizes = [16, 8], strides = [1, 1]} : vector<16x32xbf16> to vector<16x8xbf16>
      %c2_128 = arith.constant 2 : index
      %c0_129 = arith.constant 0 : index
      %c0_130 = arith.constant 0 : index
      %264 = vector.load %arg18[%c2_128, %c0_129, %c0_130] : memref<4x16x8xbf16, #tpu.memory_space<vmem>>, vector<1x16x8xbf16>
      %265 = vector.shape_cast %264 : vector<1x16x8xbf16> to vector<16x8xbf16>
      %266 = vector.shape_cast %263 : vector<16x8xbf16> to vector<1x16x8xbf16>
      tpu.vector_store %arg18[%c2_128, %c0_129, %c0_130], %266 {strides = array<i32>} : memref<4x16x8xbf16, #tpu.memory_space<vmem>>, vector<1x16x8xbf16>,
      %267 = vector.extract_strided_slice %246 {offsets = [0, 16], sizes = [16, 8], strides = [1, 1]} : vector<16x32xbf16> to vector<16x8xbf16>
      %c2_131 = arith.constant 2 : index
      %c0_132 = arith.constant 0 : index
      %c0_133 = arith.constant 0 : index
      %268 = vector.load %arg19[%c2_131, %c0_132, %c0_133] : memref<4x16x8xbf16, #tpu.memory_space<vmem>>, vector<1x16x8xbf16>
      %269 = vector.shape_cast %268 : vector<1x16x8xbf16> to vector<16x8xbf16>
      %270 = vector.shape_cast %267 : vector<16x8xbf16> to vector<1x16x8xbf16>
      tpu.vector_store %arg19[%c2_131, %c0_132, %c0_133], %270 {strides = array<i32>} : memref<4x16x8xbf16, #tpu.memory_space<vmem>>, vector<1x16x8xbf16>,
      %271 = vector.extract_strided_slice %239 {offsets = [0, 24], sizes = [16, 8], strides = [1, 1]} : vector<16x32xbf16> to vector<16x8xbf16>
      %c3_134 = arith.constant 3 : index
      %c0_135 = arith.constant 0 : index
      %c0_136 = arith.constant 0 : index
      %272 = vector.load %arg18[%c3_134, %c0_135, %c0_136] : memref<4x16x8xbf16, #tpu.memory_space<vmem>>, vector<1x16x8xbf16>
      %273 = vector.shape_cast %272 : vector<1x16x8xbf16> to vector<16x8xbf16>
      %274 = vector.shape_cast %271 : vector<16x8xbf16> to vector<1x16x8xbf16>
      tpu.vector_store %arg18[%c3_134, %c0_135, %c0_136], %274 {strides = array<i32>} : memref<4x16x8xbf16, #tpu.memory_space<vmem>>, vector<1x16x8xbf16>,
      %275 = vector.extract_strided_slice %246 {offsets = [0, 24], sizes = [16, 8], strides = [1, 1]} : vector<16x32xbf16> to vector<16x8xbf16>
      %c3_137 = arith.constant 3 : index
      %c0_138 = arith.constant 0 : index
      %c0_139 = arith.constant 0 : index
      %276 = vector.load %arg19[%c3_137, %c0_138, %c0_139] : memref<4x16x8xbf16, #tpu.memory_space<vmem>>, vector<1x16x8xbf16>
      %277 = vector.shape_cast %276 : vector<1x16x8xbf16> to vector<16x8xbf16>
      %278 = vector.shape_cast %275 : vector<16x8xbf16> to vector<1x16x8xbf16>
      tpu.vector_store %arg19[%c3_137, %c0_138, %c0_139], %278 {strides = array<i32>} : memref<4x16x8xbf16, #tpu.memory_space<vmem>>, vector<1x16x8xbf16>,
      %c0_140 = arith.constant 0 : index
      %c0_141 = arith.constant 0 : index
      %c0_142 = arith.constant 0 : index
      %279 = vector.load %arg3[%c0_140, %c0_141, %c0_142] : memref<1x16x32xbf16, #tpu.memory_space<vmem>>, vector<1x16x32xbf16>
      %280 = vector.shape_cast %279 : vector<1x16x32xbf16> to vector<16x32xbf16>
      %c1_143 = arith.constant 1 : index
      %c0_144 = arith.constant 0 : index
      %c0_145 = arith.constant 0 : index
      %281 = vector.load %arg8[%c1_143, %c0_144, %c0_145] : memref<4x32x32xbf16, #tpu.memory_space<vmem>>, vector<1x32x32xbf16>
      %282 = vector.shape_cast %281 : vector<1x32x32xbf16> to vector<32x32xbf16>
      %cst_146 = arith.constant dense<0.000000e+00> : vector<16x32xf32>
      %283 = tpu.matmul %280, %282, %cst_146 {dimension_numbers = #tpu.dot_dimension_numbers<[1], [0], [0], [1], [0, 0, 1, 1], [], []>} : vector<16x32xbf16>, vector<32x32xbf16>, vector<16x32xf32> -> vector<16x32xf32>
      %c1_147 = arith.constant 1 : index
      %c0_148 = arith.constant 0 : index
      %284 = vector.load %arg9[%c1_147, %c0_148] : memref<4x32xf32, #tpu.memory_space<vmem>>, vector<1x32xf32>
      %285 = vector.broadcast %284 : vector<1x32xf32> to vector<16x32xf32>
      %286 = arith.addf %283, %285 : vector<16x32xf32>
      %287 = arith.truncf %286 : vector<16x32xf32> to vector<16x32xbf16>
      %c2_149 = arith.constant 2 : index
      %c0_150 = arith.constant 0 : index
      %c0_151 = arith.constant 0 : index
      %288 = vector.load %arg8[%c2_149, %c0_150, %c0_151] : memref<4x32x32xbf16, #tpu.memory_space<vmem>>, vector<1x32x32xbf16>
      %289 = vector.shape_cast %288 : vector<1x32x32xbf16> to vector<32x32xbf16>
      %cst_152 = arith.constant dense<0.000000e+00> : vector<16x32xf32>
      %290 = tpu.matmul %280, %289, %cst_152 {dimension_numbers = #tpu.dot_dimension_numbers<[1], [0], [0], [1], [0, 0, 1, 1], [], []>} : vector<16x32xbf16>, vector<32x32xbf16>, vector<16x32xf32> -> vector<16x32xf32>
      %c2_153 = arith.constant 2 : index
      %c0_154 = arith.constant 0 : index
      %291 = vector.load %arg9[%c2_153, %c0_154] : memref<4x32xf32, #tpu.memory_space<vmem>>, vector<1x32xf32>
      %292 = vector.broadcast %291 : vector<1x32xf32> to vector<16x32xf32>
      %293 = arith.addf %290, %292 : vector<16x32xf32>
      %294 = arith.truncf %293 : vector<16x32xf32> to vector<16x32xbf16>
      %295 = vector.extract_strided_slice %287 {offsets = [0, 0], sizes = [16, 8], strides = [1, 1]} : vector<16x32xbf16> to vector<16x8xbf16>
      %c0_155 = arith.constant 0 : index
      %c0_156 = arith.constant 0 : index
      %c0_157 = arith.constant 0 : index
      %296 = vector.load %arg20[%c0_155, %c0_156, %c0_157] : memref<4x16x8xbf16, #tpu.memory_space<vmem>>, vector<1x16x8xbf16>
      %297 = vector.shape_cast %296 : vector<1x16x8xbf16> to vector<16x8xbf16>
      %298 = vector.shape_cast %295 : vector<16x8xbf16> to vector<1x16x8xbf16>
      tpu.vector_store %arg20[%c0_155, %c0_156, %c0_157], %298 {strides = array<i32>} : memref<4x16x8xbf16, #tpu.memory_space<vmem>>, vector<1x16x8xbf16>,
      %299 = vector.extract_strided_slice %294 {offsets = [0, 0], sizes = [16, 8], strides = [1, 1]} : vector<16x32xbf16> to vector<16x8xbf16>
      %c0_158 = arith.constant 0 : index
      %c0_159 = arith.constant 0 : index
      %c0_160 = arith.constant 0 : index
      %300 = vector.load %arg21[%c0_158, %c0_159, %c0_160] : memref<4x16x8xbf16, #tpu.memory_space<vmem>>, vector<1x16x8xbf16>
      %301 = vector.shape_cast %300 : vector<1x16x8xbf16> to vector<16x8xbf16>
      %302 = vector.shape_cast %299 : vector<16x8xbf16> to vector<1x16x8xbf16>
      tpu.vector_store %arg21[%c0_158, %c0_159, %c0_160], %302 {strides = array<i32>} : memref<4x16x8xbf16, #tpu.memory_space<vmem>>, vector<1x16x8xbf16>,
      %303 = vector.extract_strided_slice %287 {offsets = [0, 8], sizes = [16, 8], strides = [1, 1]} : vector<16x32xbf16> to vector<16x8xbf16>
      %c1_161 = arith.constant 1 : index
      %c0_162 = arith.constant 0 : index
      %c0_163 = arith.constant 0 : index
      %304 = vector.load %arg20[%c1_161, %c0_162, %c0_163] : memref<4x16x8xbf16, #tpu.memory_space<vmem>>, vector<1x16x8xbf16>
      %305 = vector.shape_cast %304 : vector<1x16x8xbf16> to vector<16x8xbf16>
      %306 = vector.shape_cast %303 : vector<16x8xbf16> to vector<1x16x8xbf16>
      tpu.vector_store %arg20[%c1_161, %c0_162, %c0_163], %306 {strides = array<i32>} : memref<4x16x8xbf16, #tpu.memory_space<vmem>>, vector<1x16x8xbf16>,
      %307 = vector.extract_strided_slice %294 {offsets = [0, 8], sizes = [16, 8], strides = [1, 1]} : vector<16x32xbf16> to vector<16x8xbf16>
      %c1_164 = arith.constant 1 : index
      %c0_165 = arith.constant 0 : index
      %c0_166 = arith.constant 0 : index
      %308 = vector.load %arg21[%c1_164, %c0_165, %c0_166] : memref<4x16x8xbf16, #tpu.memory_space<vmem>>, vector<1x16x8xbf16>
      %309 = vector.shape_cast %308 : vector<1x16x8xbf16> to vector<16x8xbf16>
      %310 = vector.shape_cast %307 : vector<16x8xbf16> to vector<1x16x8xbf16>
      tpu.vector_store %arg21[%c1_164, %c0_165, %c0_166], %310 {strides = array<i32>} : memref<4x16x8xbf16, #tpu.memory_space<vmem>>, vector<1x16x8xbf16>,
      %311 = vector.extract_strided_slice %287 {offsets = [0, 16], sizes = [16, 8], strides = [1, 1]} : vector<16x32xbf16> to vector<16x8xbf16>
      %c2_167 = arith.constant 2 : index
      %c0_168 = arith.constant 0 : index
      %c0_169 = arith.constant 0 : index
      %312 = vector.load %arg20[%c2_167, %c0_168, %c0_169] : memref<4x16x8xbf16, #tpu.memory_space<vmem>>, vector<1x16x8xbf16>
      %313 = vector.shape_cast %312 : vector<1x16x8xbf16> to vector<16x8xbf16>
      %314 = vector.shape_cast %311 : vector<16x8xbf16> to vector<1x16x8xbf16>
      tpu.vector_store %arg20[%c2_167, %c0_168, %c0_169], %314 {strides = array<i32>} : memref<4x16x8xbf16, #tpu.memory_space<vmem>>, vector<1x16x8xbf16>,
      %315 = vector.extract_strided_slice %294 {offsets = [0, 16], sizes = [16, 8], strides = [1, 1]} : vector<16x32xbf16> to vector<16x8xbf16>
      %c2_170 = arith.constant 2 : index
      %c0_171 = arith.constant 0 : index
      %c0_172 = arith.constant 0 : index
      %316 = vector.load %arg21[%c2_170, %c0_171, %c0_172] : memref<4x16x8xbf16, #tpu.memory_space<vmem>>, vector<1x16x8xbf16>
      %317 = vector.shape_cast %316 : vector<1x16x8xbf16> to vector<16x8xbf16>
      %318 = vector.shape_cast %315 : vector<16x8xbf16> to vector<1x16x8xbf16>
      tpu.vector_store %arg21[%c2_170, %c0_171, %c0_172], %318 {strides = array<i32>} : memref<4x16x8xbf16, #tpu.memory_space<vmem>>, vector<1x16x8xbf16>,
      %319 = vector.extract_strided_slice %287 {offsets = [0, 24], sizes = [16, 8], strides = [1, 1]} : vector<16x32xbf16> to vector<16x8xbf16>
      %c3_173 = arith.constant 3 : index
      %c0_174 = arith.constant 0 : index
      %c0_175 = arith.constant 0 : index
      %320 = vector.load %arg20[%c3_173, %c0_174, %c0_175] : memref<4x16x8xbf16, #tpu.memory_space<vmem>>, vector<1x16x8xbf16>
      %321 = vector.shape_cast %320 : vector<1x16x8xbf16> to vector<16x8xbf16>
      %322 = vector.shape_cast %319 : vector<16x8xbf16> to vector<1x16x8xbf16>
      tpu.vector_store %arg20[%c3_173, %c0_174, %c0_175], %322 {strides = array<i32>} : memref<4x16x8xbf16, #tpu.memory_space<vmem>>, vector<1x16x8xbf16>,
      %323 = vector.extract_strided_slice %294 {offsets = [0, 24], sizes = [16, 8], strides = [1, 1]} : vector<16x32xbf16> to vector<16x8xbf16>
      %c3_176 = arith.constant 3 : index
      %c0_177 = arith.constant 0 : index
      %c0_178 = arith.constant 0 : index
      %324 = vector.load %arg21[%c3_176, %c0_177, %c0_178] : memref<4x16x8xbf16, #tpu.memory_space<vmem>>, vector<1x16x8xbf16>
      %325 = vector.shape_cast %324 : vector<1x16x8xbf16> to vector<16x8xbf16>
      %326 = vector.shape_cast %323 : vector<16x8xbf16> to vector<1x16x8xbf16>
      tpu.vector_store %arg21[%c3_176, %c0_177, %c0_178], %326 {strides = array<i32>} : memref<4x16x8xbf16, #tpu.memory_space<vmem>>, vector<1x16x8xbf16>,
    } else {
    }
    %c0 = arith.constant 0 : index
    %5 = arith.index_cast %1 : i32 to index
    %c0_1 = arith.constant 0 : index
    %6 = vector.load %arg2[%c0, %5, %c0_1] : memref<1x16x32xbf16, #tpu.memory_space<vmem>>, vector<1x8x32xbf16>
    %7 = vector.shape_cast %6 : vector<1x8x32xbf16> to vector<8x32xbf16>
    %8 = tpu.iota {dimensions = array<i32: 0>} : vector<8x16xi32>
    %9 = vector.broadcast %1 : i32 to vector<8x16xi32>
    %10 = arith.addi %9, %8 : vector<8x16xi32>
    %11 = tpu.iota {dimensions = array<i32: 1>} : vector<8x16xi32>
    %12 = arith.cmpi sge, %10, %11 : vector<8x16xi32>
    %c0_2 = arith.constant 0 : index
    %c0_3 = arith.constant 0 : index
    %c0_4 = arith.constant 0 : index
    %13 = vector.load %arg4[%c0_2, %c0_3, %c0_4] : memref<1x1x16xf32, #tpu.memory_space<vmem>>, vector<1x1x16xf32>
    %14 = vector.shape_cast %13 : vector<1x1x16xf32> to vector<1x16xf32>
    %cst = arith.constant 0.000000e+00 : f32
    %15 = vector.broadcast %cst : f32 to vector<1x16xf32>
    %16 = arith.cmpf one, %14, %15 : vector<1x16xf32>
    %17 = vector.broadcast %16 : vector<1x16xi1> to vector<8x16xi1>
    %18 = arith.andi %12, %17 : vector<8x16xi1>
    %cst_5 = arith.constant 0.000000e+00 : f32
    %cst_6 = arith.constant -1.000000e+10 : f32
    %19 = vector.broadcast %cst_5 : f32 to vector<8x16xf32>
    %20 = vector.broadcast %cst_6 : f32 to vector<8x16xf32>
    %21 = arith.select %18, %19, %20 : vector<8x16xi1>, vector<8x16xf32>
    %c0_7 = arith.constant 0 : index
    %c0_8 = arith.constant 0 : index
    %c0_9 = arith.constant 0 : index
    %22 = vector.load %arg5[%c0_7, %c0_8, %c0_9] : memref<1x1x16xf32, #tpu.memory_space<vmem>>, vector<1x1x16xf32>
    %23 = vector.shape_cast %22 : vector<1x1x16xf32> to vector<1x16xf32>
    %cst_10 = arith.constant 0.000000e+00 : f32
    %24 = vector.broadcast %cst_10 : f32 to vector<1x16xf32>
    %25 = arith.cmpf one, %23, %24 : vector<1x16xf32>
    %cst_11 = arith.constant 0.000000e+00 : f32
    %cst_12 = arith.constant -1.000000e+10 : f32
    %26 = vector.broadcast %cst_11 : f32 to vector<1x16xf32>
    %27 = vector.broadcast %cst_12 : f32 to vector<1x16xf32>
    %28 = arith.select %25, %26, %27 : vector<1x16xi1>, vector<1x16xf32>
    %c0_13 = arith.constant 0 : index
    %c0_14 = arith.constant 0 : index
    %c0_15 = arith.constant 0 : index
    %29 = vector.load %arg6[%c0_13, %c0_14, %c0_15] : memref<4x32x32xbf16, #tpu.memory_space<vmem>>, vector<1x32x32xbf16>
    %30 = vector.shape_cast %29 : vector<1x32x32xbf16> to vector<32x32xbf16>
    %cst_16 = arith.constant dense<0.000000e+00> : vector<8x32xf32>
    %31 = tpu.matmul %7, %30, %cst_16 {dimension_numbers = #tpu.dot_dimension_numbers<[1], [0], [0], [1], [0, 0, 1, 1], [], []>} : vector<8x32xbf16>, vector<32x32xbf16>, vector<8x32xf32> -> vector<8x32xf32>
    %c0_17 = arith.constant 0 : index
    %c0_18 = arith.constant 0 : index
    %32 = vector.load %arg7[%c0_17, %c0_18] : memref<4x32xf32, #tpu.memory_space<vmem>>, vector<1x32xf32>
    %33 = vector.broadcast %32 : vector<1x32xf32> to vector<8x32xf32>
    %34 = arith.addf %31, %33 : vector<8x32xf32>
    %cst_19 = arith.constant 0.353553385 : f32
    %35 = vector.broadcast %cst_19 : f32 to vector<8x32xf32>
    %36 = arith.mulf %34, %35 : vector<8x32xf32>
    %37 = arith.truncf %36 : vector<8x32xf32> to vector<8x32xbf16>
    %38 = vector.extract_strided_slice %37 {offsets = [0, 0], sizes = [8, 8], strides = [1, 1]} : vector<8x32xbf16> to vector<8x8xbf16>
    %39 = vector.extract_strided_slice %37 {offsets = [0, 8], sizes = [8, 8], strides = [1, 1]} : vector<8x32xbf16> to vector<8x8xbf16>
    %40 = vector.extract_strided_slice %37 {offsets = [0, 16], sizes = [8, 8], strides = [1, 1]} : vector<8x32xbf16> to vector<8x8xbf16>
    %41 = vector.extract_strided_slice %37 {offsets = [0, 24], sizes = [8, 8], strides = [1, 1]} : vector<8x32xbf16> to vector<8x8xbf16>
    %42 = vector.shape_cast %38 : vector<8x8xbf16> to vector<1x8x8xbf16>
    %43 = vector.shape_cast %39 : vector<8x8xbf16> to vector<1x8x8xbf16>
    %44 = vector.shape_cast %40 : vector<8x8xbf16> to vector<1x8x8xbf16>
    %45 = vector.shape_cast %41 : vector<8x8xbf16> to vector<1x8x8xbf16>
    %46 = tpu.concatenate %42, %43, %44, %45 in 0 : vector<1x8x8xbf16>, vector<1x8x8xbf16>, vector<1x8x8xbf16>, vector<1x8x8xbf16> -> vector<4x8x8xbf16>
    %c0_20 = arith.constant 0 : index
    %c0_21 = arith.constant 0 : index
    %c0_22 = arith.constant 0 : index
    %47 = vector.load %arg18[%c0_20, %c0_21, %c0_22] : memref<4x16x8xbf16, #tpu.memory_space<vmem>>, vector<4x16x8xbf16>
    "tpu.trace_start"() <{level = 10 : i32, message = "hqd,hkd->hqk"}> : () -> ()
    %cst_23 = arith.constant dense<0.000000e+00> : vector<4x8x16xf32>
    %48 = tpu.matmul %46, %47, %cst_23 {dimension_numbers = #tpu.dot_dimension_numbers<[2], [2], [1], [1], [0, 0, 0, 1, 1, 1], [0], [0]>} : vector<4x8x8xbf16>, vector<4x16x8xbf16>, vector<4x8x16xf32> -> vector<4x8x16xf32>
    "tpu.trace_stop"() : () -> ()
    %49 = vector.shape_cast %21 : vector<8x16xf32> to vector<1x8x16xf32>
    %50 = vector.broadcast %49 : vector<1x8x16xf32> to vector<4x8x16xf32>
    %51 = arith.addf %48, %50 : vector<4x8x16xf32>
    %cst_24 = arith.constant dense<0xFF800000> : vector<4x8xf32>
    %52 = vector.multi_reduction <maximumf>, %51, %cst_24 [2] : vector<4x8x16xf32> to vector<4x8xf32>
    %53 = vector.shape_cast %52 : vector<4x8xf32> to vector<4x8x1xf32>
    %54 = vector.broadcast %53 : vector<4x8x1xf32> to vector<4x8x16xf32>
    %55 = arith.subf %51, %54 : vector<4x8x16xf32>
    %56 = math.exp %55 : vector<4x8x16xf32>
    %cst_25 = arith.constant dense<0.000000e+00> : vector<4x8xf32>
    %57 = vector.multi_reduction <add>, %56, %cst_25 [2] : vector<4x8x16xf32> to vector<4x8xf32>
    %58 = vector.shape_cast %57 : vector<4x8xf32> to vector<4x8x1xf32>
    %59 = tpu.reciprocal %58 {approx = true} : vector<4x8x1xf32> -> vector<4x8x1xf32>
    %60 = vector.broadcast %59 : vector<4x8x1xf32> to vector<4x8x16xf32>
    %61 = arith.mulf %56, %60 : vector<4x8x16xf32>
    %62 = arith.truncf %61 : vector<4x8x16xf32> to vector<4x8x16xbf16>
    %c0_26 = arith.constant 0 : index
    %c0_27 = arith.constant 0 : index
    %c0_28 = arith.constant 0 : index
    %63 = vector.load %arg19[%c0_26, %c0_27, %c0_28] : memref<4x16x8xbf16, #tpu.memory_space<vmem>>, vector<4x16x8xbf16>
    "tpu.trace_start"() <{level = 10 : i32, message = "hqk,hkd->hqd"}> : () -> ()
    %cst_29 = arith.constant dense<0.000000e+00> : vector<4x8x8xf32>
    %64 = tpu.matmul %62, %63, %cst_29 {dimension_numbers = #tpu.dot_dimension_numbers<[2], [1], [1], [2], [0, 0, 0, 1, 1, 2], [0], [0]>} : vector<4x8x16xbf16>, vector<4x16x8xbf16>, vector<4x8x8xf32> -> vector<4x8x8xf32>
    "tpu.trace_stop"() : () -> ()
    %65 = vector.extract_strided_slice %64 {offsets = [0, 0, 0], sizes = [1, 8, 8], strides = [1, 1, 1]} : vector<4x8x8xf32> to vector<1x8x8xf32>
    %66 = vector.shape_cast %65 : vector<1x8x8xf32> to vector<8x8xf32>
    %67 = vector.extract_strided_slice %64 {offsets = [1, 0, 0], sizes = [1, 8, 8], strides = [1, 1, 1]} : vector<4x8x8xf32> to vector<1x8x8xf32>
    %68 = vector.shape_cast %67 : vector<1x8x8xf32> to vector<8x8xf32>
    %69 = vector.extract_strided_slice %64 {offsets = [2, 0, 0], sizes = [1, 8, 8], strides = [1, 1, 1]} : vector<4x8x8xf32> to vector<1x8x8xf32>
    %70 = vector.shape_cast %69 : vector<1x8x8xf32> to vector<8x8xf32>
    %71 = vector.extract_strided_slice %64 {offsets = [3, 0, 0], sizes = [1, 8, 8], strides = [1, 1, 1]} : vector<4x8x8xf32> to vector<1x8x8xf32>
    %72 = vector.shape_cast %71 : vector<1x8x8xf32> to vector<8x8xf32>
    %73 = tpu.concatenate %66, %68, %70, %72 in 1 : vector<8x8xf32>, vector<8x8xf32>, vector<8x8xf32>, vector<8x8xf32> -> vector<8x32xf32>
    %74 = arith.truncf %73 : vector<8x32xf32> to vector<8x32xbf16>
    %c3 = arith.constant 3 : index
    %c0_30 = arith.constant 0 : index
    %c0_31 = arith.constant 0 : index
    %75 = vector.load %arg6[%c3, %c0_30, %c0_31] : memref<4x32x32xbf16, #tpu.memory_space<vmem>>, vector<1x32x32xbf16>
    %76 = vector.shape_cast %75 : vector<1x32x32xbf16> to vector<32x32xbf16>
    %cst_32 = arith.constant dense<0.000000e+00> : vector<8x32xf32>
    %77 = tpu.matmul %74, %76, %cst_32 {dimension_numbers = #tpu.dot_dimension_numbers<[1], [0], [0], [1], [0, 0, 1, 1], [], []>} : vector<8x32xbf16>, vector<32x32xbf16>, vector<8x32xf32> -> vector<8x32xf32>
    %c3_33 = arith.constant 3 : index
    %c0_34 = arith.constant 0 : index
    %78 = vector.load %arg7[%c3_33, %c0_34] : memref<4x32xf32, #tpu.memory_space<vmem>>, vector<1x32xf32>
    %79 = vector.broadcast %78 : vector<1x32xf32> to vector<8x32xf32>
    %80 = arith.addf %77, %79 : vector<8x32xf32>
    %81 = arith.extf %7 : vector<8x32xbf16> to vector<8x32xf32>
    %82 = arith.addf %81, %80 : vector<8x32xf32>
    %c0_35 = arith.constant 0 : index
    %c0_36 = arith.constant 0 : index
    %83 = vector.load %arg10[%c0_35, %c0_36] : memref<3x32xf32, #tpu.memory_space<vmem>>, vector<1x32xf32>
    %c0_37 = arith.constant 0 : index
    %c0_38 = arith.constant 0 : index
    %84 = vector.load %arg11[%c0_37, %c0_38] : memref<3x32xf32, #tpu.memory_space<vmem>>, vector<1x32xf32>
    %cst_39 = arith.constant dense<0.000000e+00> : vector<8xf32>
    %85 = vector.multi_reduction <add>, %82, %cst_39 [1] : vector<8x32xf32> to vector<8xf32>
    %86 = vector.shape_cast %85 : vector<8xf32> to vector<8x1xf32>
    %cst_40 = arith.constant 3.200000e+01 : f32
    %87 = vector.broadcast %cst_40 : f32 to vector<8x1xf32>
    %88 = arith.divf %86, %87 : vector<8x1xf32>
    %89 = vector.broadcast %88 : vector<8x1xf32> to vector<8x32xf32>
    %90 = arith.subf %82, %89 : vector<8x32xf32>
    %91 = arith.mulf %90, %90 : vector<8x32xf32>
    %cst_41 = arith.constant dense<0.000000e+00> : vector<8xf32>
    %92 = vector.multi_reduction <add>, %91, %cst_41 [1] : vector<8x32xf32> to vector<8xf32>
    %93 = vector.shape_cast %92 : vector<8xf32> to vector<8x1xf32>
    %cst_42 = arith.constant 3.200000e+01 : f32
    %94 = vector.broadcast %cst_42 : f32 to vector<8x1xf32>
    %95 = arith.divf %93, %94 : vector<8x1xf32>
    %96 = vector.broadcast %88 : vector<8x1xf32> to vector<8x32xf32>
    %97 = arith.subf %82, %96 : vector<8x32xf32>
    %cst_43 = arith.constant 9.99999974E-6 : f32
    %98 = vector.broadcast %cst_43 : f32 to vector<8x1xf32>
    %99 = arith.addf %95, %98 : vector<8x1xf32>
    %100 = math.rsqrt %99 : vector<8x1xf32>
    %101 = vector.broadcast %100 : vector<8x1xf32> to vector<8x32xf32>
    %102 = arith.mulf %97, %101 : vector<8x32xf32>
    %103 = vector.broadcast %83 : vector<1x32xf32> to vector<8x32xf32>
    %104 = arith.mulf %102, %103 : vector<8x32xf32>
    %105 = vector.broadcast %84 : vector<1x32xf32> to vector<8x32xf32>
    %106 = arith.addf %104, %105 : vector<8x32xf32>
    %107 = arith.truncf %106 : vector<8x32xf32> to vector<8x32xbf16>
    %c0_44 = arith.constant 0 : index
    %c0_45 = arith.constant 0 : index
    %c0_46 = arith.constant 0 : index
    %108 = vector.load %arg8[%c0_44, %c0_45, %c0_46] : memref<4x32x32xbf16, #tpu.memory_space<vmem>>, vector<1x32x32xbf16>
    %109 = vector.shape_cast %108 : vector<1x32x32xbf16> to vector<32x32xbf16>
    %cst_47 = arith.constant dense<0.000000e+00> : vector<8x32xf32>
    %110 = tpu.matmul %107, %109, %cst_47 {dimension_numbers = #tpu.dot_dimension_numbers<[1], [0], [0], [1], [0, 0, 1, 1], [], []>} : vector<8x32xbf16>, vector<32x32xbf16>, vector<8x32xf32> -> vector<8x32xf32>
    %c0_48 = arith.constant 0 : index
    %c0_49 = arith.constant 0 : index
    %111 = vector.load %arg9[%c0_48, %c0_49] : memref<4x32xf32, #tpu.memory_space<vmem>>, vector<1x32xf32>
    %112 = vector.broadcast %111 : vector<1x32xf32> to vector<8x32xf32>
    %113 = arith.addf %110, %112 : vector<8x32xf32>
    %cst_50 = arith.constant 0.353553385 : f32
    %114 = vector.broadcast %cst_50 : f32 to vector<8x32xf32>
    %115 = arith.mulf %113, %114 : vector<8x32xf32>
    %116 = arith.truncf %115 : vector<8x32xf32> to vector<8x32xbf16>
    %117 = vector.extract_strided_slice %116 {offsets = [0, 0], sizes = [8, 8], strides = [1, 1]} : vector<8x32xbf16> to vector<8x8xbf16>
    %118 = vector.extract_strided_slice %116 {offsets = [0, 8], sizes = [8, 8], strides = [1, 1]} : vector<8x32xbf16> to vector<8x8xbf16>
    %119 = vector.extract_strided_slice %116 {offsets = [0, 16], sizes = [8, 8], strides = [1, 1]} : vector<8x32xbf16> to vector<8x8xbf16>
    %120 = vector.extract_strided_slice %116 {offsets = [0, 24], sizes = [8, 8], strides = [1, 1]} : vector<8x32xbf16> to vector<8x8xbf16>
    %121 = vector.shape_cast %117 : vector<8x8xbf16> to vector<1x8x8xbf16>
    %122 = vector.shape_cast %118 : vector<8x8xbf16> to vector<1x8x8xbf16>
    %123 = vector.shape_cast %119 : vector<8x8xbf16> to vector<1x8x8xbf16>
    %124 = vector.shape_cast %120 : vector<8x8xbf16> to vector<1x8x8xbf16>
    %125 = tpu.concatenate %121, %122, %123, %124 in 0 : vector<1x8x8xbf16>, vector<1x8x8xbf16>, vector<1x8x8xbf16>, vector<1x8x8xbf16> -> vector<4x8x8xbf16>
    %c0_51 = arith.constant 0 : index
    %c0_52 = arith.constant 0 : index
    %c0_53 = arith.constant 0 : index
    %126 = vector.load %arg20[%c0_51, %c0_52, %c0_53] : memref<4x16x8xbf16, #tpu.memory_space<vmem>>, vector<4x16x8xbf16>
    "tpu.trace_start"() <{level = 10 : i32, message = "hqd,hkd->hqk"}> : () -> ()
    %cst_54 = arith.constant dense<0.000000e+00> : vector<4x8x16xf32>
    %127 = tpu.matmul %125, %126, %cst_54 {dimension_numbers = #tpu.dot_dimension_numbers<[2], [2], [1], [1], [0, 0, 0, 1, 1, 1], [0], [0]>} : vector<4x8x8xbf16>, vector<4x16x8xbf16>, vector<4x8x16xf32> -> vector<4x8x16xf32>
    "tpu.trace_stop"() : () -> ()
    %128 = vector.shape_cast %28 : vector<1x16xf32> to vector<1x1x16xf32>
    %129 = vector.broadcast %128 : vector<1x1x16xf32> to vector<4x8x16xf32>
    %130 = arith.addf %127, %129 : vector<4x8x16xf32>
    %cst_55 = arith.constant dense<0xFF800000> : vector<4x8xf32>
    %131 = vector.multi_reduction <maximumf>, %130, %cst_55 [2] : vector<4x8x16xf32> to vector<4x8xf32>
    %132 = vector.shape_cast %131 : vector<4x8xf32> to vector<4x8x1xf32>
    %133 = vector.broadcast %132 : vector<4x8x1xf32> to vector<4x8x16xf32>
    %134 = arith.subf %130, %133 : vector<4x8x16xf32>
    %135 = math.exp %134 : vector<4x8x16xf32>
    %cst_56 = arith.constant dense<0.000000e+00> : vector<4x8xf32>
    %136 = vector.multi_reduction <add>, %135, %cst_56 [2] : vector<4x8x16xf32> to vector<4x8xf32>
    %137 = vector.shape_cast %136 : vector<4x8xf32> to vector<4x8x1xf32>
    %138 = tpu.reciprocal %137 : vector<4x8x1xf32> -> vector<4x8x1xf32>
    %139 = vector.broadcast %138 : vector<4x8x1xf32> to vector<4x8x16xf32>
    %140 = arith.mulf %135, %139 : vector<4x8x16xf32>
    %141 = arith.truncf %140 : vector<4x8x16xf32> to vector<4x8x16xbf16>
    %c0_57 = arith.constant 0 : index
    %c0_58 = arith.constant 0 : index
    %c0_59 = arith.constant 0 : index
    %c0_60 = arith.constant 0 : index
    %142 = vector.load %arg17[%c0_57, %c0_58, %c0_59, %c0_60] : memref<1x4x8x16xbf16, #tpu.memory_space<vmem>>, vector<1x4x8x16xbf16>
    %143 = vector.shape_cast %142 : vector<1x4x8x16xbf16> to vector<4x8x16xbf16>
    %144 = vector.shape_cast %141 : vector<4x8x16xbf16> to vector<1x4x8x16xbf16>
    tpu.vector_store %arg17[%c0_57, %c0_58, %c0_59, %c0_60], %144 {strides = array<i32>} : memref<1x4x8x16xbf16, #tpu.memory_space<vmem>>, vector<1x4x8x16xbf16>,
    %145 = arith.truncf %140 : vector<4x8x16xf32> to vector<4x8x16xbf16>
    %c0_61 = arith.constant 0 : index
    %c0_62 = arith.constant 0 : index
    %c0_63 = arith.constant 0 : index
    %146 = vector.load %arg21[%c0_61, %c0_62, %c0_63] : memref<4x16x8xbf16, #tpu.memory_space<vmem>>, vector<4x16x8xbf16>
    "tpu.trace_start"() <{level = 10 : i32, message = "hqk,hkd->hqd"}> : () -> ()
    %cst_64 = arith.constant dense<0.000000e+00> : vector<4x8x8xf32>
    %147 = tpu.matmul %145, %146, %cst_64 {dimension_numbers = #tpu.dot_dimension_numbers<[2], [1], [1], [2], [0, 0, 0, 1, 1, 2], [0], [0]>} : vector<4x8x16xbf16>, vector<4x16x8xbf16>, vector<4x8x8xf32> -> vector<4x8x8xf32>
    "tpu.trace_stop"() : () -> ()
    %148 = vector.extract_strided_slice %147 {offsets = [0, 0, 0], sizes = [1, 8, 8], strides = [1, 1, 1]} : vector<4x8x8xf32> to vector<1x8x8xf32>
    %149 = vector.shape_cast %148 : vector<1x8x8xf32> to vector<8x8xf32>
    %150 = vector.extract_strided_slice %147 {offsets = [1, 0, 0], sizes = [1, 8, 8], strides = [1, 1, 1]} : vector<4x8x8xf32> to vector<1x8x8xf32>
    %151 = vector.shape_cast %150 : vector<1x8x8xf32> to vector<8x8xf32>
    %152 = vector.extract_strided_slice %147 {offsets = [2, 0, 0], sizes = [1, 8, 8], strides = [1, 1, 1]} : vector<4x8x8xf32> to vector<1x8x8xf32>
    %153 = vector.shape_cast %152 : vector<1x8x8xf32> to vector<8x8xf32>
    %154 = vector.extract_strided_slice %147 {offsets = [3, 0, 0], sizes = [1, 8, 8], strides = [1, 1, 1]} : vector<4x8x8xf32> to vector<1x8x8xf32>
    %155 = vector.shape_cast %154 : vector<1x8x8xf32> to vector<8x8xf32>
    %156 = tpu.concatenate %149, %151, %153, %155 in 1 : vector<8x8xf32>, vector<8x8xf32>, vector<8x8xf32>, vector<8x8xf32> -> vector<8x32xf32>
    %157 = arith.truncf %156 : vector<8x32xf32> to vector<8x32xbf16>
    %c3_65 = arith.constant 3 : index
    %c0_66 = arith.constant 0 : index
    %c0_67 = arith.constant 0 : index
    %158 = vector.load %arg8[%c3_65, %c0_66, %c0_67] : memref<4x32x32xbf16, #tpu.memory_space<vmem>>, vector<1x32x32xbf16>
    %159 = vector.shape_cast %158 : vector<1x32x32xbf16> to vector<32x32xbf16>
    %cst_68 = arith.constant dense<0.000000e+00> : vector<8x32xf32>
    %160 = tpu.matmul %157, %159, %cst_68 {dimension_numbers = #tpu.dot_dimension_numbers<[1], [0], [0], [1], [0, 0, 1, 1], [], []>} : vector<8x32xbf16>, vector<32x32xbf16>, vector<8x32xf32> -> vector<8x32xf32>
    %c3_69 = arith.constant 3 : index
    %c0_70 = arith.constant 0 : index
    %161 = vector.load %arg9[%c3_69, %c0_70] : memref<4x32xf32, #tpu.memory_space<vmem>>, vector<1x32xf32>
    %162 = vector.broadcast %161 : vector<1x32xf32> to vector<8x32xf32>
    %163 = arith.addf %160, %162 : vector<8x32xf32>
    %164 = arith.addf %106, %163 : vector<8x32xf32>
    %c1 = arith.constant 1 : index
    %c0_71 = arith.constant 0 : index
    %165 = vector.load %arg10[%c1, %c0_71] : memref<3x32xf32, #tpu.memory_space<vmem>>, vector<1x32xf32>
    %c1_72 = arith.constant 1 : index
    %c0_73 = arith.constant 0 : index
    %166 = vector.load %arg11[%c1_72, %c0_73] : memref<3x32xf32, #tpu.memory_space<vmem>>, vector<1x32xf32>
    %cst_74 = arith.constant dense<0.000000e+00> : vector<8xf32>
    %167 = vector.multi_reduction <add>, %164, %cst_74 [1] : vector<8x32xf32> to vector<8xf32>
    %168 = vector.shape_cast %167 : vector<8xf32> to vector<8x1xf32>
    %cst_75 = arith.constant 3.200000e+01 : f32
    %169 = vector.broadcast %cst_75 : f32 to vector<8x1xf32>
    %170 = arith.divf %168, %169 : vector<8x1xf32>
    %171 = vector.broadcast %170 : vector<8x1xf32> to vector<8x32xf32>
    %172 = arith.subf %164, %171 : vector<8x32xf32>
    %173 = arith.mulf %172, %172 : vector<8x32xf32>
    %cst_76 = arith.constant dense<0.000000e+00> : vector<8xf32>
    %174 = vector.multi_reduction <add>, %173, %cst_76 [1] : vector<8x32xf32> to vector<8xf32>
    %175 = vector.shape_cast %174 : vector<8xf32> to vector<8x1xf32>
    %cst_77 = arith.constant 3.200000e+01 : f32
    %176 = vector.broadcast %cst_77 : f32 to vector<8x1xf32>
    %177 = arith.divf %175, %176 : vector<8x1xf32>
    %178 = vector.broadcast %170 : vector<8x1xf32> to vector<8x32xf32>
    %179 = arith.subf %164, %178 : vector<8x32xf32>
    %cst_78 = arith.constant 9.99999974E-6 : f32
    %180 = vector.broadcast %cst_78 : f32 to vector<8x1xf32>
    %181 = arith.addf %177, %180 : vector<8x1xf32>
    %182 = math.rsqrt %181 : vector<8x1xf32>
    %183 = vector.broadcast %182 : vector<8x1xf32> to vector<8x32xf32>
    %184 = arith.mulf %179, %183 : vector<8x32xf32>
    %185 = vector.broadcast %165 : vector<1x32xf32> to vector<8x32xf32>
    %186 = arith.mulf %184, %185 : vector<8x32xf32>
    %187 = vector.broadcast %166 : vector<1x32xf32> to vector<8x32xf32>
    %188 = arith.addf %186, %187 : vector<8x32xf32>
    %189 = arith.truncf %188 : vector<8x32xf32> to vector<8x32xbf16>
    %c0_79 = arith.constant 0 : index
    %c0_80 = arith.constant 0 : index
    %190 = vector.load %arg12[%c0_79, %c0_80] : memref<32x64xbf16, #tpu.memory_space<vmem>>, vector<32x64xbf16>
    %cst_81 = arith.constant dense<0.000000e+00> : vector<8x64xf32>
    %191 = tpu.matmul %189, %190, %cst_81 {dimension_numbers = #tpu.dot_dimension_numbers<[1], [0], [0], [1], [0, 0, 1, 1], [], []>} : vector<8x32xbf16>, vector<32x64xbf16>, vector<8x64xf32> -> vector<8x64xf32>
    %c0_82 = arith.constant 0 : index
    %c0_83 = arith.constant 0 : index
    %192 = vector.load %arg13[%c0_82, %c0_83] : memref<1x64xf32, #tpu.memory_space<vmem>>, vector<1x64xf32>
    %193 = vector.broadcast %192 : vector<1x64xf32> to vector<8x64xf32>
    %194 = arith.addf %191, %193 : vector<8x64xf32>
    %cst_84 = arith.constant 0.000000e+00 : f32
    %195 = vector.broadcast %cst_84 : f32 to vector<8x64xf32>
    %196 = arith.maximumf %194, %195 : vector<8x64xf32>
    %197 = arith.truncf %196 : vector<8x64xf32> to vector<8x64xbf16>
    %c0_85 = arith.constant 0 : index
    %c0_86 = arith.constant 0 : index
    %198 = vector.load %arg14[%c0_85, %c0_86] : memref<64x32xbf16, #tpu.memory_space<vmem>>, vector<64x32xbf16>
    %cst_87 = arith.constant dense<0.000000e+00> : vector<8x32xf32>
    %199 = tpu.matmul %197, %198, %cst_87 {dimension_numbers = #tpu.dot_dimension_numbers<[1], [0], [0], [1], [0, 0, 1, 1], [], []>} : vector<8x64xbf16>, vector<64x32xbf16>, vector<8x32xf32> -> vector<8x32xf32>
    %c0_88 = arith.constant 0 : index
    %c0_89 = arith.constant 0 : index
    %200 = vector.load %arg15[%c0_88, %c0_89] : memref<1x32xf32, #tpu.memory_space<vmem>>, vector<1x32xf32>
    %201 = vector.broadcast %200 : vector<1x32xf32> to vector<8x32xf32>
    %202 = arith.addf %199, %201 : vector<8x32xf32>
    %203 = arith.addf %188, %202 : vector<8x32xf32>
    %c2 = arith.constant 2 : index
    %c0_90 = arith.constant 0 : index
    %204 = vector.load %arg10[%c2, %c0_90] : memref<3x32xf32, #tpu.memory_space<vmem>>, vector<1x32xf32>
    %c2_91 = arith.constant 2 : index
    %c0_92 = arith.constant 0 : index
    %205 = vector.load %arg11[%c2_91, %c0_92] : memref<3x32xf32, #tpu.memory_space<vmem>>, vector<1x32xf32>
    %cst_93 = arith.constant dense<0.000000e+00> : vector<8xf32>
    %206 = vector.multi_reduction <add>, %203, %cst_93 [1] : vector<8x32xf32> to vector<8xf32>
    %207 = vector.shape_cast %206 : vector<8xf32> to vector<8x1xf32>
    %cst_94 = arith.constant 3.200000e+01 : f32
    %208 = vector.broadcast %cst_94 : f32 to vector<8x1xf32>
    %209 = arith.divf %207, %208 : vector<8x1xf32>
    %210 = vector.broadcast %209 : vector<8x1xf32> to vector<8x32xf32>
    %211 = arith.subf %203, %210 : vector<8x32xf32>
    %212 = arith.mulf %211, %211 : vector<8x32xf32>
    %cst_95 = arith.constant dense<0.000000e+00> : vector<8xf32>
    %213 = vector.multi_reduction <add>, %212, %cst_95 [1] : vector<8x32xf32> to vector<8xf32>
    %214 = vector.shape_cast %213 : vector<8xf32> to vector<8x1xf32>
    %cst_96 = arith.constant 3.200000e+01 : f32
    %215 = vector.broadcast %cst_96 : f32 to vector<8x1xf32>
    %216 = arith.divf %214, %215 : vector<8x1xf32>
    %217 = vector.broadcast %209 : vector<8x1xf32> to vector<8x32xf32>
    %218 = arith.subf %203, %217 : vector<8x32xf32>
    %cst_97 = arith.constant 9.99999974E-6 : f32
    %219 = vector.broadcast %cst_97 : f32 to vector<8x1xf32>
    %220 = arith.addf %216, %219 : vector<8x1xf32>
    %221 = math.rsqrt %220 : vector<8x1xf32>
    %222 = vector.broadcast %221 : vector<8x1xf32> to vector<8x32xf32>
    %223 = arith.mulf %218, %222 : vector<8x32xf32>
    %224 = vector.broadcast %204 : vector<1x32xf32> to vector<8x32xf32>
    %225 = arith.mulf %223, %224 : vector<8x32xf32>
    %226 = vector.broadcast %205 : vector<1x32xf32> to vector<8x32xf32>
    %227 = arith.addf %225, %226 : vector<8x32xf32>
    %c0_98 = arith.constant 0 : index
    %c0_99 = arith.constant 0 : index
    %c0_100 = arith.constant 0 : index
    %228 = vector.load %arg16[%c0_98, %c0_99, %c0_100] : memref<1x8x32xf32, #tpu.memory_space<vmem>>, vector<1x8x32xf32>
    %229 = vector.shape_cast %228 : vector<1x8x32xf32> to vector<8x32xf32>
    %230 = vector.shape_cast %227 : vector<8x32xf32> to vector<1x8x32xf32>
    tpu.vector_store %arg16[%c0_98, %c0_99, %c0_100], %230 {strides = array<i32>} : memref<1x8x32xf32, #tpu.memory_space<vmem>>, vector<1x8x32xf32>,
    return
  }
  func.func @transform_0(%arg0: i32, %arg1: i32) -> (i32, i32, i32) {
    %c0_i32 = arith.constant 0 : i32
    %c0_i32_0 = arith.constant 0 : i32
    %c0_i32_1 = arith.constant 0 : i32
    return %arg0, %c0_i32, %c0_i32_0 : i32, i32, i32
  }
  func.func @transform_1(%arg0: i32, %arg1: i32) -> (i32, i32, i32) {
    %c0_i32 = arith.constant 0 : i32
    %c0_i32_0 = arith.constant 0 : i32
    %c0_i32_1 = arith.constant 0 : i32
    return %arg0, %c0_i32, %c0_i32_0 : i32, i32, i32
  }
  func.func @transform_2(%arg0: i32, %arg1: i32) -> (i32, i32, i32) {
    %c0_i32 = arith.constant 0 : i32
    %c0_i32_0 = arith.constant 0 : i32
    %c0_i32_1 = arith.constant 0 : i32
    return %arg0, %c0_i32, %c0_i32_0 : i32, i32, i32
  }
  func.func @transform_3(%arg0: i32, %arg1: i32) -> (i32, i32, i32) {
    %c0_i32 = arith.constant 0 : i32
    %c0_i32_0 = arith.constant 0 : i32
    %c0_i32_1 = arith.constant 0 : i32
    return %arg0, %c0_i32, %c0_i32_0 : i32, i32, i32
  }
  func.func @transform_4(%arg0: i32, %arg1: i32) -> (i32, i32, i32) {
    %c0_i32 = arith.constant 0 : i32
    %c0_i32_0 = arith.constant 0 : i32
    %c0_i32_1 = arith.constant 0 : i32
    %c0_i32_2 = arith.constant 0 : i32
    return %c0_i32, %c0_i32_0, %c0_i32_1 : i32, i32, i32
  }
  func.func @transform_5(%arg0: i32, %arg1: i32) -> (i32, i32) {
    %c0_i32 = arith.constant 0 : i32
    %c0_i32_0 = arith.constant 0 : i32
    %c0_i32_1 = arith.constant 0 : i32
    return %c0_i32, %c0_i32_0 : i32, i32
  }
  func.func @transform_6(%arg0: i32, %arg1: i32) -> (i32, i32, i32) {
    %c0_i32 = arith.constant 0 : i32
    %c0_i32_0 = arith.constant 0 : i32
    %c0_i32_1 = arith.constant 0 : i32
    %c0_i32_2 = arith.constant 0 : i32
    return %c0_i32, %c0_i32_0, %c0_i32_1 : i32, i32, i32
  }
  func.func @transform_7(%arg0: i32, %arg1: i32) -> (i32, i32) {
    %c0_i32 = arith.constant 0 : i32
    %c0_i32_0 = arith.constant 0 : i32
    %c0_i32_1 = arith.constant 0 : i32
    return %c0_i32, %c0_i32_0 : i32, i32
  }
  func.func @transform_8(%arg0: i32, %arg1: i32) -> (i32, i32) {
    %c0_i32 = arith.constant 0 : i32
    %c0_i32_0 = arith.constant 0 : i32
    %c0_i32_1 = arith.constant 0 : i32
    return %c0_i32, %c0_i32_0 : i32, i32
  }
  func.func @transform_9(%arg0: i32, %arg1: i32) -> (i32, i32) {
    %c0_i32 = arith.constant 0 : i32
    %c0_i32_0 = arith.constant 0 : i32
    %c0_i32_1 = arith.constant 0 : i32
    return %c0_i32, %c0_i32_0 : i32, i32
  }
  func.func @transform_10(%arg0: i32, %arg1: i32) -> (i32, i32) {
    %c0_i32 = arith.constant 0 : i32
    %c0_i32_0 = arith.constant 0 : i32
    %c0_i32_1 = arith.constant 0 : i32
    return %c0_i32, %c0_i32_0 : i32, i32
  }
  func.func @transform_11(%arg0: i32, %arg1: i32) -> (i32, i32) {
    %c0_i32 = arith.constant 0 : i32
    %c0_i32_0 = arith.constant 0 : i32
    %c0_i32_1 = arith.constant 0 : i32
    return %c0_i32, %c0_i32_0 : i32, i32
  }
  func.func @transform_12(%arg0: i32, %arg1: i32) -> (i32, i32) {
    %c0_i32 = arith.constant 0 : i32
    %c0_i32_0 = arith.constant 0 : i32
    %c0_i32_1 = arith.constant 0 : i32
    return %c0_i32, %c0_i32_0 : i32, i32
  }
  func.func @transform_13(%arg0: i32, %arg1: i32) -> (i32, i32) {
    %c0_i32 = arith.constant 0 : i32
    %c0_i32_0 = arith.constant 0 : i32
    %c0_i32_1 = arith.constant 0 : i32
    return %c0_i32, %c0_i32_0 : i32, i32
  }
  func.func @transform_14(%arg0: i32, %arg1: i32) -> (i32, i32, i32) {
    %c0_i32 = arith.constant 0 : i32
    %c0_i32_0 = arith.constant 0 : i32
    return %arg0, %arg1, %c0_i32 : i32, i32, i32
  }
  func.func @transform_15(%arg0: i32, %arg1: i32) -> (i32, i32, i32, i32) {
    %c0_i32 = arith.constant 0 : i32
    %c0_i32_0 = arith.constant 0 : i32
    %c0_i32_1 = arith.constant 0 : i32
    return %arg0, %c0_i32, %arg1, %c0_i32_0 : i32, i32, i32, i32
  }
}

</mosaic_0001>

<bundles_post_ra>
// kernel: tpu_custom_call.1
= control target key start
LH: loop header
LB: loop body
LE: loop exit
PB: predicated region body
PF: predicated region fallthrough
CT: control target
= control target key end

     0   :  { %s4584_s0 = inlined_call_operand.vmem [shape: bf16[2,16,32], index: 0, kind: input, shape index: {}]   ;;  %s4585_s1 = inlined_call_operand.vmem [shape: bf16[2,16,32], index: 1, kind: input, shape index: {}]   ;;  %s4586_s2 = inlined_call_operand.hbm [shape: f32[2,1,16], index: 2, kind: input, shape index: {}]   ;;  %s4587_s3 = inlined_call_operand.hbm [shape: f32[2,1,16], index: 3, kind: input, shape index: {}]   ;;  %s4588_s4 = inlined_call_operand.hbm [shape: bf16[4,32,32], index: 4, kind: input, shape index: {}]   ;;  %s4589_s5 = inlined_call_operand.vmem [shape: f32[4,32], index: 5, kind: input, shape index: {}]   ;;  %s4590_s6 = inlined_call_operand.hbm [shape: bf16[4,32,32], index: 6, kind: input, shape index: {}]   ;;  %s4591_s7 = inlined_call_operand.hbm [shape: f32[4,32], index: 7, kind: input, shape index: {}]   ;;  %s4592_s8 = inlined_call_operand.hbm [shape: f32[3,32], index: 8, kind: input, shape index: {}]   ;;  %s4593_s9 = inlined_call_operand.hbm [shape: f32[3,32], index: 9, kind: input, shape index: {}]   ;;  %s4594_s10 = inlined_call_operand.vmem [shape: bf16[32,64], index: 10, kind: input, shape index: {}]   ;;  %s4595_s11 = inlined_call_operand.vmem [shape: f32[1,64], index: 11, kind: input, shape index: {}]   ;;  %s4596_s12 = inlined_call_operand.vmem [shape: bf16[64,32], index: 12, kind: input, shape index: {}]   ;;  %s4597_s13 = inlined_call_operand.vmem [shape: f32[1,32], index: 13, kind: input, shape index: {}]   ;;  %s4598_s14 = inlined_call_operand.hbm [shape: f32[2,16,32], index: 14, kind: output, shape index: {0}]   ;;  %s4599_s15 = inlined_call_operand.hbm [shape: bf16[2,4,16,16], index: 15, kind: output, shape index: {1}]  }
   0x1   :  { %4613 = sst [smem:[#allocation32_spill]] %s4584_s0 }
   0x2   :  { %4614 = sst [smem:[#allocation33_spill]] %s4585_s1 }
   0x3   :  { %4615 = sst [smem:[#allocation34_spill]] %s4586_s2 }
   0x4   :  { %4616 = sst [smem:[#allocation35_spill]] %s4588_s4 }
   0x5   :  { %4617 = sst [smem:[#allocation36_spill]] %s4589_s5 }
   0x6   :  { %4618 = sst [smem:[#allocation37_spill]] %s4590_s6 }
   0x7   :  { %4619 = sst [smem:[#allocation38_spill]] %s4591_s7 }
   0x8   :  { %4620 = sst [smem:[#allocation39_spill]] %s4592_s8 }
   0x9   :  { %4621 = sst [smem:[#allocation40_spill]] %s4593_s9 }
   0xa   :  { %4622 = sst [smem:[#allocation41_spill]] %s4594_s10 }
   0xb   :  { %4623 = sst [smem:[#allocation42_spill]] %s4595_s11 }
   0xc   :  { %4624 = sst [smem:[#allocation43_spill]] %s4596_s12 }
   0xd   :  { %4625 = sst [smem:[#allocation44_spill]] %s4597_s13 }
   0xe   :  { %4626 = sst [smem:[#allocation45_spill]] %s4598_s14 }
   0xf   :  { %4627 = sst [smem:[#allocation46_spill]] %s4599_s15 }
  0x10   :  { %21 = vsyncpa [#allocation7], 0 }
  0x11   :  { %23 = vsyncpa [#allocation7 + $0x1], 0 }
  0x12   :  { %24 = vsyncpa [#allocation10], 0 }
  0x13   :  { %26 = vsyncpa [#allocation10 + $0x1], 0 }
  0x14   :  { %27 = vsyncpa [#allocation13], 0 }
  0x15   :  { %28 = vsyncpa [#allocation16], 0 }
  0x16   :  { %29 = vsyncpa [#allocation8], 0 }
  0x17   :  { %31 = vsyncpa [#allocation8 + $0x1], 0 }
  0x18   :  { %32 = vsyncpa [#allocation20], 0 }
  0x19   :  { %34 = vsyncpa [#allocation20 + $0x1], 0  ;;  %s3959_s18 = smov 0   ;;  %s3961_s19 = smov 0  }
  0x1a   :  { %s3963_s20 = smov 0   ;;  %s3965_s21 = smov 0  }
  0x1b   :  { %s3967_s22 = smov 0   ;;  %s3969_s23 = smov 0  }
  0x1c   :  { %s3971_s24 = smov 0   ;;  %s3973_s25 = smov 0  }
  0x1d   :  { %s3975_s26 = smov 0   ;;  %s3977_s27 = smov 0  }
  0x1e   :  { %s3979_s28 = smov 0  }
  0x1f LB: > { %4628 = sst [smem:[#allocation28_spill]] %s3832_s24  ;;  %s4015_s29 = sadd.s32 4294967295, %s3848_s28   ;;  %s3848_s28 = sphi %s3979_s28, %s40_s28   ;;  %s3844_s27 = sphi %s3977_s27, %s4671_s27   ;;  %s3840_s26 = sphi %s3975_s26, %s4679_s26   ;;  %s3836_s25 = sphi %s3973_s25, %s4669_s25   ;;  %s3832_s24 = sphi %s3971_s24, %s4678_s24   ;;  %s3828_s23 = sphi %s3969_s23, %s4677_s23   ;;  %s3824_s22 = sphi %s3967_s22, %s4676_s22   ;;  %s3820_s21 = sphi %s3965_s21, %s4675_s21   ;;  %s3816_s20 = sphi %s3963_s20, %s4674_s20   ;;  %s3812_s19 = sphi %s3961_s19, %s4673_s19   ;;  %s3808_s18 = sphi %s3959_s18, %s4672_s18  }
  0x20   : > { %4629 = sst [smem:[#allocation29_spill]] %s3844_s27  ;;  %p2859_p0 = scmp.ge.s32.totalorder %s3848_s28, 1 }
  0x21   : > { %p4608_p1 = scmp.eq.s32.totalorder %s4015_s29, 0  ;;  %p427_p3 = scmp.lt.s32.totalorder %s3848_s28, 5 }
  0x22   : > { %s3850_s16 = smov [#allocation11]   ;;  %s3851_s15 = smov [#allocation12]  }
  0x23   : > { %p4021_p4 = pnand %p2859_p0, %p427_p3  ;;  %s439_s17 = sshll.u32 %s3850_s16, 4  ;;  %s440_s17 = int_to_ptr.vmem [resolvable:$true] %s439_s17 }
  0x24   : > { %s455_s13 = sshll.u32 %s3851_s15, 4  ;;  %s3852_s11 = smov [#allocation15]   ;;  %s4033_s13 = int_to_ptr.vmem [resolvable:$true] %s455_s13 }
  0x25   : > { %s4630_s30 = scalar_select %p4021_p4, 1, 0 }
  0x26   : > { %p3263_p5 = pneg %p4021_p4  ;;  %s480_s12 = sshll.u32 %s3852_s11, 4  ;;  %s4035_s12 = int_to_ptr.vmem [resolvable:$true] %s480_s12 }
  0x27   : > { %s3507_s10 = scalar_lea.vmem %s440_s17, 1024  ;;  %p3515_p11 = scmp.lt.s32.totalorder %s440_s17, %s440_s17 }
  0x28   : > { %p4029_p6 = pnand %p3263_p5, %p4608_p1  ;;  %p3508_p8 = scmp.ne.s32.totalorder %s440_s17, %s3507_s10 }
  0x29   : > { %p3516_p12 = scmp.lt.s32.totalorder %s3507_s10, %s3507_s10 }
  0x2a   : > { %p4039_p7 = pneg %p4029_p6 }
  0x2b   : > { %p3517_p13 = por %p3516_p12, %p3515_p11 }
  0x2c   : > { %p3510_p9 = pnand %p3508_p8, %p4039_p7 }
  0x2e   : > { %p3511_p10 = pneg %p3510_p9 }
  0x30   : > { %p3518_p0 = pnand %p3517_p13, %p3511_p10 }
  0x32   : > { %3521 = shalt.err (!%p3518_p0)
}
  0x33   : > { %s3853_s15 = smov 64   ;;  %s3854_s11 = smov 4  }
  0x34   : > { %s4633_s4 = sld [smem:[#allocation35_spill]]  ;;  %s3533_s0 = scalar_lea.vmem %s4033_s13, 1024 }
  0x35   : > { %p3534_p3 = scmp.ne.s32.totalorder %s4033_s13, %s3533_s0  ;;  %p3541_p9 = scmp.lt.s32.totalorder %s4033_s13, %s4033_s13 }
  0x36   : > { %p3542_p10 = scmp.lt.s32.totalorder %s3533_s0, %s3533_s0 }
  0x37   : > { %p3536_p5 = pnand %p3534_p3, %p4039_p7 }
  0x38   : > { %p3543_p11 = por %p3542_p10, %p3541_p9 }
  0x39   : > { %p3537_p8 = pneg %p3536_p5 }
  0x3a   : > { %3266 = dma.hbm_to_vmem [thread:$0]  (!%p4029_p6), %s4633_s4, 1024, %s440_s17, [#allocation10], %s3853_s15, %s3853_s15, %s3854_s11  }
  0x3b   : > { %p3544_p12 = pnand %p3543_p11, %p3537_p8 }
  0x3d   : > { %3547 = shalt.err (!%p3544_p12)
}
  0x3e   : > { %s4634_s6 = sld [smem:[#allocation37_spill]]  ;;  %s3559_s1 = scalar_lea.vmem %s4035_s12, 64 }
  0x3f   : > { %p3560_p13 = scmp.ne.s32.totalorder %s4035_s12, %s3559_s1  ;;  %p3567_p5 = scmp.lt.s32.totalorder %s4035_s12, %s4035_s12 }
  0x40   : > { %p3568_p8 = scmp.lt.s32.totalorder %s3559_s1, %s3559_s1 }
  0x41   : > { %p3562_p0 = pnand %p3560_p13, %p4039_p7 }
  0x42   : > { %p3569_p9 = por %p3568_p8, %p3567_p5 }
  0x43   : > { %p3563_p3 = pneg %p3562_p0 }
  0x44   : > { %3269 = dma.hbm_to_vmem [thread:$0]  (!%p4029_p6), %s4634_s6, 1024, %s4033_s13, [#allocation13], %s3853_s15, %s3853_s15, %s3854_s11  }
  0x45   : > { %p3570_p10 = pnand %p3569_p9, %p3563_p3 }
  0x47   : > { %3573 = shalt.err (!%p3570_p10)
}
  0x48   : > { %s4635_s8 = sld [smem:[#allocation39_spill]]  ;;  %s3855_s13 = smov [#allocation14]  }
  0x49   : > { %s469_s24 = sshll.u32 %s3855_s13, 4  ;;  %s3856_s17 = smov [#allocation17]   ;;  %s470_s24 = int_to_ptr.vmem [resolvable:$true] %s469_s24 }
  0x4a   : > { %s491_s15 = sshll.u32 %s3856_s17, 4  ;;  %s3585_s11 = scalar_lea.vmem %s470_s24, 64  ;;  %s492_s15 = int_to_ptr.vmem [resolvable:$true] %s491_s15 }
  0x4b   : > { %p3586_p11 = scmp.ne.s32.totalorder %s470_s24, %s3585_s11  ;;  %p3593_p0 = scmp.lt.s32.totalorder %s470_s24, %s470_s24 }
  0x4c   : > { %p3594_p3 = scmp.lt.s32.totalorder %s3585_s11, %s3585_s11 }
  0x4d   : > { %p3588_p12 = pnand %p3586_p11, %p4039_p7 }
  0x4e   : > { %3275 = dma.hbm_to_vmem [thread:$0]  (!%p4029_p6), %s4635_s8, 64, %s4035_s12, [#allocation16]  }
  0x4f   : > { %p3589_p13 = pneg %p3588_p12  ;;  %p3595_p5 = por %p3594_p3, %p3593_p0 }
  0x51   : > { %p3596_p8 = pnand %p3595_p5, %p3589_p13 }
  0x53   : > { %3599 = shalt.err (!%p3596_p8)
}
  0x54   : > { %s4636_s7 = sld [smem:[#allocation38_spill]]  ;;  %s3611_s1 = scalar_lea.vmem %s492_s15, 64 }
  0x55   : > { %p3612_p9 = scmp.ne.s32.totalorder %s492_s15, %s3611_s1  ;;  %p3619_p1 = scmp.lt.s32.totalorder %s492_s15, %s492_s15 }
  0x56   : > { %p3620_p11 = scmp.lt.s32.totalorder %s3611_s1, %s3611_s1 }
  0x57   : > { %p3614_p10 = pnand %p3612_p9, %p4039_p7 }
  0x58   : > { %p3621_p12 = por %p3620_p11, %p3619_p1 }
  0x59   : > { %p3615_p2 = pneg %p3614_p10 }
  0x5a   : > { %3272 = dma.hbm_to_vmem [thread:$0]  (!%p4029_p6), %s4636_s7, 64, %s470_s24, [#allocation13]  }
  0x5b   : > { %p3622_p4 = pnand %p3621_p12, %p3615_p2 }
  0x5d   : > { %3625 = shalt.err (!%p3622_p4)
}
  0x5e   : > { %s4637_s9 = sld [smem:[#allocation40_spill]]  ;;  %s2858_s16 = sadd.s32 4294967294, %s3848_s28  }
  0x5f   : > { %s49_s14 = sadd.s32 1, %s3840_s26  ;;  %s52_s13 = sadd.s32 1, %s3844_s27 }
  0x60   : > { %p50_p1 = scmp.ge.s32.totalorder %s49_s14, 2  ;;  %s111_s24 = sadd.s32 1, %s3828_s23 }
  0x61   : > { %p118_p2 = scmp.ne.s32.totalorder %s3828_s23, %s3824_s22  ;;  %p119_p4 = scmp.eq.s32.totalorder %s3848_s28, 0 }
  0x62   : > { %s4681_s14 = smov (%p50_p1, %s49_s14), 0  ;;  %s4683_s13 = smov (!%p50_p1, %s52_s13), %s3844_s27 }
  0x63   : > { %4638 = sst [smem:[#allocation30_spill]] %s4681_s14  ;;  %p54_p7 = scmp.ge.s32.totalorder %s4683_s13, 2 }
  0x64   : > { %3278 = dma.hbm_to_vmem [thread:$0]  (!%p4029_p6), %s4637_s9, 64, %s492_s15, [#allocation16]  }
  0x65   : > { %p124_p6 = scmp.ne.s32.totalorder %s3824_s22, %s3820_s21  ;;  %s371_s17 = ssub.s32 %s3840_s26, %s4681_s14 }
  0x66   : > { %p4102_p13 = por %p119_p4, %p118_p2  ;;  %p4640_p0 = scmp.eq.s32.totalorder %s4015_s29, 0 }
  0x67   : > { %s4685_s13 = smov (%p54_p7, %s4683_s13), 0  ;;  %s375_s10 = sadd.s32 1, %s3816_s20 }
  0x68   : > { %p4108_p3 = por %p4640_p0, %p124_p6  ;;  %4642 = sst [smem:[#allocation31_spill]] %s4685_s13 }
  0x69   : > { %p385_p5 = scmp.ne.s32.totalorder %s3816_s20, %s3812_s19  ;;  %s108_s21 = ssub.s32 %s3844_s27, %s4685_s13 }
  0x6a   : > { %p391_p8 = scmp.ne.s32.totalorder %s3812_s19, %s3808_s18  ;;  %p109_p9 = scmp.eq.s32.totalorder %s108_s21, 0 }
  0x6b   : > { %s372_s12 = sor.u32 %s371_s17, %s108_s21  ;;  %p4643_p11 = scmp.eq.s32.totalorder %s4015_s29, 3 }
  0x6c   : > { %p373_p10 = scmp.eq.s32.totalorder %s372_s12, 0  ;;  %p392_p1 = scmp.eq.s32.totalorder %s2858_s16, 3 }
  0x6d   : > { %p4123_p12 = por %p4643_p11, %p385_p5  ;;  %p3298_p2 = scmp.lt.s32.totalorder %s3848_s28, 4 }
  0x6e   : > { %s4128_s0 = scalar_select %p109_p9, %s3828_s23, %s111_s24  }
  0x6f   : > { %s4131_s5 = scalar_select %p373_p10, %s3816_s20, %s375_s10  }
  0x70   : > { %s530_s4 = sand.u32 1, %s3828_s23   ;;  %s2866_s6 = sshll.u32 %s3844_s27, 4 }
  0x71   : > { %p4136_p4 = por %p392_p1, %p391_p8  ;;  %s4646_s2 = sld [smem:[#allocation34_spill]] }
  0x72   : > { %s533_s8 = scalar_lea.vmem [#allocation6], %s530_s4  ;;  %p4145_p6 = pnand %p3298_p2, %p4102_p13 }
  0x73   : > { %s540_s9 = sshll.u32 %s533_s8, 4  ;;  %s4152_s13 = scalar_lea.hbm %s4587_s3, %s2866_s6  ;;  %s541_s9 = int_to_ptr.vmem [resolvable:$true] %s540_s9 }
  0x74   : > { %s547_s14 = sand.u32 1, %s3848_s28   ;;  %s531_s27 = scalar_lea.sflag [#allocation7], %s530_s4 }
  0x75   : > { %p3628_p7 = pneg %p4145_p6  ;;  %s3639_s17 = scalar_lea.vmem %s541_s9, 16 }
  0x76   : > { %p3640_p0 = scmp.ne.s32.totalorder %s541_s9, %s3639_s17  ;;  %s3857_s8 = smov [#allocation6]  }
  0x77   : > { %s538_s12 = scalar_lea.hbm %s4646_s2, %s2866_s6  ;;  %s3644_s15 = sshll.u32 %s3857_s8, 4  ;;  %s3645_s15 = int_to_ptr.vmem [resolvable:$false] %s3644_s15 }
  0x78   : > { %p3642_p13 = pnand %p3640_p0, %p3628_p7  ;;  %s3646_s21 = scalar_lea.vmem %s3645_s15, 32 }
  0x79   : > { %p3647_p8 = scmp.lt.s32.totalorder %s541_s9, %s3645_s15  ;;  %p3648_p9 = scmp.lt.s32.totalorder %s3646_s21, %s3639_s17 }
  0x7a   : > { %p3643_p5 = pneg %p3642_p13 }
  0x7b   : > { %p3649_p10 = por %p3648_p9, %p3647_p8 }
  0x7d   : > { %p3650_p11 = pnand %p3649_p10, %p3643_p5 }
  0x7f   : > { %3653 = shalt.err (!%p3650_p11)
}
  0x80   : > { %3282 = dma.hbm_to_vmem [thread:$0]  (!%p4145_p6), %s538_s12, 16, %s541_s9, %s531_s27  }
  0x81   : > { %s550_s6 = scalar_lea.vmem [#allocation9], %s530_s4  ;;  %s548_s10 = scalar_lea.sflag [#allocation10], %s547_s14 }
  0x82   : > { %s557_s16 = sshll.u32 %s550_s6, 4  ;;  %s3858_s8 = smov [#allocation9]   ;;  %s558_s16 = int_to_ptr.vmem [resolvable:$true] %s557_s16 }
  0x83   : > { %s3667_s2 = scalar_lea.vmem %s558_s16, 16  ;;  %s3672_s15 = sshll.u32 %s3858_s8, 4  ;;  %s3673_s15 = int_to_ptr.vmem [resolvable:$false] %s3672_s15 }
  0x84   : > { %p3668_p1 = scmp.ne.s32.totalorder %s558_s16, %s3667_s2  ;;  %s3674_s17 = scalar_lea.vmem %s3673_s15, 32 }
  0x85   : > { %p3675_p13 = scmp.lt.s32.totalorder %s558_s16, %s3673_s15  ;;  %p3676_p5 = scmp.lt.s32.totalorder %s3674_s17, %s3667_s2 }
  0x86   : > { %p3670_p2 = pnand %p3668_p1, %p3628_p7 }
  0x87   : > { %p3677_p8 = por %p3676_p5, %p3675_p13 }
  0x88   : > { %p3671_p0 = pneg %p3670_p2 }
  0x8a   : > { %p3678_p9 = pnand %p3677_p8, %p3671_p0 }
  0x8c   : > { %3681 = shalt.err (!%p3678_p9)
}
  0x8d   : > { %3285 = dma.hbm_to_vmem [thread:$0]  (!%p4145_p6), %s4152_s13, 16, %s558_s16, %s548_s10  }
  0x8e   : > { %p4648_p10 = scmp.ne.s32.totalorder %s4630_s30, 0 }
  0x8f   : > { %s4171_s4 = sand.u32 (!%p4648_p10), 1, %s3824_s22  }
  0x90   : > { %566 = sbr.rel (%p4648_p10) target bundleno = 4567 (0x11d7), region = 76  ;;  %s569_s9 = scalar_lea.sflag (!%p4648_p10), [#allocation7], %s4171_s4 }
  0x95   : > { %3779 = dma.done.wait (%p4108_p3), %s569_s9, 16  }
  0x96   : > { %3781 = vsyncadd (%p4108_p3), %s569_s9, 4294967280  ;;  %s576_s2 = sand.u32 1, %s4015_s29  }
  0x97   : > { %s577_s14 = scalar_lea.sflag [#allocation10], %s576_s2 }
  0x98   : > { %3783 = dma.done.wait (%p4108_p3), %s577_s14, 16  }
  0x99   : > { %3785 = vsyncadd (%p4108_p3), %s577_s14, 4294967280  ;;  %p4649_p6 = scmp.eq.s32.totalorder %s4015_s29, 0 }
  0x9b   : > { %3787 = dma.done.wait (%p4649_p6), [#allocation10], 1024   ;;  %p4650_p7 = pmov %p4649_p6 }
  0x9c   : > { %p4651_p11 = pmov %p4649_p6 }
  0x9d   : > { %3789 = vsyncadd (%p4650_p7), [#allocation10], 4294966272 }
  0x9e   : > { %3791 = dma.done.wait (%p4651_p11), [#allocation13], 1088   ;;  %p4652_p1 = pmov %p4649_p6 }
  0xa0   : > { %3793 = vsyncadd (%p4652_p1), [#allocation13], 4294966208  ;;  %p4653_p2 = pmov %p4652_p1 }
  0xa1   : > { %p4654_p0 = pmov %p4652_p1 }
  0xa2   : > { %3795 = dma.done.wait (%p4653_p2), [#allocation16], 128  }
  0xa3   : > { %3797 = vsyncadd (%p4654_p0), [#allocation16], 4294967168  ;;  %s4655_s13 = sld [smem:[#allocation28_spill]]  ;;  %s4198_s11 = sand.u32 1, %s3812_s19  }
  0xa4   : > { %p664_p3 = scmp.lt.s32.totalorder %s3836_s25, 1  ;;  %s2874_s12 = sshll.u32 %s4198_s11, 3 }
  0xa5   : > { %s2875_s24 = sshll.u32 %s4198_s11, 4  ;;  %s4656_s15 = sld [smem:[#allocation32_spill]] }
  0xa6   : > { %s665_s21 = scalar_select %p664_p3, %s3836_s25, 1 }
  0xa7   : > { %s4657_s2 = sld [smem:[#allocation33_spill]]  ;;  %s4215_s30 = scalar_lea.vmem [#allocation18], %s2874_s12 }
  0xa8   : > { %s2981_s16 = sshll.u32 %s665_s21, 3  ;;  %s4217_s27 = scalar_lea.vmem [#allocation19], %s2875_s24 }
  0xa9   : > { %s2880_s6 = sshll.u32 %s4655_s13, 3  ;;  %p2881_p13 = scmp.ne.s32.totalorder %s4655_s13, 0 }
  0xaa   : > { %s4658_s24 = sld [smem:[#allocation36_spill]] (!%p2881_p13)  ;;  %s3861_s10 = smov (!%p2881_p13), 120  }
  0xab   : > { %s4208_s17 = scalar_lea.vmem %s4656_s15, %s2981_s16  ;;  %679 = sbr.rel (%p2881_p13) target bundleno = 543 (0x21f), region = 108 }
  0xac   : > { %s3862_s8 = smov (!%p2881_p13), 112   ;;  %s3863_s15 = smov (!%p2881_p13), 104  }
  0xad   : > { %s4213_s14 = scalar_lea.vmem %s4657_s2, %s2981_s16 }
  0xb0   : > { %v3418_v0 = vld [vmem:[#allocation11 + $0x18] sm:$0xff]   ;;  %v3859_v1 = vmov 0.0   ;;  %v3419_v2 = vld [vmem:[#allocation11 + $0x28] sm:$0xff]   ;;  %v3420_v3 = vld [vmem:[#allocation11 + $0x10] sm:$0xff]   ;;  %vm3860_vm0 = vmmov 0   ;;  %vm709_vm1 = vcmask 261120  }
  0xb1   : > { %3055 = vmatprep.subr.bf16.mxu0 %v3859_v1  ;;  %3063 = vmatprep.subr.bf16.mxu1 %v3859_v1  ;;  %v3421_v4 = vld [vmem:[#allocation11 + $0x20] sm:$0xff]   ;;  %v3423_v6 = vld [vmem:[#allocation12 + $0x18] sm:$0xff]   ;;  %v3425_v7 = vld [vmem:[#allocation12 + $0x28] sm:$0xff]   ;;  %vm826_vm2 = vcmask 60416  }
  0xb2   : > { %3056 = vmatpush3.bf16.msra.mxu0 %v3418_v0  ;;  %3059 = vmatprep.mubr.msk.bf16.mxu0 %vm3860_vm0, %v3859_v1  ;;  %v3422_v5 = vld [vmem:[%s4208_s17] sm:$0xff]   ;;  %v3424_v8 = vld [vmem:[#allocation12 + $0x10] sm:$0xff]  }
  0xb3   : > { %3064 = vmatpush3.bf16.msra.mxu1 %v3419_v2  ;;  %3057 = vmatprep.subr.bf16.mxu0 %v3859_v1  ;;  %v3427_v9 = vld [vmem:[#allocation12 + $0x20] sm:$0xff]   ;;  %v2882_v11 = vld [vmem:[%s4658_s24 + $0x1] ss:$0 sm:$0xff]  ;;  %v2887_v12 = vld [vmem:[%s4658_s24 + $0x2] ss:$0 sm:$0xff] }
  0xb4   : > { %3065 = vmatprep.subr.bf16.mxu1 %v3859_v1  ;;  %3067 = vmatprep.mubr.msk.bf16.mxu1 %vm3860_vm0, %v3859_v1  ;;  %v3426_v10 = vld [vmem:[%s4213_s14] sm:$0xff]  }
  0xb5   : > { %v2895_v26 = vld [vmem:[#allocation14 + $0x1] ss:$0 sm:$0xff]  ;;  %v2900_v29 = vld [vmem:[#allocation14 + $0x2] ss:$0 sm:$0xff] }
  0xb6   : > { %3058 = vmatpush3.bf16.msra.mxu0 %v3420_v3 }
  0xb7   : > { %3066 = vmatpush3.bf16.msra.mxu1 %v3421_v4  ;;  %3071 = vmatprep.subr.bf16.mxu0 %v3859_v1 }
  0xb8   : > { %3079 = vmatprep.subr.bf16.mxu1 %v3859_v1 }
  0xb9   : > { %3060 = vmatmul.mubr.msk.bf16.vlgmr.msra.gmra.mxu0 %vm709_vm1, %v3422_v5 }
  0xba   : > { %3068 = vmatmul.mubr.msk.bf16.vlgmr.msra.gmra.mxu1 %vm709_vm1, %v3422_v5  ;;  %3072 = vmatpush3.bf16.msra.mxu0 %v3423_v6 }
  0xbb   : > { %3073 = vmatprep.subr.bf16.mxu0 %v3859_v1  ;;  %3080 = vmatpush3.bf16.msra.mxu1 %v3425_v7 }
  0xbc   : > { %3075 = vmatprep.mubr.msk.bf16.mxu0 %vm3860_vm0, %v3859_v1  ;;  %3081 = vmatprep.subr.bf16.mxu1 %v3859_v1 }
  0xbd   : > { %3083 = vmatprep.mubr.msk.bf16.mxu1 %vm3860_vm0, %v3859_v1 }
  0xbe   : > { %3074 = vmatpush3.bf16.msra.mxu0 %v3424_v8 }
  0xbf   : > { %3082 = vmatpush3.bf16.msra.mxu1 %v3427_v9 }
  0xc1   : > { %3076 = vmatmul.mubr.msk.bf16.vlgmr.msra.gmra.mxu0 %vm709_vm1, %v3426_v10 }
  0xc2   : > { %3084 = vmatmul.mubr.msk.bf16.vlgmr.msra.gmra.mxu1 %vm709_vm1, %v3426_v10 }
 0x179   : > { %v747_v13 = vpop.f32.mrf.mxu0 }
 0x17a   : > { %v748_v14 = vadd.f32 %v2882_v11, %v747_v13  ;;  %v811_v15 = vpop.f32.mrf.mxu1 }
 0x17b   : > { %v812_v16 = vadd.f32 %v2887_v12, %v811_v15  ;;  %v3061_v17 = vpop.f32.mrf.mxu0 }
 0x17c   : > { %v2983_v18 = vpack.c.bf16 %v748_v14, %v748_v14  ;;  %v3069_v19 = vpop.f32.mrf.mxu1 }
 0x17d   : > { %v2985_v20 = vpack.c.bf16 %v812_v16, %v812_v16  ;;  %v750_v21 = vpop.f32.mrf.mxu0 }
 0x17e   : > { %827 = vst.msk [vmem:[#allocation2] sm:$0xf] %vm826_vm2, %v2983_v18  ;;  %v751_v22 = vadd.f32 %v2882_v11, %v750_v21  ;;  %v814_v23 = vpop.f32.mrf.mxu1  ;;  %838 = vrot.lane.b32.xlu0 %v2983_v18, %s3861_s10 }
 0x17f   : > { %836 = vst.msk [vmem:[#allocation3] sm:$0xf] %vm826_vm2, %v2985_v20  ;;  %v815_v24 = vadd.f32 %v2887_v12, %v814_v23  ;;  %847 = vrot.lane.b32.xlu1 %v2985_v20, %s3861_s10  ;;  %v3062_v25 = vpop.f32.mrf.mxu0 }
 0x180   : > { %v2984_v27 = vpack.c.bf16 %v751_v22, %v751_v22  ;;  %v3070_v28 = vpop.f32.mrf.mxu1 }
 0x181   : > { %v2986_v30 = vpack.c.bf16 %v815_v24, %v815_v24  ;;  %v958_v31 = vpop.f32.mrf.mxu0 }
 0x182   : > { %828 = vst.msk [vmem:[#allocation2 + $0x4] sm:$0xf] %vm826_vm2, %v2984_v27  ;;  %856 = vrot.lane.b32.xlu0 %v2983_v18, %s3862_s8  ;;  %v959_v32 = vadd.f32 %v2895_v26, %v958_v31  ;;  %v1022_v33 = vpop.f32.mrf.mxu1 }
 0x183   : > { %837 = vst.msk [vmem:[#allocation3 + $0x4] sm:$0xf] %vm826_vm2, %v2986_v30  ;;  %849 = vrot.lane.b32.xlu1 %v2986_v30, %s3861_s10  ;;  %v3077_v34 = vpop.f32.mrf.mxu0  ;;  %v1023_v35 = vadd.f32 %v2900_v29, %v1022_v33 }
 0x184   : > { %v2987_v36 = vpack.c.bf16 %v959_v32, %v959_v32  ;;  %v3085_v37 = vpop.f32.mrf.mxu1 }
 0x185   : > { %v961_v38 = vpop.f32.mrf.mxu0  ;;  %v2989_v39 = vpack.c.bf16 %v1023_v35, %v1023_v35 }
 0x186   : > { %865 = vrot.lane.b32.xlu0 %v2985_v20, %s3862_s8  ;;  %1037 = vst.msk [vmem:[#allocation4] sm:$0xf] %vm826_vm2, %v2987_v36  ;;  %v962_v40 = vadd.f32 %v2895_v26, %v961_v38  ;;  %v1025_v41 = vpop.f32.mrf.mxu1 }
 0x187   : > { %858 = vrot.lane.b32.xlu1 %v2984_v27, %s3862_s8  ;;  %1046 = vst.msk [vmem:[#allocation5] sm:$0xf] %vm826_vm2, %v2989_v39  ;;  %v3078_v42 = vpop.f32.mrf.mxu0  ;;  %v1026_v43 = vadd.f32 %v2900_v29, %v1025_v41 }
 0x188   : > { %v2988_v44 = vpack.c.bf16 %v962_v40, %v962_v40  ;;  %v3086_v45 = vpop.f32.mrf.mxu1 }
 0x189   : > { %v2990_v46 = vpack.c.bf16 %v1026_v43, %v1026_v43 }
 0x18a   : > { %874 = vrot.lane.b32.xlu0 %v2983_v18, %s3863_s15  ;;  %1038 = vst.msk [vmem:[#allocation4 + $0x4] sm:$0xf] %vm826_vm2, %v2988_v44 }
 0x18b   : > { %867 = vrot.lane.b32.xlu1 %v2986_v30, %s3862_s8  ;;  %1047 = vst.msk [vmem:[#allocation5 + $0x4] sm:$0xf] %vm826_vm2, %v2990_v46 }
 0x18e   : > { %883 = vrot.lane.b32.xlu0 %v2985_v20, %s3863_s15 }
 0x18f   : > { %876 = vrot.lane.b32.xlu1 %v2984_v27, %s3863_s15 }
 0x192   : > { %840 = vrot.lane.b32.xlu0 %v2984_v27, %s3861_s10 }
 0x193   : > { %885 = vrot.lane.b32.xlu1 %v2986_v30, %s3863_s15 }
 0x196   : > { %1048 = vrot.lane.b32.xlu0 %v2987_v36, %s3861_s10 }
 0x197   : > { %1050 = vrot.lane.b32.xlu1 %v2988_v44, %s3861_s10 }
 0x19a   : > { %1057 = vrot.lane.b32.xlu0 %v2989_v39, %s3861_s10 }
 0x19b   : > { %1059 = vrot.lane.b32.xlu1 %v2990_v46, %s3861_s10 }
 0x19e   : > { %1066 = vrot.lane.b32.xlu0 %v2987_v36, %s3862_s8 }
 0x19f   : > { %1068 = vrot.lane.b32.xlu1 %v2988_v44, %s3862_s8 }
 0x1a2   : > { %1075 = vrot.lane.b32.xlu0 %v2989_v39, %s3862_s8 }
 0x1a3   : > { %1077 = vrot.lane.b32.xlu1 %v2990_v46, %s3862_s8 }
 0x1a6   : > { %1084 = vrot.lane.b32.xlu0 %v2987_v36, %s3863_s15 }
 0x1a7   : > { %1086 = vrot.lane.b32.xlu1 %v2988_v44, %s3863_s15 }
 0x1aa   : > { %1093 = vrot.lane.b32.xlu0 %v2989_v39, %s3863_s15 }
 0x1ab   : > { %1095 = vrot.lane.b32.xlu1 %v2990_v46, %s3863_s15 }
 0x1f0   : > { %v839_v47 = vpop.permute.xlu0 %838 }
 0x1f1   : > { %v848_v48 = vpop.permute.xlu1 %847  ;;  %845 = vst.msk [vmem:[#allocation2 + $0x8] sm:$0xf] %vm826_vm2, %v839_v47 }
 0x1f2   : > { %854 = vst.msk [vmem:[#allocation3 + $0x8] sm:$0xf] %vm826_vm2, %v848_v48 }
 0x1f4   : > { %v857_v49 = vpop.permute.xlu0 %856 }
 0x1f5   : > { %v850_v50 = vpop.permute.xlu1 %849  ;;  %863 = vst.msk [vmem:[#allocation2 + $0x10] sm:$0xf] %vm826_vm2, %v857_v49 }
 0x1f6   : > { %855 = vst.msk [vmem:[#allocation3 + $0xc] sm:$0xf] %vm826_vm2, %v850_v50 }
 0x1f8   : > { %v866_v51 = vpop.permute.xlu0 %865 }
 0x1f9   : > { %872 = vst.msk [vmem:[#allocation3 + $0x10] sm:$0xf] %vm826_vm2, %v866_v51  ;;  %v859_v52 = vpop.permute.xlu1 %858 }
 0x1fa   : > { %864 = vst.msk [vmem:[#allocation2 + $0x14] sm:$0xf] %vm826_vm2, %v859_v52 }
 0x1fc   : > { %v875_v53 = vpop.permute.xlu0 %874 }
 0x1fd   : > { %881 = vst.msk [vmem:[#allocation2 + $0x18] sm:$0xf] %vm826_vm2, %v875_v53  ;;  %v868_v54 = vpop.permute.xlu1 %867 }
 0x1fe   : > { %873 = vst.msk [vmem:[#allocation3 + $0x14] sm:$0xf] %vm826_vm2, %v868_v54 }
 0x200   : > { %v884_v55 = vpop.permute.xlu0 %883 }
 0x201   : > { %890 = vst.msk [vmem:[#allocation3 + $0x18] sm:$0xf] %vm826_vm2, %v884_v55  ;;  %v877_v56 = vpop.permute.xlu1 %876 }
 0x202   : > { %882 = vst.msk [vmem:[#allocation2 + $0x1c] sm:$0xf] %vm826_vm2, %v877_v56 }
 0x204   : > { %v841_v57 = vpop.permute.xlu0 %840 }
 0x205   : > { %v886_v58 = vpop.permute.xlu1 %885  ;;  %846 = vst.msk [vmem:[#allocation2 + $0xc] sm:$0xf] %vm826_vm2, %v841_v57 }
 0x206   : > { %891 = vst.msk [vmem:[#allocation3 + $0x1c] sm:$0xf] %vm826_vm2, %v886_v58 }
 0x208   : > { %v1049_v59 = vpop.permute.xlu0 %1048 }
 0x209   : > { %1055 = vst.msk [vmem:[#allocation4 + $0x8] sm:$0xf] %vm826_vm2, %v1049_v59  ;;  %v1051_v60 = vpop.permute.xlu1 %1050 }
 0x20a   : > { %1056 = vst.msk [vmem:[#allocation4 + $0xc] sm:$0xf] %vm826_vm2, %v1051_v60 }
 0x20c   : > { %v1058_v61 = vpop.permute.xlu0 %1057 }
 0x20d   : > { %1064 = vst.msk [vmem:[#allocation5 + $0x8] sm:$0xf] %vm826_vm2, %v1058_v61  ;;  %v1060_v62 = vpop.permute.xlu1 %1059 }
 0x20e   : > { %1065 = vst.msk [vmem:[#allocation5 + $0xc] sm:$0xf] %vm826_vm2, %v1060_v62 }
 0x210   : > { %v1067_v63 = vpop.permute.xlu0 %1066 }
 0x211   : > { %1073 = vst.msk [vmem:[#allocation4 + $0x10] sm:$0xf] %vm826_vm2, %v1067_v63  ;;  %v1069_v0 = vpop.permute.xlu1 %1068 }
 0x212   : > { %1074 = vst.msk [vmem:[#allocation4 + $0x14] sm:$0xf] %vm826_vm2, %v1069_v0 }
 0x214   : > { %v1076_v1 = vpop.permute.xlu0 %1075 }
 0x215   : > { %1082 = vst.msk [vmem:[#allocation5 + $0x10] sm:$0xf] %vm826_vm2, %v1076_v1  ;;  %v1078_v2 = vpop.permute.xlu1 %1077 }
 0x216   : > { %1083 = vst.msk [vmem:[#allocation5 + $0x14] sm:$0xf] %vm826_vm2, %v1078_v2 }
 0x218   : > { %v1085_v3 = vpop.permute.xlu0 %1084 }
 0x219   : > { %1091 = vst.msk [vmem:[#allocation4 + $0x18] sm:$0xf] %vm826_vm2, %v1085_v3  ;;  %v1087_v4 = vpop.permute.xlu1 %1086 }
 0x21a   : > { %1092 = vst.msk [vmem:[#allocation4 + $0x1c] sm:$0xf] %vm826_vm2, %v1087_v4 }
 0x21c   : > { %v1094_v5 = vpop.permute.xlu0 %1093 }
 0x21d   : > { %1100 = vst.msk [vmem:[#allocation5 + $0x18] sm:$0xf] %vm826_vm2, %v1094_v5  ;;  %v1096_v6 = vpop.permute.xlu1 %1095 }
 0x21e   : > { %1101 = vst.msk [vmem:[#allocation5 + $0x1c] sm:$0xf] %vm826_vm2, %v1096_v6 }
 0x21f PF: > { %v3428_v7 = vld [vmem:[#allocation11 + $0x8] sm:$0xff]   ;;  %s4659_s29 = sld [smem:[#allocation28_spill]]  ;;  %v3864_v8 = vmov 0.0   ;;  %v3429_v9 = vld [vmem:[#allocation11] sm:$0xff]   ;;  %vm3865_vm3 = vmmov 0   ;;  %s1102_s9 = sshra.s32 %s2880_s6, 3  ;;  %v1107_v30 = vlaneseq  ;;  %v1109_v34 = vstv %s2880_s6 }
 0x220   : > { %3087 = vmatprep.subr.bf16.mxu0 %v3864_v8  ;;  %3095 = vmatprep.subr.bf16.mxu1 %v3864_v8  ;;  %s2908_s2 = sshll.u32 %s1102_s9, 2  ;;  %vm1148_vm4 = vcmask 261120   ;;  %v3430_v11 = vld [vmem:[#allocation2] sm:$0xff]   ;;  %vm1214_vm5 = vcmask 64512   ;;  %v3431_v13 = vld [vmem:[#allocation2 + $0x8] sm:$0xff]   ;;  %s4660_s12 = sld [smem:[#allocation36_spill]] }
 0x221   : > { %3088 = vmatpush3.bf16.msra.mxu0 %v3428_v7  ;;  %3091 = vmatprep.mubr.msk.bf16.mxu0 %vm3865_vm3, %v3864_v8  ;;  %s1105_s14 = scalar_lea.vmem %s4208_s17, %s2908_s2  ;;  %v1219_v12 = vsel %vm1214_vm5, %v3430_v11, 0  ;;  %v1270_v14 = vsel %vm1214_vm5, %v3431_v13, 0  ;;  %v3432_v19 = vld [vmem:[#allocation2 + $0x10] sm:$0xff]   ;;  %s3866_s24 = smov 104   ;;  %v3433_v25 = vld [vmem:[#allocation2 + $0x18] sm:$0xff]   ;;  %v4329_v32 = vshrl.u32 %v1107_v30, 7 }
 0x222   : > { %3089 = vmatprep.subr.bf16.mxu0 %v3864_v8  ;;  %3097 = vmatprep.mubr.msk.bf16.mxu1 %vm3865_vm3, %v3864_v8  ;;  %v4294_v10 = vld [vmem:[%s1105_s14] sm:$0xf]  ;;  %v1321_v24 = vsel %vm1214_vm5, %v3432_v19, 0  ;;  %s3867_s21 = smov 120   ;;  %s3868_s16 = smov 112   ;;  %v1372_v26 = vsel %vm1214_vm5, %v3433_v25, 0 }
 0x223   : > { %3096 = vmatpush3.bf16.xpose.msra.mxu1 %v1219_v12  ;;  %s4661_s10 = scalar_lea.vmem [#allocation6], %s4171_s4  ;;  %v1119_v33 = vsub.s32 0, %v4329_v32  ;;  %v3869_v35 = vmov 0   ;;  %v1110_v37 = vadd.s32 %v1109_v34, %v4329_v32  ;;  %v1112_v38 = vand.u32 127, %v1107_v30  ;;  %v3434_v7 = vld [vmem:[#allocation3] sm:$0xff]   ;;  %v3435_v25 = vld [vmem:[#allocation3 + $0x8] sm:$0xff]  }
 0x224   : > { %3107 = vmatprep.subr.bf16.mxu1 %v3864_v8  ;;  %v1114_v31 = vld [vmem:[%s4661_s10] sm:$0x1]  ;;  %v3870_v40 = vmov -1e+10   ;;  %vm1414_vm10 = vcmask 130048   ;;  %s3871_s6 = smov 8  }
 0x225   : > { %3090 = vmatpush3.bf16.msra.mxu0 %v3429_v9  ;;  %vm1115_vm6 = vcmp.ne.f32.partialorder %v1114_v31, 0.0  ;;  %vm1113_vm7 = vcmp.ge.s32.totalorder %v1110_v37, %v1112_v38  ;;  %v3437_v38 = vld [vmem:[#allocation3 + $0x18] sm:$0xff]   ;;  %s3872_s8 = smov 16   ;;  %s3873_s15 = smov 24   ;;  %vm1681_vm11 = vcmask 195584   ;;  %vm2117_vm13 = vcmask 125952  }
 0x226   : > { %3101 = vmatprep.subr.bf16.mxu0 %v3864_v8  ;;  %v2909_v15 = vld [vmem:[%s4660_s12] ss:$0 sm:$0xff]  ;;  %v1116_v36 = vsel %vm1115_vm6, 1, %v3869_v35  ;;  %s4662_s14 = scalar_lea.vmem [#allocation9], %s4171_s4  ;;  %s4663_s13 = sld [smem:[#allocation41_spill]]  ;;  %vm2541_vm14 = vcmask 523264  }
 0x227   : > { %v1120_v39 = vrot.slane %v1116_v36, %v1119_v33  ;;  %s4664_s10 = sld [smem:[#allocation43_spill]]  ;;  %s2647_s9 = sshll.u32 %s4217_s27, 4  ;;  %s4501_s9 = int_to_ptr.vmem [resolvable:$true] %s2647_s9 }
 0x228   : > { %3092 = vmatmul.mubr.msk.bf16.vlgmr.msra.gmra.mxu0 %vm1148_vm4, %v4294_v10  ;;  %s4667_s4 = sld [smem:[#allocation46_spill]] }
 0x229   : > { %3103 = vmatprep.mubr.msk.bf16.mxu0 %vm3865_vm3, %v3864_v8  ;;  %3102 = vmatpush3.bf16.xpose.msra.mxu0 %v1270_v14  ;;  %vm1121_vm8 = vcmp.eq.s32.totalorder %v1120_v39, 1 }
 0x22a   : > { %3113 = vmatprep.subr.bf16.mxu0 %v3864_v8  ;;  %vm1122_vm9 = vmand %vm1113_vm7, %vm1121_vm8 }
 0x22b   : > { %v1123_v41 = vsel %vm1122_vm9, 0.0, %v3870_v40 }
 0x2e8   : > { %v1186_v16 = vpop.f32.mrf.mxu0 }
 0x2e9   : > { %v1187_v17 = vadd.f32 %v2909_v15, %v1186_v16 }
 0x2ea   : > { %v3093_v18 = vpop.f32.mrf.mxu0 }
 0x2eb   : > { %v1192_v20 = vmul.f32 0.35355338, %v1187_v17 }
 0x2ec   : > { %v1189_v21 = vpop.f32.mrf.mxu0 }
 0x2ed   : > { %v1193_v22 = vpack.c.bf16 %v1192_v20, %v1192_v20 }
 0x2ee   : > { %v3094_v23 = vpop.f32.mrf.mxu0 }
 0x2ef   : > { %1199 = vrot.lane.b32.xlu1 %v1193_v22, %s3866_s24  ;;  %1195 = vrot.lane.b32.xlu0 %v1193_v22, %s3867_s21 }
 0x2f0   : > { %3098 = vmatmul.mubr.msk.bf16.vlgmr.msra.gmra.mxu1 %vm1214_vm5, %v1193_v22 }
 0x2f1   : > { %3108 = vmatpush3.bf16.xpose.msra.mxu1 %v1321_v24  ;;  %3109 = vmatprep.mubr.msk.bf16.mxu1 %vm3865_vm3, %v3864_v8 }
 0x2f2   : > { %3119 = vmatprep.subr.bf16.mxu1 %v3864_v8 }
 0x2f3   : > { %1197 = vrot.lane.b32.xlu0 %v1193_v22, %s3868_s16 }
 0x361   : > { %v1196_v27 = vpop.permute.xlu0 %1195  ;;  %v1200_v29 = vpop.permute.xlu1 %1199 }
 0x362   : > { %3104 = vmatmul.mubr.msk.bf16.vlgmr.msra.gmra.mxu0 %vm1214_vm5, %v1196_v27 }
 0x363   : > { %3114 = vmatpush3.bf16.xpose.msra.mxu0 %v1372_v26  ;;  %3115 = vmatprep.mubr.msk.bf16.mxu0 %vm3865_vm3, %v3864_v8 }
 0x364   : > { %3125 = vmatprep.subr.bf16.mxu0 %v3864_v8 }
 0x365   : > { %v1198_v28 = vpop.permute.xlu0 %1197 }
 0x366   : > { %3110 = vmatmul.mubr.msk.bf16.vlgmr.msra.gmra.mxu1 %vm1214_vm5, %v1198_v28 }
 0x367   : > { %3121 = vmatprep.mubr.msk.bf16.mxu1 %vm3865_vm3, %v3864_v8  ;;  %3120 = vmatpush3.bf16.msra.mxu1 %v3434_v7 }
 0x368   : > { %3131 = vmatprep.subr.bf16.mxu1 %v3864_v8 }
 0x36a   : > { %3116 = vmatmul.mubr.msk.bf16.vlgmr.msra.gmra.mxu0 %vm1214_vm5, %v1200_v29  ;;  %v3436_v29 = vld [vmem:[#allocation3 + $0x10] sm:$0xff]  }
 0x36b   : > { %3127 = vmatprep.mubr.msk.bf16.mxu0 %vm3865_vm3, %v3864_v8  ;;  %3126 = vmatpush3.bf16.msra.mxu0 %v3435_v25  ;;  %v3441_v25 = vld [vmem:[#allocation12] sm:$0xff]  }
 0x36c   : > { %3137 = vmatprep.subr.bf16.mxu0 %v3864_v8 }
 0x3b0   : > { %v1255_v42 = vpop.f32.mrf.mxu1 }
 0x3b1   : > { %v1256_v43 = vadd.f32 %v1255_v42, %v1123_v41 }
 0x3b2   : > { %v3099_v44 = vpop.f32.mrf.mxu1 }
 0x3b3   : > { %v1415_v45 = vsel %vm1414_vm10, %v1256_v43, -inf }
 0x3b4   : > { %1416 = vmax.xlane.f32.xlu1 %v1415_v45  ;;  %v1258_v46 = vpop.f32.mrf.mxu1 }
 0x3b6   : > { %v3100_v47 = vpop.f32.mrf.mxu1 }
 0x422   : > { %v1306_v48 = vpop.f32.mrf.mxu0 }
 0x423   : > { %v1307_v49 = vadd.f32 %v1306_v48, %v1123_v41 }
 0x424   : > { %v3105_v50 = vpop.f32.mrf.mxu0 }
 0x425   : > { %v1418_v51 = vsel %vm1414_vm10, %v1307_v49, -inf }
 0x426   : > { %v1357_v52 = vpop.f32.mrf.mxu1  ;;  %1419 = vmax.xlane.f32.xlu0 %v1418_v51  ;;  %v1309_v53 = vpop.f32.mrf.mxu0  ;;  %v3438_v51 = vld [vmem:[#allocation11 + $0x38] sm:$0xff]  }
 0x427   : > { %v1358_v54 = vadd.f32 %v1357_v52, %v1123_v41  ;;  %v3439_v52 = vld [vmem:[#allocation11 + $0x30] sm:$0xff]  }
 0x428   : > { %v3106_v55 = vpop.f32.mrf.mxu0  ;;  %v3111_v56 = vpop.f32.mrf.mxu1 }
 0x429   : > { %v1421_v57 = vsel %vm1414_vm10, %v1358_v54, -inf }
 0x42a   : > { %v1360_v58 = vpop.f32.mrf.mxu1  ;;  %1422 = vmax.xlane.f32.xlu0 %v1421_v57  ;;  %v1408_v59 = vpop.f32.mrf.mxu0 }
 0x42b   : > { %v1409_v60 = vadd.f32 %v1408_v59, %v1123_v41 }
 0x42c   : > { %v3112_v61 = vpop.f32.mrf.mxu1  ;;  %v3117_v62 = vpop.f32.mrf.mxu0 }
 0x42d   : > { %v1424_v63 = vsel %vm1414_vm10, %v1409_v60, -inf }
 0x42e   : > { %1425 = vmax.xlane.f32.xlu1 %v1424_v63  ;;  %v1411_v0 = vpop.f32.mrf.mxu0 }
 0x430   : > { %v3118_v1 = vpop.f32.mrf.mxu0 }
 0x43d   : > { %v1417_v2 = vpop.xlane.xlu1 %1416 }
 0x43e   : > { %v1427_v3 = vsub.f32 %v1256_v43, %v1417_v2 }
 0x440   : > { %v1431_v4 = vmul.f32 1.442695, %v1427_v3 }
 0x442   : > { %3458 = vpow2.f32 %v1431_v4 }
 0x44f   : > { %v3459_v5 = vpop.eup %3458 }
 0x450   : > { %v1439_v6 = vsel %vm1414_vm10, %v3459_v5, 0.0 }
 0x451   : > { %1440 = vadd.xlane.f32.xlu0 %v1439_v6 }
 0x4af   : > { %v1420_v9 = vpop.xlane.xlu0 %1419 }
 0x4b0   : > { %v1428_v11 = vsub.f32 %v1307_v49, %v1420_v9  ;;  %v2929_v9 = vld [vmem:[%s4660_s12 + $0x3] ss:$0 sm:$0xff]  ;;  %s4665_s12 = sld [smem:[#allocation42_spill]] }
 0x4b2   : > { %v1433_v12 = vmul.f32 1.442695, %v1428_v11  ;;  %v1749_v11 = vunpack.c.l.bf16 %v4294_v10 }
 0x4b3   : > { %v1423_v13 = vpop.xlane.xlu0 %1422 }
 0x4b4   : > { %3460 = vpow2.f32 %v1433_v12  ;;  %v1429_v14 = vsub.f32 %v1358_v54, %v1423_v13 }
 0x4b6   : > { %v1435_v15 = vmul.f32 1.442695, %v1429_v14 }
 0x4b7   : > { %v1426_v16 = vpop.xlane.xlu1 %1425 }
 0x4b8   : > { %3462 = vpow2.f32 %v1435_v15  ;;  %v1430_v17 = vsub.f32 %v1409_v60, %v1426_v16 }
 0x4ba   : > { %v1437_v18 = vmul.f32 1.442695, %v1430_v17 }
 0x4bc   : > { %3464 = vpow2.f32 %v1437_v18 }
 0x4c1   : > { %v3461_v19 = vpop.eup %3460 }
 0x4c2   : > { %v1442_v20 = vsel %vm1414_vm10, %v3461_v19, 0.0 }
 0x4c3   : > { %1443 = vadd.xlane.f32.xlu1 %v1442_v20 }
 0x4c5   : > { %v3463_v21 = vpop.eup %3462 }
 0x4c6   : > { %v1445_v22 = vsel %vm1414_vm10, %v3463_v21, 0.0 }
 0x4c7   : > { %1446 = vadd.xlane.f32.xlu0 %v1445_v22 }
 0x4c9   : > { %v3465_v23 = vpop.eup %3464 }
 0x4ca   : > { %v1448_v24 = vsel %vm1414_vm10, %v3465_v23, 0.0 }
 0x4cb   : > { %1449 = vadd.xlane.f32.xlu1 %v1448_v24  ;;  %v3440_v24 = vld [vmem:[#allocation12 + $0x8] sm:$0xff]  }
 0x4da   : > { %v1441_v26 = vpop.xlane.xlu0 %1440 }
 0x4db   : > { %3466 = vrcp.f32 %v1441_v26 }
 0x4e8   : > { %v3467_v27 = vpop.eup %3466 }
 0x4e9   : > { %v1455_v28 = vmul.f32 %v3467_v27, %v3459_v5 }
 0x4eb   : > { %v1459_v30 = vpack.c.bf16 %v1455_v28, %v1455_v28 }
 0x4ed   : > { %3122 = vmatmul.mubr.msk.bf16.vlgmr.msra.gmra.mxu1 %vm1414_vm10, %v1459_v30 }
 0x4ee   : > { %3132 = vmatpush3.bf16.msra.mxu1 %v3436_v29  ;;  %3133 = vmatprep.mubr.msk.bf16.mxu1 %vm3865_vm3, %v3864_v8  ;;  %v2933_v29 = vld [vmem:[#allocation15] ss:$0 sm:$0xff] }
 0x4ef   : > { %3143 = vmatprep.subr.bf16.mxu1 %v3864_v8 }
 0x54c   : > { %v1444_v31 = vpop.xlane.xlu1 %1443 }
 0x54d   : > { %3468 = vrcp.f32 %v1444_v31  ;;  %v2934_v31 = vld [vmem:[#allocation17] ss:$0 sm:$0xff] }
 0x550   : > { %v1447_v34 = vpop.xlane.xlu0 %1446 }
 0x551   : > { %3470 = vrcp.f32 %v1447_v34 }
 0x554   : > { %v1450_v35 = vpop.xlane.xlu1 %1449 }
 0x555   : > { %3472 = vrcp.f32 %v1450_v35 }
 0x55a   : > { %v3469_v36 = vpop.eup %3468 }
 0x55b   : > { %v1456_v37 = vmul.f32 %v3469_v36, %v3461_v19 }
 0x55d   : > { %v1460_v39 = vpack.c.bf16 %v1456_v37, %v1456_v37  ;;  %v3442_v37 = vld [vmem:[#allocation4] sm:$0xff]  }
 0x55e   : > { %v3471_v41 = vpop.eup %3470 }
 0x55f   : > { %3128 = vmatmul.mubr.msk.bf16.vlgmr.msra.gmra.mxu0 %vm1414_vm10, %v1460_v39  ;;  %v1457_v42 = vmul.f32 %v3471_v41, %v3463_v21  ;;  %v3443_v39 = vld [vmem:[#allocation4 + $0x8] sm:$0xff]  }
 0x560   : > { %3138 = vmatpush3.bf16.msra.mxu0 %v3437_v38  ;;  %3139 = vmatprep.mubr.msk.bf16.mxu0 %vm3865_vm3, %v3864_v8  ;;  %v1874_v38 = vsel %vm1214_vm5, %v3442_v37, 0  ;;  %v1925_v41 = vsel %vm1214_vm5, %v3443_v39, 0 }
 0x561   : > { %v1461_v43 = vpack.c.bf16 %v1457_v42, %v1457_v42  ;;  %3151 = vmatprep.subr.bf16.mxu0 %v3864_v8  ;;  %v2935_v42 = vld [vmem:[#allocation14] ss:$0 sm:$0xff] }
 0x562   : > { %v3473_v44 = vpop.eup %3472 }
 0x563   : > { %3134 = vmatmul.mubr.msk.bf16.vlgmr.msra.gmra.mxu1 %vm1414_vm10, %v1461_v43  ;;  %v1458_v45 = vmul.f32 %v3473_v44, %v3465_v23 }
 0x564   : > { %3147 = vmatprep.mubr.msk.bf16.mxu1 %vm3865_vm3, %v3864_v8  ;;  %3144 = vmatpush3.bf16.msra.mxu1 %v3438_v51 }
 0x565   : > { %v1462_v46 = vpack.c.bf16 %v1458_v45, %v1458_v45  ;;  %3145 = vmatprep.subr.bf16.mxu1 %v3864_v8 }
 0x567   : > { %3140 = vmatmul.mubr.msk.bf16.vlgmr.msra.gmra.mxu0 %vm1414_vm10, %v1462_v46  ;;  %v3444_v46 = vld [vmem:[#allocation4 + $0x10] sm:$0xff]  }
 0x568   : > { %3155 = vmatprep.mubr.msk.bf16.mxu0 %vm3865_vm3, %v3864_v8  ;;  %3146 = vmatpush3.bf16.msra.mxu1 %v3439_v52  ;;  %v1976_v51 = vsel %vm1214_vm5, %v3444_v46, 0  ;;  %v3445_v52 = vld [vmem:[#allocation4 + $0x18] sm:$0xff]  }
 0x569   : > { %3159 = vmatprep.subr.bf16.mxu1 %v3864_v8  ;;  %3152 = vmatpush3.bf16.msra.mxu0 %v3440_v24  ;;  %v3446_v24 = vld [vmem:[#allocation5] sm:$0xff]  }
 0x56a   : > { %3153 = vmatprep.subr.bf16.mxu0 %v3864_v8 }
 0x56d   : > { %3154 = vmatpush3.bf16.msra.mxu0 %v3441_v25 }
 0x56e   : > { %3165 = vmatprep.subr.bf16.mxu0 %v3864_v8 }
 0x5ad   : > { %v1514_v47 = vpop.f32.mrf.mxu1 }
 0x5af   : > { %v3123_v48 = vpop.f32.mrf.mxu1 }
 0x5b1   : > { %v1517_v49 = vpop.f32.mrf.mxu1 }
 0x5b3   : > { %v3124_v50 = vpop.f32.mrf.mxu1 }
 0x61f   : > { %v1563_v53 = vpop.f32.mrf.mxu0 }
 0x620   : > { %1668 = vrot.lane.b32.xlu0 %v1563_v53, %s3871_s6  ;;  %v2027_v53 = vsel %vm1214_vm5, %v3445_v52, 0 }
 0x621   : > { %v3129_v54 = vpop.f32.mrf.mxu0 }
 0x623   : > { %v1566_v55 = vpop.f32.mrf.mxu0  ;;  %v1612_v56 = vpop.f32.mrf.mxu1 }
 0x624   : > { %1672 = vrot.lane.b32.xlu1 %v1612_v56, %s3872_s8 }
 0x625   : > { %v3130_v57 = vpop.f32.mrf.mxu0  ;;  %v3135_v58 = vpop.f32.mrf.mxu1 }
 0x626   : > { %v1124_v57 = vld [vmem:[%s4662_s14] sm:$0x1] }
 0x627   : > { %v1615_v59 = vpop.f32.mrf.mxu1  ;;  %v1661_v60 = vpop.f32.mrf.mxu0  ;;  %vm1125_vm12 = vcmp.ne.f32.partialorder %v1124_v57, 0.0 }
 0x628   : > { %1676 = vrot.lane.b32.xlu1 %v1661_v60, %s3873_s15  ;;  %v1126_v58 = vsel %vm1125_vm12, 0.0, %v3870_v40 }
 0x629   : > { %v3136_v61 = vpop.f32.mrf.mxu1  ;;  %v3141_v62 = vpop.f32.mrf.mxu0  ;;  %v1863_v59 = vrot.slane %v1126_v58, %v1119_v33 }
 0x62b   : > { %v1664_v63 = vpop.f32.mrf.mxu0 }
 0x62d   : > { %v3142_v0 = vpop.f32.mrf.mxu0 }
 0x692   : > { %v1669_v1 = vpop.permute.xlu0 %1668 }
 0x693   : > { %v1679_v3 = vsel %vm1214_vm5, %v1514_v47, %v1669_v1 }
 0x696   : > { %v1673_v2 = vpop.permute.xlu1 %1672 }
 0x697   : > { %v1680_v4 = vsel %vm1414_vm10, %v1679_v3, %v1673_v2 }
 0x69a   : > { %v1677_v5 = vpop.permute.xlu1 %1676 }
 0x69b   : > { %v1682_v6 = vsel %vm1681_vm11, %v1680_v4, %v1677_v5 }
 0x69c   : > { %v1683_v7 = vpack.c.bf16 %v1682_v6, %v1682_v6 }
 0x69e   : > { %3148 = vmatmul.mubr.msk.bf16.vlgmr.msra.gmra.mxu1 %vm1148_vm4, %v1683_v7 }
 0x69f   : > { %3161 = vmatprep.mubr.msk.bf16.mxu1 %vm3865_vm3, %v3864_v8  ;;  %3160 = vmatpush3.bf16.xpose.msra.mxu1 %v1874_v38 }
 0x6a0   : > { %3171 = vmatprep.subr.bf16.mxu1 %v3864_v8 }
 0x75e   : > { %v1743_v12 = vpop.f32.mrf.mxu1 }
 0x75f   : > { %v1744_v13 = vadd.f32 %v2929_v9, %v1743_v12 }
 0x760   : > { %v3149_v14 = vpop.f32.mrf.mxu1 }
 0x761   : > { %v1750_v15 = vadd.f32 %v1749_v11, %v1744_v13 }
 0x762   : > { %v1746_v16 = vpop.f32.mrf.mxu1 }
 0x763   : > { %v1753_v17 = vsel %vm1148_vm4, %v1750_v15, 0.0 }
 0x764   : > { %1754 = vadd.xlane.f32.xlu0 %v1753_v17  ;;  %v3150_v18 = vpop.f32.mrf.mxu1 }
 0x7ed   : > { %v1755_v19 = vpop.xlane.xlu0 %1754 }
 0x7ee   : > { %v1757_v20 = vmul.f32 0.03125, %v1755_v19 }
 0x7f0   : > { %v1758_v21 = vsub.f32 %v1750_v15, %v1757_v20 }
 0x7f2   : > { %v1759_v22 = vmul.f32 %v1758_v21, %v1758_v21 }
 0x7f4   : > { %v1760_v23 = vsel %vm1148_vm4, %v1759_v22, 0.0 }
 0x7f5   : > { %1761 = vadd.xlane.f32.xlu1 %v1760_v23 }
 0x87e   : > { %v1762_v10 = vpop.xlane.xlu1 %1761 }
 0x87f   : > { %v1763_v26 = vmul.f32 0.03125, %v1762_v10 }
 0x881   : > { %v1764_v27 = vadd.f32 1e-05, %v1763_v26 }
 0x883   : > { %3474 = vrsqrt.f32 %v1764_v27 }
 0x890   : > { %v3475_v28 = vpop.eup %3474 }
 0x891   : > { %v1766_v30 = vmul.f32 %v3475_v28, %v1758_v21 }
 0x893   : > { %v1771_v34 = vmul.f32 %v2933_v29, %v1766_v30 }
 0x895   : > { %v4381_v35 = vadd.f32 %v2934_v31, %v1771_v34 }
 0x897   : > { %v1777_v36 = vpack.c.bf16 %v4381_v35, %v4381_v35 }
 0x899   : > { %3156 = vmatmul.mubr.msk.bf16.vlgmr.msra.gmra.mxu0 %vm1148_vm4, %v1777_v36 }
 0x89a   : > { %3167 = vmatprep.mubr.msk.bf16.mxu0 %vm3865_vm3, %v3864_v8  ;;  %3166 = vmatpush3.bf16.xpose.msra.mxu0 %v1925_v41 }
 0x89b   : > { %3177 = vmatprep.subr.bf16.mxu0 %v3864_v8 }
 0x959   : > { %v1836_v43 = vpop.f32.mrf.mxu0 }
 0x95a   : > { %v1837_v44 = vadd.f32 %v2935_v42, %v1836_v43  ;;  %v3447_v43 = vld [vmem:[#allocation5 + $0x8] sm:$0xff]  }
 0x95b   : > { %v3157_v45 = vpop.f32.mrf.mxu0 }
 0x95c   : > { %v1842_v47 = vmul.f32 0.35355338, %v1837_v44 }
 0x95d   : > { %v1839_v48 = vpop.f32.mrf.mxu0 }
 0x95e   : > { %v1843_v49 = vpack.c.bf16 %v1842_v47, %v1842_v47  ;;  %v3448_v47 = vld [vmem:[#allocation5 + $0x10] sm:$0xff]  }
 0x95f   : > { %v3158_v50 = vpop.f32.mrf.mxu0 }
 0x960   : > { %1847 = vrot.lane.b32.xlu1 %v1843_v49, %s3868_s16  ;;  %1845 = vrot.lane.b32.xlu0 %v1843_v49, %s3867_s21  ;;  %s4666_s16 = sld [smem:[#allocation44_spill]]  ;;  %s3874_s21 = smov [#allocation19]  }
 0x961   : > { %3162 = vmatmul.mubr.msk.bf16.vlgmr.msra.gmra.mxu1 %vm1214_vm5, %v1843_v49 }
 0x962   : > { %3172 = vmatpush3.bf16.xpose.msra.mxu1 %v1976_v51  ;;  %3173 = vmatprep.mubr.msk.bf16.mxu1 %vm3865_vm3, %v3864_v8 }
 0x963   : > { %3183 = vmatprep.subr.bf16.mxu1 %v3864_v8 }
 0x964   : > { %1849 = vrot.lane.b32.xlu0 %v1843_v49, %s3866_s24  ;;  %s3682_s24 = scalar_lea.vmem %s4501_s9, 256 }
 0x965   : > { %p3683_p5 = scmp.ne.s32.totalorder %s4501_s9, %s3682_s24 }
 0x967   : > { %p3684_p8 = pnand %p3683_p5, %p4123_p12 }
 0x969   : > { %p3685_p9 = pneg %p3684_p8 }
 0x9d2   : > { %v1848_v54 = vpop.permute.xlu1 %1847  ;;  %v1846_v55 = vpop.permute.xlu0 %1845 }
 0x9d3   : > { %3168 = vmatmul.mubr.msk.bf16.vlgmr.msra.gmra.mxu0 %vm1214_vm5, %v1846_v55  ;;  %3174 = vmatmul.mubr.msk.bf16.vlgmr.msra.gmra.mxu1 %vm1214_vm5, %v1848_v54  ;;  %v3449_v54 = vld [vmem:[#allocation5 + $0x18] sm:$0xff]  }
 0x9d4   : > { %3178 = vmatpush3.bf16.xpose.msra.mxu0 %v2027_v53  ;;  %3179 = vmatprep.mubr.msk.bf16.mxu0 %vm3865_vm3, %v3864_v8 }
 0x9d5   : > { %3185 = vmatprep.mubr.msk.bf16.mxu1 %vm3865_vm3, %v3864_v8  ;;  %3189 = vmatprep.subr.bf16.mxu0 %v3864_v8 }
 0x9d6   : > { %v1850_v56 = vpop.permute.xlu0 %1849  ;;  %3184 = vmatpush3.bf16.msra.mxu1 %v3446_v24 }
 0x9d7   : > { %3195 = vmatprep.subr.bf16.mxu1 %v3864_v8 }
 0x9db   : > { %3180 = vmatmul.mubr.msk.bf16.vlgmr.msra.gmra.mxu0 %vm1214_vm5, %v1850_v56 }
 0x9dc   : > { %3191 = vmatprep.mubr.msk.bf16.mxu0 %vm3865_vm3, %v3864_v8  ;;  %3190 = vmatpush3.bf16.msra.mxu0 %v3447_v43 }
 0x9dd   : > { %3201 = vmatprep.subr.bf16.mxu0 %v3864_v8 }
 0xa21   : > { %v1910_v60 = vpop.f32.mrf.mxu1 }
 0xa22   : > { %v1911_v61 = vadd.f32 %v1910_v60, %v1863_v59 }
 0xa23   : > { %v3163_v62 = vpop.f32.mrf.mxu1 }
 0xa24   : > { %v2069_v63 = vsel %vm1414_vm10, %v1911_v61, -inf }
 0xa25   : > { %2070 = vmax.xlane.f32.xlu1 %v2069_v63  ;;  %v1913_v0 = vpop.f32.mrf.mxu1 }
 0xa27   : > { %v3164_v1 = vpop.f32.mrf.mxu1 }
 0xa93   : > { %v1961_v2 = vpop.f32.mrf.mxu0  ;;  %v2012_v3 = vpop.f32.mrf.mxu1 }
 0xa94   : > { %v1962_v4 = vadd.f32 %v1961_v2, %v1863_v59  ;;  %v2013_v7 = vadd.f32 %v2012_v3, %v1863_v59  ;;  %v3450_v2 = vld [vmem:[#allocation12 + $0x38] sm:$0xff]   ;;  %v3451_v3 = vld [vmem:[#allocation12 + $0x30] sm:$0xff]  }
 0xa95   : > { %v3169_v5 = vpop.f32.mrf.mxu0  ;;  %v3175_v6 = vpop.f32.mrf.mxu1 }
 0xa96   : > { %v2072_v9 = vsel %vm1414_vm10, %v1962_v4, -inf  ;;  %v2075_v12 = vsel %vm1414_vm10, %v2013_v7, -inf }
 0xa97   : > { %v2015_v40 = vpop.f32.mrf.mxu1  ;;  %2073 = vmax.xlane.f32.xlu0 %v2072_v9  ;;  %v1964_v32 = vpop.f32.mrf.mxu0 }
 0xa99   : > { %v3170_v33 = vpop.f32.mrf.mxu0  ;;  %v3176_v11 = vpop.f32.mrf.mxu1 }
 0xa9b   : > { %2076 = vmax.xlane.f32.xlu0 %v2075_v12  ;;  %v2063_v13 = vpop.f32.mrf.mxu0 }
 0xa9c   : > { %v2064_v14 = vadd.f32 %v2063_v13, %v1863_v59 }
 0xa9d   : > { %v3181_v15 = vpop.f32.mrf.mxu0 }
 0xa9e   : > { %v2078_v16 = vsel %vm1414_vm10, %v2064_v14, -inf }
 0xa9f   : > { %2079 = vmax.xlane.f32.xlu1 %v2078_v16  ;;  %v2066_v17 = vpop.f32.mrf.mxu0 }
 0xaa1   : > { %v3182_v18 = vpop.f32.mrf.mxu0 }
 0xaae   : > { %v2071_v19 = vpop.xlane.xlu1 %2070 }
 0xaaf   : > { %v2081_v20 = vsub.f32 %v1911_v61, %v2071_v19 }
 0xab1   : > { %v2085_v21 = vmul.f32 1.442695, %v2081_v20 }
 0xab3   : > { %3476 = vpow2.f32 %v2085_v21 }
 0xac0   : > { %v3477_v22 = vpop.eup %3476 }
 0xac1   : > { %v2093_v23 = vsel %vm1414_vm10, %v3477_v22, 0.0 }
 0xac2   : > { %2094 = vadd.xlane.f32.xlu0 %v2093_v23 }
 0xb20   : > { %v2074_v25 = vpop.xlane.xlu0 %2073 }
 0xb21   : > { %v2082_v10 = vsub.f32 %v1962_v4, %v2074_v25 }
 0xb23   : > { %v2087_v26 = vmul.f32 1.442695, %v2082_v10 }
 0xb24   : > { %v2077_v27 = vpop.xlane.xlu0 %2076 }
 0xb25   : > { %3478 = vpow2.f32 %v2087_v26  ;;  %v2083_v28 = vsub.f32 %v2013_v7, %v2077_v27 }
 0xb27   : > { %v2089_v29 = vmul.f32 1.442695, %v2083_v28 }
 0xb28   : > { %v2080_v30 = vpop.xlane.xlu1 %2079 }
 0xb29   : > { %3480 = vpow2.f32 %v2089_v29  ;;  %v2084_v31 = vsub.f32 %v2064_v14, %v2080_v30 }
 0xb2b   : > { %v2091_v34 = vmul.f32 1.442695, %v2084_v31 }
 0xb2d   : > { %3482 = vpow2.f32 %v2091_v34 }
 0xb32   : > { %v3479_v36 = vpop.eup %3478 }
 0xb33   : > { %v2096_v37 = vsel %vm1414_vm10, %v3479_v36, 0.0 }
 0xb34   : > { %2097 = vadd.xlane.f32.xlu1 %v2096_v37  ;;  %v3452_v37 = vld [vmem:[%s4663_s13 + $0x8] sm:$0xff]  }
 0xb36   : > { %v3481_v38 = vpop.eup %3480 }
 0xb37   : > { %v2099_v39 = vsel %vm1414_vm10, %v3481_v38, 0.0 }
 0xb38   : > { %2100 = vadd.xlane.f32.xlu0 %v2099_v39  ;;  %v3455_v39 = vld [vmem:[%s4664_s10 + $0x10] sm:$0xff]  }
 0xb3a   : > { %v3483_v41 = vpop.eup %3482 }
 0xb3b   : > { %v2102_v42 = vsel %vm1414_vm10, %v3483_v41, 0.0 }
 0xb3c   : > { %2103 = vadd.xlane.f32.xlu1 %v2102_v42 }
 0xb4b   : > { %v2095_v44 = vpop.xlane.xlu0 %2094 }
 0xb4c   : > { %3484 = vrcp.f32 %v2095_v44 }
 0xb59   : > { %v3485_v45 = vpop.eup %3484 }
 0xb5a   : > { %v2109_v46 = vmul.f32 %v3485_v45, %v3477_v22  ;;  %v2955_v22 = vld [vmem:[#allocation14 + $0x3] ss:$0 sm:$0xff]  ;;  %v2959_v45 = vld [vmem:[#allocation15 + $0x1] ss:$0 sm:$0xff] }
 0xb5c   : > { %v2113_v48 = vpack.c.bf16 %v2109_v46, %v2109_v46 }
 0xb5e   : > { %2118 = vst.msk [vmem:[%s4217_s27] sm:$0xf] %vm2117_vm13, %v2113_v48  ;;  %3186 = vmatmul.mubr.msk.bf16.vlgmr.msra.gmra.mxu1 %vm1414_vm10, %v2113_v48 }
 0xb5f   : > { %3196 = vmatpush3.bf16.msra.mxu1 %v3448_v47  ;;  %3197 = vmatprep.mubr.msk.bf16.mxu1 %vm3865_vm3, %v3864_v8  ;;  %v2960_v47 = vld [vmem:[#allocation17 + $0x1] ss:$0 sm:$0xff] }
 0xb60   : > { %3207 = vmatprep.subr.bf16.mxu1 %v3864_v8 }
 0xbbd   : > { %v2098_v49 = vpop.xlane.xlu1 %2097 }
 0xbbe   : > { %3486 = vrcp.f32 %v2098_v49 }
 0xbc1   : > { %v2101_v50 = vpop.xlane.xlu0 %2100 }
 0xbc2   : > { %3488 = vrcp.f32 %v2101_v50 }
 0xbc5   : > { %v2104_v51 = vpop.xlane.xlu1 %2103 }
 0xbc6   : > { %3490 = vrcp.f32 %v2104_v51  ;;  %v3456_v51 = vld [vmem:[%s4664_s10 + $0x8] sm:$0xff]  }
 0xbcb   : > { %v3487_v52 = vpop.eup %3486 }
 0xbcc   : > { %v2110_v53 = vmul.f32 %v3487_v52, %v3479_v36  ;;  %v3457_v52 = vld [vmem:[%s4664_s10] sm:$0xff]  }
 0xbce   : > { %v2114_v55 = vpack.c.bf16 %v2110_v53, %v2110_v53  ;;  %v2961_v53 = vld [vmem:[%s4665_s12] ss:$0 sm:$0xff]  ;;  %s2618_s12 = scalar_lea.sflag [#allocation20], %s4198_s11 }
 0xbcf   : > { %v3489_v56 = vpop.eup %3488 }
 0xbd0   : > { %2119 = vst.msk [vmem:[%s4217_s27 + $0x4] sm:$0xf] %vm2117_vm13, %v2114_v55  ;;  %3192 = vmatmul.mubr.msk.bf16.vlgmr.msra.gmra.mxu0 %vm1414_vm10, %v2114_v55  ;;  %v2111_v57 = vmul.f32 %v3489_v56, %v3481_v38  ;;  %v3454_v38 = vld [vmem:[%s4664_s10 + $0x18] sm:$0xff]  }
 0xbd1   : > { %3202 = vmatpush3.bf16.msra.mxu0 %v3449_v54  ;;  %3203 = vmatprep.mubr.msk.bf16.mxu0 %vm3865_vm3, %v3864_v8 }
 0xbd2   : > { %v2115_v58 = vpack.c.bf16 %v2111_v57, %v2111_v57  ;;  %3215 = vmatprep.subr.bf16.mxu0 %v3864_v8 }
 0xbd3   : > { %v3491_v59 = vpop.eup %3490 }
 0xbd4   : > { %2120 = vst.msk [vmem:[%s4217_s27 + $0x8] sm:$0xf] %vm2117_vm13, %v2115_v58  ;;  %3198 = vmatmul.mubr.msk.bf16.vlgmr.msra.gmra.mxu1 %vm1414_vm10, %v2115_v58  ;;  %v2112_v60 = vmul.f32 %v3491_v59, %v3483_v41 }
 0xbd5   : > { %3211 = vmatprep.mubr.msk.bf16.mxu1 %vm3865_vm3, %v3864_v8  ;;  %3208 = vmatpush3.bf16.msra.mxu1 %v3450_v2 }
 0xbd6   : > { %v2116_v61 = vpack.c.bf16 %v2112_v60, %v2112_v60  ;;  %3209 = vmatprep.subr.bf16.mxu1 %v3864_v8 }
 0xbd8   : > { %2121 = vst.msk [vmem:[%s4217_s27 + $0xc] sm:$0xf] %vm2117_vm13, %v2116_v61  ;;  %3204 = vmatmul.mubr.msk.bf16.vlgmr.msra.gmra.mxu0 %vm1414_vm10, %v2116_v61 }
 0xbd9   : > { %3219 = vmatprep.mubr.msk.bf16.mxu0 %vm3865_vm3, %v3864_v8  ;;  %3210 = vmatpush3.bf16.msra.mxu1 %v3451_v3 }
 0xbda   : > { %3223 = vmatprep.subr.bf16.mxu1 %v3864_v8  ;;  %3216 = vmatpush3.bf16.msra.mxu0 %v3452_v37 }
 0xbdb   : > { %3217 = vmatprep.subr.bf16.mxu0 %v3864_v8 }
 0xc1e   : > { %v2173_v62 = vpop.f32.mrf.mxu1 }
 0xc20   : > { %v3187_v63 = vpop.f32.mrf.mxu1 }
 0xc22   : > { %v2176_v0 = vpop.f32.mrf.mxu1 }
 0xc24   : > { %v3188_v1 = vpop.f32.mrf.mxu1 }
 0xc90   : > { %v2222_v4 = vpop.f32.mrf.mxu0 }
 0xc91   : > { %2327 = vrot.lane.b32.xlu0 %v2222_v4, %s3871_s6  ;;  %s2977_s6 = sshll.u32 %s3836_s25, 3 }
 0xc92   : > { %v3193_v5 = vpop.f32.mrf.mxu0 }
 0xc94   : > { %v2225_v6 = vpop.f32.mrf.mxu0  ;;  %v2271_v7 = vpop.f32.mrf.mxu1 }
 0xc95   : > { %2331 = vrot.lane.b32.xlu1 %v2271_v7, %s3872_s8  ;;  %s2644_s8 = sadd.s32 %s4659_s29, %s2977_s6 }
 0xc96   : > { %v3194_v9 = vpop.f32.mrf.mxu0  ;;  %v3199_v40 = vpop.f32.mrf.mxu1 }
 0xc98   : > { %v2274_v32 = vpop.f32.mrf.mxu1  ;;  %v2320_v33 = vpop.f32.mrf.mxu0 }
 0xc99   : > { %2335 = vrot.lane.b32.xlu1 %v2320_v33, %s3873_s15  ;;  %s2978_s15 = sshll.u32 %s2644_s8, 6 }
 0xc9a   : > { %v3200_v11 = vpop.f32.mrf.mxu1  ;;  %v3205_v12 = vpop.f32.mrf.mxu0  ;;  %s4499_s17 = scalar_lea.hbm %s4667_s4, %s2978_s15 }
 0xc9c   : > { %v2323_v13 = vpop.f32.mrf.mxu0 }
 0xc9e   : > { %v3206_v14 = vpop.f32.mrf.mxu0 }
 0xd03   : > { %v2328_v15 = vpop.permute.xlu0 %2327 }
 0xd04   : > { %v2338_v17 = vsel %vm1214_vm5, %v2173_v62, %v2328_v15 }
 0xd07   : > { %v2332_v16 = vpop.permute.xlu1 %2331 }
 0xd08   : > { %v2339_v18 = vsel %vm1414_vm10, %v2338_v17, %v2332_v16 }
 0xd0b   : > { %v2336_v19 = vpop.permute.xlu1 %2335 }
 0xd0c   : > { %v2340_v20 = vsel %vm1681_vm11, %v2339_v18, %v2336_v19 }
 0xd0d   : > { %v2341_v21 = vpack.c.bf16 %v2340_v20, %v2340_v20 }
 0xd0f   : > { %3212 = vmatmul.mubr.msk.bf16.vlgmr.msra.gmra.mxu1 %vm1148_vm4, %v2341_v21 }
 0xd10   : > { %3231 = vmatprep.mubr.msk.bf16.mxu1 %vm3865_vm3, %v3864_v8  ;;  %3224 = vmatpush3.bf16.msra.mxu1 %v3454_v38 }
 0xd11   : > { %3225 = vmatprep.subr.bf16.mxu1 %v3864_v8 }
 0xd14   : > { %3226 = vmatpush3.bf16.msra.mxu1 %v3455_v39 }
 0xd15   : > { %3227 = vmatprep.subr.bf16.mxu1 %v3864_v8 }
 0xd18   : > { %3228 = vmatpush3.bf16.msra.mxu1 %v3456_v51 }
 0xd19   : > { %3229 = vmatprep.subr.bf16.mxu1 %v3864_v8  ;;  %v2965_v8 = vld [vmem:[%s4666_s16] ss:$0 sm:$0xff]  ;;  %s3686_s16 = sshll.u32 %s3874_s21, 4  ;;  %s3687_s16 = int_to_ptr.vmem [resolvable:$false] %s3686_s16 }
 0xd1a   : > { %s3688_s27 = scalar_lea.vmem %s3687_s16, 512  ;;  %p3689_p10 = scmp.lt.s32.totalorder %s4501_s9, %s3687_s16 }
 0xd1b   : > { %p3690_p6 = scmp.lt.s32.totalorder %s3688_s27, %s3682_s24 }
 0xd1c   : > { %3230 = vmatpush3.bf16.msra.mxu1 %v3457_v52 }
 0xd1d   : > { %p3691_p7 = por %p3690_p6, %p3689_p10 }
 0xd1f   : > { %p3692_p11 = pnand %p3691_p7, %p3685_p9 }
 0xdcf   : > { %v2401_v23 = vpop.f32.mrf.mxu1 }
 0xdd0   : > { %v2402_v24 = vadd.f32 %v2955_v22, %v2401_v23 }
 0xdd1   : > { %v3213_v25 = vpop.f32.mrf.mxu1 }
 0xdd2   : > { %v2407_v10 = vadd.f32 %v2402_v24, %v4381_v35  ;;  %v3453_v35 = vld [vmem:[%s4663_s13] sm:$0xff]  }
 0xdd3   : > { %v2404_v26 = vpop.f32.mrf.mxu1  ;;  %3218 = vmatpush3.bf16.msra.mxu0 %v3453_v35 }
 0xdd4   : > { %v2410_v27 = vsel %vm1148_vm4, %v2407_v10, 0.0 }
 0xdd5   : > { %2411 = vadd.xlane.f32.xlu0 %v2410_v27  ;;  %v3214_v28 = vpop.f32.mrf.mxu1 }
 0xe5e   : > { %v2412_v29 = vpop.xlane.xlu0 %2411 }
 0xe5f   : > { %v2413_v30 = vmul.f32 0.03125, %v2412_v29 }
 0xe61   : > { %v2414_v31 = vsub.f32 %v2407_v10, %v2413_v30 }
 0xe63   : > { %v2415_v34 = vmul.f32 %v2414_v31, %v2414_v31 }
 0xe65   : > { %v2416_v36 = vsel %vm1148_vm4, %v2415_v34, 0.0 }
 0xe66   : > { %2417 = vadd.xlane.f32.xlu1 %v2416_v36 }
 0xeef   : > { %v2418_v41 = vpop.xlane.xlu1 %2417 }
 0xef0   : > { %v2419_v42 = vmul.f32 0.03125, %v2418_v41 }
 0xef2   : > { %v2420_v43 = vadd.f32 1e-05, %v2419_v42 }
 0xef4   : > { %3492 = vrsqrt.f32 %v2420_v43 }
 0xf01   : > { %v3493_v44 = vpop.eup %3492 }
 0xf02   : > { %v2422_v46 = vmul.f32 %v3493_v44, %v2414_v31 }
 0xf04   : > { %v2427_v48 = vmul.f32 %v2959_v45, %v2422_v46 }
 0xf06   : > { %v2432_v49 = vadd.f32 %v2960_v47, %v2427_v48 }
 0xf08   : > { %v2433_v50 = vpack.c.bf16 %v2432_v49, %v2432_v49 }
 0xf0a   : > { %3220 = vmatmul.mubr.msk.bf16.vlgmr.msra.gmra.mxu0 %vm1148_vm4, %v2433_v50 }
 0xfca   : > { %v2494_v54 = vpop.f32.mrf.mxu0 }
 0xfcb   : > { %v2495_v55 = vadd.f32 %v2961_v53, %v2494_v54 }
 0xfcc   : > { %v3221_v56 = vpop.f32.mrf.mxu0 }
 0xfcd   : > { %v2500_v57 = vmax.f32 %v2495_v55, 0.0 }
 0xfce   : > { %v2497_v58 = vpop.f32.mrf.mxu0 }
 0xfcf   : > { %v2501_v59 = vpack.c.bf16 %v2500_v57, %v2500_v57 }
 0xfd0   : > { %v3222_v60 = vpop.f32.mrf.mxu0 }
 0xfd1   : > { %3232 = vmatmul.mubr.msk.bf16.vlgmr.msra.gmra.mxu1 %vm2541_vm14, %v2501_v59 }
0x1091   : > { %v2579_v61 = vpop.f32.mrf.mxu1 }
0x1092   : > { %v2580_v62 = vadd.f32 %v2965_v8, %v2579_v61 }
0x1093   : > { %v3233_v63 = vpop.f32.mrf.mxu1 }
0x1094   : > { %v2585_v0 = vadd.f32 %v2580_v62, %v2432_v49 }
0x1095   : > { %v2582_v1 = vpop.f32.mrf.mxu1 }
0x1096   : > { %v2588_v2 = vsel %vm1148_vm4, %v2585_v0, 0.0 }
0x1097   : > { %2589 = vadd.xlane.f32.xlu0 %v2588_v2  ;;  %v3234_v3 = vpop.f32.mrf.mxu1 }
0x1120   : > { %v2590_v4 = vpop.xlane.xlu0 %2589 }
0x1121   : > { %v2591_v5 = vmul.f32 0.03125, %v2590_v4 }
0x1123   : > { %v2592_v6 = vsub.f32 %v2585_v0, %v2591_v5 }
0x1125   : > { %v2593_v7 = vmul.f32 %v2592_v6, %v2592_v6 }
0x1127   : > { %v2594_v9 = vsel %vm1148_vm4, %v2593_v7, 0.0 }
0x1128   : > { %2595 = vadd.xlane.f32.xlu0 %v2594_v9 }
0x1129   : > { %3695 = shalt.err (!%p3692_p11)
}
0x112a   : > { %s3696_s6 = scalar_lea.hbm %s4499_s17, 256  ;;  %s3700_s2 = scalar_lea.hbm %s4667_s4, 1024 }
0x112b   : > { %p3697_p1 = scmp.ne.s32.totalorder %s4499_s17, %s3696_s6  ;;  %p3701_p3 = scmp.lt.s32.totalorder %s4499_s17, %s4667_s4 }
0x112c   : > { %p3702_p13 = scmp.lt.s32.totalorder %s3700_s2, %s3696_s6 }
0x112d   : > { %p3698_p2 = pnand %p3697_p1, %p4123_p12 }
0x112e   : > { %p3703_p5 = por %p3702_p13, %p3701_p3 }
0x112f   : > { %p3699_p0 = pneg %p3698_p2 }
0x1131   : > { %p3704_p8 = pnand %p3703_p5, %p3699_p0 }
0x1133   : > { %3707 = shalt.err (!%p3704_p8)
}
0x1134   : > { %s3875_s24 = smov 64   ;;  %s3876_s16 = smov 128   ;;  %v2971_v12 = vld [vmem:[#allocation15 + $0x2] ss:$0 sm:$0xff]  ;;  %v2972_v14 = vld [vmem:[#allocation17 + $0x2] ss:$0 sm:$0xff] }
0x1135   : > { %s3877_s27 = smov 4   ;;  %s2975_s6 = sshll.u32 %s3836_s25, 1 }
0x1136   : > { %3260 = dma.vmem_to_hbm [thread:$0]  (%p4123_p12), %s4501_s9, 256, %s4499_s17, %s2618_s12, %s3875_s24, %s3876_s16, %s3877_s27  }
0x1137   : > { %s2629_s8 = sadd.s32 %s4659_s29, %s2975_s6  ;;  %s2633_s2 = sshll.u32 %s4215_s30, 4  ;;  %s2634_s2 = int_to_ptr.vmem [resolvable:$true] %s2633_s2 }
0x1138   : > { %s2976_s15 = sshll.u32 %s2629_s8, 7  ;;  %s4668_s9 = sld [smem:[#allocation45_spill]] }
0x1139   : > { %s2613_s12 = scalar_lea.sflag [#allocation8], %s4198_s11  ;;  %s3708_s24 = scalar_lea.vmem %s2634_s2, 128 }
0x113a   : > { %p3709_p9 = scmp.ne.s32.totalorder %s2634_s2, %s3708_s24  ;;  %s3878_s25 = smov [#allocation18]  }
0x113b   : > { %s3712_s29 = sshll.u32 %s3878_s25, 4  ;;  %s3713_s29 = int_to_ptr.vmem [resolvable:$false] %s3712_s29 }
0x113c   : > { %p3710_p10 = pnand %p3709_p9, %p4123_p12  ;;  %s3714_s16 = scalar_lea.vmem %s3713_s29, 256 }
0x113d   : > { %p3715_p7 = scmp.lt.s32.totalorder %s2634_s2, %s3713_s29  ;;  %p3716_p11 = scmp.lt.s32.totalorder %s3714_s16, %s3708_s24 }
0x113e   : > { %s2631_s17 = scalar_lea.hbm %s4668_s9, %s2976_s15  ;;  %p3711_p6 = pneg %p3710_p10 }
0x113f   : > { %p3717_p1 = por %p3716_p11, %p3715_p7 }
0x1141   : > { %p3718_p2 = pnand %p3717_p1, %p3711_p6 }
0x11b1   : > { %v2596_v40 = vpop.xlane.xlu0 %2595 }
0x11b2   : > { %v2597_v32 = vmul.f32 0.03125, %v2596_v40 }
0x11b4   : > { %v2598_v33 = vadd.f32 1e-05, %v2597_v32 }
0x11b6   : > { %3494 = vrsqrt.f32 %v2598_v33 }
0x11c3   : > { %v3495_v11 = vpop.eup %3494 }
0x11c4   : > { %v2600_v13 = vmul.f32 %v3495_v11, %v2592_v6 }
0x11c6   : > { %v2605_v15 = vmul.f32 %v2971_v12, %v2600_v13 }
0x11c8   : > { %v2610_v16 = vadd.f32 %v2972_v14, %v2605_v15 }
0x11ca   : > { %2611 = vst.msk [vmem:[%s4215_s30] sm:$0xff] %vm1148_vm4, %v2610_v16 }
0x11cb   : > { %3721 = shalt.err (!%p3718_p2)
}
0x11cc   : > { %s3722_s27 = scalar_lea.hbm %s2631_s17, 128  ;;  %s3726_s6 = scalar_lea.hbm %s4668_s9, 512 }
0x11cd   : > { %p3723_p0 = scmp.ne.s32.totalorder %s2631_s17, %s3722_s27  ;;  %p3727_p5 = scmp.lt.s32.totalorder %s2631_s17, %s4668_s9 }
0x11ce   : > { %p3728_p8 = scmp.lt.s32.totalorder %s3726_s6, %s3722_s27 }
0x11cf   : > { %p3724_p3 = pnand %p3723_p0, %p4123_p12 }
0x11d0   : > { %p3729_p9 = por %p3728_p8, %p3727_p5 }
0x11d1   : > { %p3725_p13 = pneg %p3724_p3 }
0x11d3   : > { %p3730_p10 = pnand %p3729_p9, %p3725_p13 }
0x11d5   : > { %3733 = shalt.err (!%p3730_p10)
}
0x11d6   : > { %3259 = dma.vmem_to_hbm [thread:$0]  (%p4123_p12), %s2634_s2, 128, %s2631_s17, %s2613_s12  }
0x11d7 PF: > { %p3304_p6 = scmp.ge.s32.totalorder %s3848_s28, 2  ;;  %s2662_s14 = sand.u32 1, %s3808_s18  }
0x11d8   : > { %s2663_s21 = scalar_lea.sflag [#allocation8], %s2662_s14 }
0x11d9   : > { %p3287_p7 = pnand %p3304_p6, %p4136_p4 }
0x11db   : > { %p3288_p11 = pneg %p3287_p7 }
0x11dd   : > { %3799 = dma.done.wait (%p3288_p11), %s2663_s21, 128  }
0x11de   : > { %3801 = vsyncadd (%p3288_p11), %s2663_s21, 4294967168  ;;  %s2672_s24 = scalar_lea.sflag [#allocation20], %s2662_s14 }
0x11df   : > { %3803 = dma.done.wait (%p3288_p11), %s2672_s24, 256  }
0x11e0   : > { %3805 = vsyncadd (%p3288_p11), %s2672_s24, 4294967040  ;;  %s40_s28 = sadd.s32 1, %s3848_s28   ;;  %s4669_s25 = sld [smem:[#allocation29_spill]] }
0x11e1   : > { %p37_p1 = scmp.ge.s32.totalorder %s40_s28, 6   ;;  %s4670_s7 = sld [smem:[#allocation30_spill]] }
0x11e2   : > { %s4671_s27 = sld [smem:[#allocation31_spill]]  ;;  %s4672_s18 = smov %s3812_s19 }
0x11e3   : > { %s4673_s19 = smov %s3816_s20  ;;  %s4674_s20 = smov %s4131_s5 }
0x11e4   : > { %s4675_s21 = smov %s3824_s22  ;;  %s4676_s22 = smov %s3828_s23 }
0x11e5   : > { %s4677_s23 = smov %s4128_s0  ;;  %s4678_s24 = smov %s3840_s26 }
0x11e6   :  { %39 = sbr.rel (!%p37_p1) target bundleno = 31 (0x1f), region = 200 }
0x11e7   : > { %s4679_s26 = smov %s4670_s7 }
0x11eb   :  { %2677 = vsyncpa [#allocation7], 1 }
0x11ec   :  { %2679 = vsyncpa [#allocation7 + $0x1], 1 }
0x11ed   :  { %2680 = vsyncpa [#allocation10], 1 }
0x11ee   :  { %2682 = vsyncpa [#allocation10 + $0x1], 1 }
0x11ef   :  { %2683 = vsyncpa [#allocation13], 1 }
0x11f0   :  { %2684 = vsyncpa [#allocation16], 1 }
0x11f1   :  { %2685 = vsyncpa [#allocation8], 1 }
0x11f2   :  { %2687 = vsyncpa [#allocation8 + $0x1], 1 }
0x11f3   :  { %2688 = vsyncpa [#allocation20], 1 }
0x11f4   :  { %2690 = vsyncpa [#allocation20 + $0x1], 1 }

// kernel: tpu_custom_call.1
= control target key start
LH: loop header
LB: loop body
LE: loop exit
PB: predicated region body
PF: predicated region fallthrough
CT: control target
= control target key end

     0   :  { %s4584_s0 = inlined_call_operand.vmem [shape: bf16[2,16,32], index: 0, kind: input, shape index: {}]   ;;  %s4585_s1 = inlined_call_operand.vmem [shape: bf16[2,16,32], index: 1, kind: input, shape index: {}]   ;;  %s4586_s2 = inlined_call_operand.hbm [shape: f32[2,1,16], index: 2, kind: input, shape index: {}]   ;;  %s4587_s3 = inlined_call_operand.hbm [shape: f32[2,1,16], index: 3, kind: input, shape index: {}]   ;;  %s4588_s4 = inlined_call_operand.hbm [shape: bf16[4,32,32], index: 4, kind: input, shape index: {}]   ;;  %s4589_s5 = inlined_call_operand.vmem [shape: f32[4,32], index: 5, kind: input, shape index: {}]   ;;  %s4590_s6 = inlined_call_operand.hbm [shape: bf16[4,32,32], index: 6, kind: input, shape index: {}]   ;;  %s4591_s7 = inlined_call_operand.hbm [shape: f32[4,32], index: 7, kind: input, shape index: {}]   ;;  %s4592_s8 = inlined_call_operand.hbm [shape: f32[3,32], index: 8, kind: input, shape index: {}]   ;;  %s4593_s9 = inlined_call_operand.hbm [shape: f32[3,32], index: 9, kind: input, shape index: {}]   ;;  %s4594_s10 = inlined_call_operand.vmem [shape: bf16[32,64], index: 10, kind: input, shape index: {}]   ;;  %s4595_s11 = inlined_call_operand.vmem [shape: f32[1,64], index: 11, kind: input, shape index: {}]   ;;  %s4596_s12 = inlined_call_operand.vmem [shape: bf16[64,32], index: 12, kind: input, shape index: {}]   ;;  %s4597_s13 = inlined_call_operand.vmem [shape: f32[1,32], index: 13, kind: input, shape index: {}]   ;;  %s4598_s14 = inlined_call_operand.hbm [shape: f32[2,16,32], index: 14, kind: output, shape index: {0}]   ;;  %s4599_s15 = inlined_call_operand.hbm [shape: bf16[2,4,16,16], index: 15, kind: output, shape index: {1}]  }
   0x1   :  { %4613 = sst [smem:[#allocation32_spill]] %s4584_s0 }
   0x2   :  { %4614 = sst [smem:[#allocation33_spill]] %s4585_s1 }
   0x3   :  { %4615 = sst [smem:[#allocation34_spill]] %s4586_s2 }
   0x4   :  { %4616 = sst [smem:[#allocation35_spill]] %s4588_s4 }
   0x5   :  { %4617 = sst [smem:[#allocation36_spill]] %s4589_s5 }
   0x6   :  { %4618 = sst [smem:[#allocation37_spill]] %s4590_s6 }
   0x7   :  { %4619 = sst [smem:[#allocation38_spill]] %s4591_s7 }
   0x8   :  { %4620 = sst [smem:[#allocation39_spill]] %s4592_s8 }
   0x9   :  { %4621 = sst [smem:[#allocation40_spill]] %s4593_s9 }
   0xa   :  { %4622 = sst [smem:[#allocation41_spill]] %s4594_s10 }
   0xb   :  { %4623 = sst [smem:[#allocation42_spill]] %s4595_s11 }
   0xc   :  { %4624 = sst [smem:[#allocation43_spill]] %s4596_s12 }
   0xd   :  { %4625 = sst [smem:[#allocation44_spill]] %s4597_s13 }
   0xe   :  { %4626 = sst [smem:[#allocation45_spill]] %s4598_s14 }
   0xf   :  { %4627 = sst [smem:[#allocation46_spill]] %s4599_s15 }
  0x10   :  { %21 = vsyncpa [#allocation7], 0 }
  0x11   :  { %23 = vsyncpa [#allocation7 + $0x1], 0 }
  0x12   :  { %24 = vsyncpa [#allocation10], 0 }
  0x13   :  { %26 = vsyncpa [#allocation10 + $0x1], 0 }
  0x14   :  { %27 = vsyncpa [#allocation13], 0 }
  0x15   :  { %28 = vsyncpa [#allocation16], 0 }
  0x16   :  { %29 = vsyncpa [#allocation8], 0 }
  0x17   :  { %31 = vsyncpa [#allocation8 + $0x1], 0 }
  0x18   :  { %32 = vsyncpa [#allocation20], 0 }
  0x19   :  { %34 = vsyncpa [#allocation20 + $0x1], 0  ;;  %s3959_s18 = smov 0   ;;  %s3961_s19 = smov 0  }
  0x1a   :  { %s3963_s20 = smov 0   ;;  %s3965_s21 = smov 0  }
  0x1b   :  { %s3967_s22 = smov 0   ;;  %s3969_s23 = smov 0  }
  0x1c   :  { %s3971_s24 = smov 0   ;;  %s3973_s25 = smov 0  }
  0x1d   :  { %s3975_s26 = smov 0   ;;  %s3977_s27 = smov 0  }
  0x1e   :  { %s3979_s28 = smov 0  }
  0x1f LB: > { %4628 = sst [smem:[#allocation28_spill]] %s3832_s24  ;;  %s4015_s29 = sadd.s32 4294967295, %s3848_s28   ;;  %s3848_s28 = sphi %s3979_s28, %s40_s28   ;;  %s3844_s27 = sphi %s3977_s27, %s4671_s27   ;;  %s3840_s26 = sphi %s3975_s26, %s4679_s26   ;;  %s3836_s25 = sphi %s3973_s25, %s4669_s25   ;;  %s3832_s24 = sphi %s3971_s24, %s4678_s24   ;;  %s3828_s23 = sphi %s3969_s23, %s4677_s23   ;;  %s3824_s22 = sphi %s3967_s22, %s4676_s22   ;;  %s3820_s21 = sphi %s3965_s21, %s4675_s21   ;;  %s3816_s20 = sphi %s3963_s20, %s4674_s20   ;;  %s3812_s19 = sphi %s3961_s19, %s4673_s19   ;;  %s3808_s18 = sphi %s3959_s18, %s4672_s18  }
  0x20   : > { %4629 = sst [smem:[#allocation29_spill]] %s3844_s27  ;;  %p2859_p0 = scmp.ge.s32.totalorder %s3848_s28, 1 }
  0x21   : > { %p4608_p1 = scmp.eq.s32.totalorder %s4015_s29, 0  ;;  %p427_p3 = scmp.lt.s32.totalorder %s3848_s28, 5 }
  0x22   : > { %s3850_s16 = smov [#allocation11]   ;;  %s3851_s15 = smov [#allocation12]  }
  0x23   : > { %p4021_p4 = pnand %p2859_p0, %p427_p3  ;;  %s439_s17 = sshll.u32 %s3850_s16, 4  ;;  %s440_s17 = int_to_ptr.vmem [resolvable:$true] %s439_s17 }
  0x24   : > { %s455_s13 = sshll.u32 %s3851_s15, 4  ;;  %s3852_s11 = smov [#allocation15]   ;;  %s4033_s13 = int_to_ptr.vmem [resolvable:$true] %s455_s13 }
  0x25   : > { %s4630_s30 = scalar_select %p4021_p4, 1, 0 }
  0x26   : > { %p3263_p5 = pneg %p4021_p4  ;;  %s480_s12 = sshll.u32 %s3852_s11, 4  ;;  %s4035_s12 = int_to_ptr.vmem [resolvable:$true] %s480_s12 }
  0x27   : > { %s3507_s10 = scalar_lea.vmem %s440_s17, 1024  ;;  %p3515_p11 = scmp.lt.s32.totalorder %s440_s17, %s440_s17 }
  0x28   : > { %p4029_p6 = pnand %p3263_p5, %p4608_p1  ;;  %p3508_p8 = scmp.ne.s32.totalorder %s440_s17, %s3507_s10 }
  0x29   : > { %p3516_p12 = scmp.lt.s32.totalorder %s3507_s10, %s3507_s10 }
  0x2a   : > { %p4039_p7 = pneg %p4029_p6 }
  0x2b   : > { %p3517_p13 = por %p3516_p12, %p3515_p11 }
  0x2c   : > { %p3510_p9 = pnand %p3508_p8, %p4039_p7 }
  0x2e   : > { %p3511_p10 = pneg %p3510_p9 }
  0x30   : > { %p3518_p0 = pnand %p3517_p13, %p3511_p10 }
  0x32   : > { %3521 = shalt.err (!%p3518_p0)
}
  0x33   : > { %s3853_s15 = smov 64   ;;  %s3854_s11 = smov 4  }
  0x34   : > { %s4633_s4 = sld [smem:[#allocation35_spill]]  ;;  %s3533_s0 = scalar_lea.vmem %s4033_s13, 1024 }
  0x35   : > { %p3534_p3 = scmp.ne.s32.totalorder %s4033_s13, %s3533_s0  ;;  %p3541_p9 = scmp.lt.s32.totalorder %s4033_s13, %s4033_s13 }
  0x36   : > { %p3542_p10 = scmp.lt.s32.totalorder %s3533_s0, %s3533_s0 }
  0x37   : > { %p3536_p5 = pnand %p3534_p3, %p4039_p7 }
  0x38   : > { %p3543_p11 = por %p3542_p10, %p3541_p9 }
  0x39   : > { %p3537_p8 = pneg %p3536_p5 }
  0x3a   : > { %3266 = dma.hbm_to_vmem [thread:$0]  (!%p4029_p6), %s4633_s4, 1024, %s440_s17, [#allocation10], %s3853_s15, %s3853_s15, %s3854_s11  }
  0x3b   : > { %p3544_p12 = pnand %p3543_p11, %p3537_p8 }
  0x3d   : > { %3547 = shalt.err (!%p3544_p12)
}
  0x3e   : > { %s4634_s6 = sld [smem:[#allocation37_spill]]  ;;  %s3559_s1 = scalar_lea.vmem %s4035_s12, 64 }
  0x3f   : > { %p3560_p13 = scmp.ne.s32.totalorder %s4035_s12, %s3559_s1  ;;  %p3567_p5 = scmp.lt.s32.totalorder %s4035_s12, %s4035_s12 }
  0x40   : > { %p3568_p8 = scmp.lt.s32.totalorder %s3559_s1, %s3559_s1 }
  0x41   : > { %p3562_p0 = pnand %p3560_p13, %p4039_p7 }
  0x42   : > { %p3569_p9 = por %p3568_p8, %p3567_p5 }
  0x43   : > { %p3563_p3 = pneg %p3562_p0 }
  0x44   : > { %3269 = dma.hbm_to_vmem [thread:$0]  (!%p4029_p6), %s4634_s6, 1024, %s4033_s13, [#allocation13], %s3853_s15, %s3853_s15, %s3854_s11  }
  0x45   : > { %p3570_p10 = pnand %p3569_p9, %p3563_p3 }
  0x47   : > { %3573 = shalt.err (!%p3570_p10)
}
  0x48   : > { %s4635_s8 = sld [smem:[#allocation39_spill]]  ;;  %s3855_s13 = smov [#allocation14]  }
  0x49   : > { %s469_s24 = sshll.u32 %s3855_s13, 4  ;;  %s3856_s17 = smov [#allocation17]   ;;  %s470_s24 = int_to_ptr.vmem [resolvable:$true] %s469_s24 }
  0x4a   : > { %s491_s15 = sshll.u32 %s3856_s17, 4  ;;  %s3585_s11 = scalar_lea.vmem %s470_s24, 64  ;;  %s492_s15 = int_to_ptr.vmem [resolvable:$true] %s491_s15 }
  0x4b   : > { %p3586_p11 = scmp.ne.s32.totalorder %s470_s24, %s3585_s11  ;;  %p3593_p0 = scmp.lt.s32.totalorder %s470_s24, %s470_s24 }
  0x4c   : > { %p3594_p3 = scmp.lt.s32.totalorder %s3585_s11, %s3585_s11 }
  0x4d   : > { %p3588_p12 = pnand %p3586_p11, %p4039_p7 }
  0x4e   : > { %3275 = dma.hbm_to_vmem [thread:$0]  (!%p4029_p6), %s4635_s8, 64, %s4035_s12, [#allocation16]  }
  0x4f   : > { %p3589_p13 = pneg %p3588_p12  ;;  %p3595_p5 = por %p3594_p3, %p3593_p0 }
  0x51   : > { %p3596_p8 = pnand %p3595_p5, %p3589_p13 }
  0x53   : > { %3599 = shalt.err (!%p3596_p8)
}
  0x54   : > { %s4636_s7 = sld [smem:[#allocation38_spill]]  ;;  %s3611_s1 = scalar_lea.vmem %s492_s15, 64 }
  0x55   : > { %p3612_p9 = scmp.ne.s32.totalorder %s492_s15, %s3611_s1  ;;  %p3619_p1 = scmp.lt.s32.totalorder %s492_s15, %s492_s15 }
  0x56   : > { %p3620_p11 = scmp.lt.s32.totalorder %s3611_s1, %s3611_s1 }
  0x57   : > { %p3614_p10 = pnand %p3612_p9, %p4039_p7 }
  0x58   : > { %p3621_p12 = por %p3620_p11, %p3619_p1 }
  0x59   : > { %p3615_p2 = pneg %p3614_p10 }
  0x5a   : > { %3272 = dma.hbm_to_vmem [thread:$0]  (!%p4029_p6), %s4636_s7, 64, %s470_s24, [#allocation13]  }
  0x5b   : > { %p3622_p4 = pnand %p3621_p12, %p3615_p2 }
  0x5d   : > { %3625 = shalt.err (!%p3622_p4)
}
  0x5e   : > { %s4637_s9 = sld [smem:[#allocation40_spill]]  ;;  %s2858_s16 = sadd.s32 4294967294, %s3848_s28  }
  0x5f   : > { %s49_s14 = sadd.s32 1, %s3840_s26  ;;  %s52_s13 = sadd.s32 1, %s3844_s27 }
  0x60   : > { %p50_p1 = scmp.ge.s32.totalorder %s49_s14, 2  ;;  %s111_s24 = sadd.s32 1, %s3828_s23 }
  0x61   : > { %p118_p2 = scmp.ne.s32.totalorder %s3828_s23, %s3824_s22  ;;  %p119_p4 = scmp.eq.s32.totalorder %s3848_s28, 0 }
  0x62   : > { %s4681_s14 = smov (%p50_p1, %s49_s14), 0  ;;  %s4683_s13 = smov (!%p50_p1, %s52_s13), %s3844_s27 }
  0x63   : > { %4638 = sst [smem:[#allocation30_spill]] %s4681_s14  ;;  %p54_p7 = scmp.ge.s32.totalorder %s4683_s13, 2 }
  0x64   : > { %3278 = dma.hbm_to_vmem [thread:$0]  (!%p4029_p6), %s4637_s9, 64, %s492_s15, [#allocation16]  }
  0x65   : > { %p124_p6 = scmp.ne.s32.totalorder %s3824_s22, %s3820_s21  ;;  %s371_s17 = ssub.s32 %s3840_s26, %s4681_s14 }
  0x66   : > { %p4102_p13 = por %p119_p4, %p118_p2  ;;  %p4640_p0 = scmp.eq.s32.totalorder %s4015_s29, 0 }
  0x67   : > { %s4685_s13 = smov (%p54_p7, %s4683_s13), 0  ;;  %s375_s10 = sadd.s32 1, %s3816_s20 }
  0x68   : > { %p4108_p3 = por %p4640_p0, %p124_p6  ;;  %4642 = sst [smem:[#allocation31_spill]] %s4685_s13 }
  0x69   : > { %p385_p5 = scmp.ne.s32.totalorder %s3816_s20, %s3812_s19  ;;  %s108_s21 = ssub.s32 %s3844_s27, %s4685_s13 }
  0x6a   : > { %p391_p8 = scmp.ne.s32.totalorder %s3812_s19, %s3808_s18  ;;  %p109_p9 = scmp.eq.s32.totalorder %s108_s21, 0 }
  0x6b   : > { %s372_s12 = sor.u32 %s371_s17, %s108_s21  ;;  %p4643_p11 = scmp.eq.s32.totalorder %s4015_s29, 3 }
  0x6c   : > { %p373_p10 = scmp.eq.s32.totalorder %s372_s12, 0  ;;  %p392_p1 = scmp.eq.s32.totalorder %s2858_s16, 3 }
  0x6d   : > { %p4123_p12 = por %p4643_p11, %p385_p5  ;;  %p3298_p2 = scmp.lt.s32.totalorder %s3848_s28, 4 }
  0x6e   : > { %s4128_s0 = scalar_select %p109_p9, %s3828_s23, %s111_s24  }
  0x6f   : > { %s4131_s5 = scalar_select %p373_p10, %s3816_s20, %s375_s10  }
  0x70   : > { %s530_s4 = sand.u32 1, %s3828_s23   ;;  %s2866_s6 = sshll.u32 %s3844_s27, 4 }
  0x71   : > { %p4136_p4 = por %p392_p1, %p391_p8  ;;  %s4646_s2 = sld [smem:[#allocation34_spill]] }
  0x72   : > { %s533_s8 = scalar_lea.vmem [#allocation6], %s530_s4  ;;  %p4145_p6 = pnand %p3298_p2, %p4102_p13 }
  0x73   : > { %s540_s9 = sshll.u32 %s533_s8, 4  ;;  %s4152_s13 = scalar_lea.hbm %s4587_s3, %s2866_s6  ;;  %s541_s9 = int_to_ptr.vmem [resolvable:$true] %s540_s9 }
  0x74   : > { %s547_s14 = sand.u32 1, %s3848_s28   ;;  %s531_s27 = scalar_lea.sflag [#allocation7], %s530_s4 }
  0x75   : > { %p3628_p7 = pneg %p4145_p6  ;;  %s3639_s17 = scalar_lea.vmem %s541_s9, 16 }
  0x76   : > { %p3640_p0 = scmp.ne.s32.totalorder %s541_s9, %s3639_s17  ;;  %s3857_s8 = smov [#allocation6]  }
  0x77   : > { %s538_s12 = scalar_lea.hbm %s4646_s2, %s2866_s6  ;;  %s3644_s15 = sshll.u32 %s3857_s8, 4  ;;  %s3645_s15 = int_to_ptr.vmem [resolvable:$false] %s3644_s15 }
  0x78   : > { %p3642_p13 = pnand %p3640_p0, %p3628_p7  ;;  %s3646_s21 = scalar_lea.vmem %s3645_s15, 32 }
  0x79   : > { %p3647_p8 = scmp.lt.s32.totalorder %s541_s9, %s3645_s15  ;;  %p3648_p9 = scmp.lt.s32.totalorder %s3646_s21, %s3639_s17 }
  0x7a   : > { %p3643_p5 = pneg %p3642_p13 }
  0x7b   : > { %p3649_p10 = por %p3648_p9, %p3647_p8 }
  0x7d   : > { %p3650_p11 = pnand %p3649_p10, %p3643_p5 }
  0x7f   : > { %3653 = shalt.err (!%p3650_p11)
}
  0x80   : > { %3282 = dma.hbm_to_vmem [thread:$0]  (!%p4145_p6), %s538_s12, 16, %s541_s9, %s531_s27  }
  0x81   : > { %s550_s6 = scalar_lea.vmem [#allocation9], %s530_s4  ;;  %s548_s10 = scalar_lea.sflag [#allocation10], %s547_s14 }
  0x82   : > { %s557_s16 = sshll.u32 %s550_s6, 4  ;;  %s3858_s8 = smov [#allocation9]   ;;  %s558_s16 = int_to_ptr.vmem [resolvable:$true] %s557_s16 }
  0x83   : > { %s3667_s2 = scalar_lea.vmem %s558_s16, 16  ;;  %s3672_s15 = sshll.u32 %s3858_s8, 4  ;;  %s3673_s15 = int_to_ptr.vmem [resolvable:$false] %s3672_s15 }
  0x84   : > { %p3668_p1 = scmp.ne.s32.totalorder %s558_s16, %s3667_s2  ;;  %s3674_s17 = scalar_lea.vmem %s3673_s15, 32 }
  0x85   : > { %p3675_p13 = scmp.lt.s32.totalorder %s558_s16, %s3673_s15  ;;  %p3676_p5 = scmp.lt.s32.totalorder %s3674_s17, %s3667_s2 }
  0x86   : > { %p3670_p2 = pnand %p3668_p1, %p3628_p7 }
  0x87   : > { %p3677_p8 = por %p3676_p5, %p3675_p13 }
  0x88   : > { %p3671_p0 = pneg %p3670_p2 }
  0x8a   : > { %p3678_p9 = pnand %p3677_p8, %p3671_p0 }
  0x8c   : > { %3681 = shalt.err (!%p3678_p9)
}
  0x8d   : > { %3285 = dma.hbm_to_vmem [thread:$0]  (!%p4145_p6), %s4152_s13, 16, %s558_s16, %s548_s10  }
  0x8e   : > { %p4648_p10 = scmp.ne.s32.totalorder %s4630_s30, 0 }
  0x8f   : > { %s4171_s4 = sand.u32 (!%p4648_p10), 1, %s3824_s22  }
  0x90   : > { %566 = sbr.rel (%p4648_p10) target bundleno = 4567 (0x11d7), region = 76  ;;  %s569_s9 = scalar_lea.sflag (!%p4648_p10), [#allocation7], %s4171_s4 }
  0x95   : > { %3779 = dma.done.wait (%p4108_p3), %s569_s9, 16  }
  0x96   : > { %3781 = vsyncadd (%p4108_p3), %s569_s9, 4294967280  ;;  %s576_s2 = sand.u32 1, %s4015_s29  }
  0x97   : > { %s577_s14 = scalar_lea.sflag [#allocation10], %s576_s2 }
  0x98   : > { %3783 = dma.done.wait (%p4108_p3), %s577_s14, 16  }
  0x99   : > { %3785 = vsyncadd (%p4108_p3), %s577_s14, 4294967280  ;;  %p4649_p6 = scmp.eq.s32.totalorder %s4015_s29, 0 }
  0x9b   : > { %3787 = dma.done.wait (%p4649_p6), [#allocation10], 1024   ;;  %p4650_p7 = pmov %p4649_p6 }
  0x9c   : > { %p4651_p11 = pmov %p4649_p6 }
  0x9d   : > { %3789 = vsyncadd (%p4650_p7), [#allocation10], 4294966272 }
  0x9e   : > { %3791 = dma.done.wait (%p4651_p11), [#allocation13], 1088   ;;  %p4652_p1 = pmov %p4649_p6 }
  0xa0   : > { %3793 = vsyncadd (%p4652_p1), [#allocation13], 4294966208  ;;  %p4653_p2 = pmov %p4652_p1 }
  0xa1   : > { %p4654_p0 = pmov %p4652_p1 }
  0xa2   : > { %3795 = dma.done.wait (%p4653_p2), [#allocation16], 128  }
  0xa3   : > { %3797 = vsyncadd (%p4654_p0), [#allocation16], 4294967168  ;;  %s4655_s13 = sld [smem:[#allocation28_spill]]  ;;  %s4198_s11 = sand.u32 1, %s3812_s19  }
  0xa4   : > { %p664_p3 = scmp.lt.s32.totalorder %s3836_s25, 1  ;;  %s2874_s12 = sshll.u32 %s4198_s11, 3 }
  0xa5   : > { %s2875_s24 = sshll.u32 %s4198_s11, 4  ;;  %s4656_s15 = sld [smem:[#allocation32_spill]] }
  0xa6   : > { %s665_s21 = scalar_select %p664_p3, %s3836_s25, 1 }
  0xa7   : > { %s4657_s2 = sld [smem:[#allocation33_spill]]  ;;  %s4215_s30 = scalar_lea.vmem [#allocation18], %s2874_s12 }
  0xa8   : > { %s2981_s16 = sshll.u32 %s665_s21, 3  ;;  %s4217_s27 = scalar_lea.vmem [#allocation19], %s2875_s24 }
  0xa9   : > { %s2880_s6 = sshll.u32 %s4655_s13, 3  ;;  %p2881_p13 = scmp.ne.s32.totalorder %s4655_s13, 0 }
  0xaa   : > { %s4658_s24 = sld [smem:[#allocation36_spill]] (!%p2881_p13)  ;;  %s3861_s10 = smov (!%p2881_p13), 120  }
  0xab   : > { %s4208_s17 = scalar_lea.vmem %s4656_s15, %s2981_s16  ;;  %679 = sbr.rel (%p2881_p13) target bundleno = 543 (0x21f), region = 108 }
  0xac   : > { %s3862_s8 = smov (!%p2881_p13), 112   ;;  %s3863_s15 = smov (!%p2881_p13), 104  }
  0xad   : > { %s4213_s14 = scalar_lea.vmem %s4657_s2, %s2981_s16 }
  0xb0   : > { %v3418_v0 = vld [vmem:[#allocation11 + $0x18] sm:$0xff]   ;;  %v3859_v1 = vmov 0.0   ;;  %v3419_v2 = vld [vmem:[#allocation11 + $0x28] sm:$0xff]   ;;  %v3420_v3 = vld [vmem:[#allocation11 + $0x10] sm:$0xff]   ;;  %vm3860_vm0 = vmmov 0   ;;  %vm709_vm1 = vcmask 261120  }
  0xb1   : > { %3055 = vmatprep.subr.bf16.mxu0 %v3859_v1  ;;  %3063 = vmatprep.subr.bf16.mxu1 %v3859_v1  ;;  %v3421_v4 = vld [vmem:[#allocation11 + $0x20] sm:$0xff]   ;;  %v3423_v6 = vld [vmem:[#allocation12 + $0x18] sm:$0xff]   ;;  %v3425_v7 = vld [vmem:[#allocation12 + $0x28] sm:$0xff]   ;;  %vm826_vm2 = vcmask 60416  }
  0xb2   : > { %3056 = vmatpush3.bf16.msra.mxu0 %v3418_v0  ;;  %3059 = vmatprep.mubr.msk.bf16.mxu0 %vm3860_vm0, %v3859_v1  ;;  %v3422_v5 = vld [vmem:[%s4208_s17] sm:$0xff]   ;;  %v3424_v8 = vld [vmem:[#allocation12 + $0x10] sm:$0xff]  }
  0xb3   : > { %3064 = vmatpush3.bf16.msra.mxu1 %v3419_v2  ;;  %3057 = vmatprep.subr.bf16.mxu0 %v3859_v1  ;;  %v3427_v9 = vld [vmem:[#allocation12 + $0x20] sm:$0xff]   ;;  %v2882_v11 = vld [vmem:[%s4658_s24 + $0x1] ss:$0 sm:$0xff]  ;;  %v2887_v12 = vld [vmem:[%s4658_s24 + $0x2] ss:$0 sm:$0xff] }
  0xb4   : > { %3065 = vmatprep.subr.bf16.mxu1 %v3859_v1  ;;  %3067 = vmatprep.mubr.msk.bf16.mxu1 %vm3860_vm0, %v3859_v1  ;;  %v3426_v10 = vld [vmem:[%s4213_s14] sm:$0xff]  }
  0xb5   : > { %v2895_v26 = vld [vmem:[#allocation14 + $0x1] ss:$0 sm:$0xff]  ;;  %v2900_v29 = vld [vmem:[#allocation14 + $0x2] ss:$0 sm:$0xff] }
  0xb6   : > { %3058 = vmatpush3.bf16.msra.mxu0 %v3420_v3 }
  0xb7   : > { %3066 = vmatpush3.bf16.msra.mxu1 %v3421_v4  ;;  %3071 = vmatprep.subr.bf16.mxu0 %v3859_v1 }
  0xb8   : > { %3079 = vmatprep.subr.bf16.mxu1 %v3859_v1 }
  0xb9   : > { %3060 = vmatmul.mubr.msk.bf16.vlgmr.msra.gmra.mxu0 %vm709_vm1, %v3422_v5 }
  0xba   : > { %3068 = vmatmul.mubr.msk.bf16.vlgmr.msra.gmra.mxu1 %vm709_vm1, %v3422_v5  ;;  %3072 = vmatpush3.bf16.msra.mxu0 %v3423_v6 }
  0xbb   : > { %3073 = vmatprep.subr.bf16.mxu0 %v3859_v1  ;;  %3080 = vmatpush3.bf16.msra.mxu1 %v3425_v7 }
  0xbc   : > { %3075 = vmatprep.mubr.msk.bf16.mxu0 %vm3860_vm0, %v3859_v1  ;;  %3081 = vmatprep.subr.bf16.mxu1 %v3859_v1 }
  0xbd   : > { %3083 = vmatprep.mubr.msk.bf16.mxu1 %vm3860_vm0, %v3859_v1 }
  0xbe   : > { %3074 = vmatpush3.bf16.msra.mxu0 %v3424_v8 }
  0xbf   : > { %3082 = vmatpush3.bf16.msra.mxu1 %v3427_v9 }
  0xc1   : > { %3076 = vmatmul.mubr.msk.bf16.vlgmr.msra.gmra.mxu0 %vm709_vm1, %v3426_v10 }
  0xc2   : > { %3084 = vmatmul.mubr.msk.bf16.vlgmr.msra.gmra.mxu1 %vm709_vm1, %v3426_v10 }
 0x179   : > { %v747_v13 = vpop.f32.mrf.mxu0 }
 0x17a   : > { %v748_v14 = vadd.f32 %v2882_v11, %v747_v13  ;;  %v811_v15 = vpop.f32.mrf.mxu1 }
 0x17b   : > { %v812_v16 = vadd.f32 %v2887_v12, %v811_v15  ;;  %v3061_v17 = vpop.f32.mrf.mxu0 }
 0x17c   : > { %v2983_v18 = vpack.c.bf16 %v748_v14, %v748_v14  ;;  %v3069_v19 = vpop.f32.mrf.mxu1 }
 0x17d   : > { %v2985_v20 = vpack.c.bf16 %v812_v16, %v812_v16  ;;  %v750_v21 = vpop.f32.mrf.mxu0 }
 0x17e   : > { %827 = vst.msk [vmem:[#allocation2] sm:$0xf] %vm826_vm2, %v2983_v18  ;;  %v751_v22 = vadd.f32 %v2882_v11, %v750_v21  ;;  %v814_v23 = vpop.f32.mrf.mxu1  ;;  %838 = vrot.lane.b32.xlu0 %v2983_v18, %s3861_s10 }
 0x17f   : > { %836 = vst.msk [vmem:[#allocation3] sm:$0xf] %vm826_vm2, %v2985_v20  ;;  %v815_v24 = vadd.f32 %v2887_v12, %v814_v23  ;;  %847 = vrot.lane.b32.xlu1 %v2985_v20, %s3861_s10  ;;  %v3062_v25 = vpop.f32.mrf.mxu0 }
 0x180   : > { %v2984_v27 = vpack.c.bf16 %v751_v22, %v751_v22  ;;  %v3070_v28 = vpop.f32.mrf.mxu1 }
 0x181   : > { %v2986_v30 = vpack.c.bf16 %v815_v24, %v815_v24  ;;  %v958_v31 = vpop.f32.mrf.mxu0 }
 0x182   : > { %828 = vst.msk [vmem:[#allocation2 + $0x4] sm:$0xf] %vm826_vm2, %v2984_v27  ;;  %856 = vrot.lane.b32.xlu0 %v2983_v18, %s3862_s8  ;;  %v959_v32 = vadd.f32 %v2895_v26, %v958_v31  ;;  %v1022_v33 = vpop.f32.mrf.mxu1 }
 0x183   : > { %837 = vst.msk [vmem:[#allocation3 + $0x4] sm:$0xf] %vm826_vm2, %v2986_v30  ;;  %849 = vrot.lane.b32.xlu1 %v2986_v30, %s3861_s10  ;;  %v3077_v34 = vpop.f32.mrf.mxu0  ;;  %v1023_v35 = vadd.f32 %v2900_v29, %v1022_v33 }
 0x184   : > { %v2987_v36 = vpack.c.bf16 %v959_v32, %v959_v32  ;;  %v3085_v37 = vpop.f32.mrf.mxu1 }
 0x185   : > { %v961_v38 = vpop.f32.mrf.mxu0  ;;  %v2989_v39 = vpack.c.bf16 %v1023_v35, %v1023_v35 }
 0x186   : > { %865 = vrot.lane.b32.xlu0 %v2985_v20, %s3862_s8  ;;  %1037 = vst.msk [vmem:[#allocation4] sm:$0xf] %vm826_vm2, %v2987_v36  ;;  %v962_v40 = vadd.f32 %v2895_v26, %v961_v38  ;;  %v1025_v41 = vpop.f32.mrf.mxu1 }
 0x187   : > { %858 = vrot.lane.b32.xlu1 %v2984_v27, %s3862_s8  ;;  %1046 = vst.msk [vmem:[#allocation5] sm:$0xf] %vm826_vm2, %v2989_v39  ;;  %v3078_v42 = vpop.f32.mrf.mxu0  ;;  %v1026_v43 = vadd.f32 %v2900_v29, %v1025_v41 }
 0x188   : > { %v2988_v44 = vpack.c.bf16 %v962_v40, %v962_v40  ;;  %v3086_v45 = vpop.f32.mrf.mxu1 }
 0x189   : > { %v2990_v46 = vpack.c.bf16 %v1026_v43, %v1026_v43 }
 0x18a   : > { %874 = vrot.lane.b32.xlu0 %v2983_v18, %s3863_s15  ;;  %1038 = vst.msk [vmem:[#allocation4 + $0x4] sm:$0xf] %vm826_vm2, %v2988_v44 }
 0x18b   : > { %867 = vrot.lane.b32.xlu1 %v2986_v30, %s3862_s8  ;;  %1047 = vst.msk [vmem:[#allocation5 + $0x4] sm:$0xf] %vm826_vm2, %v2990_v46 }
 0x18e   : > { %883 = vrot.lane.b32.xlu0 %v2985_v20, %s3863_s15 }
 0x18f   : > { %876 = vrot.lane.b32.xlu1 %v2984_v27, %s3863_s15 }
 0x192   : > { %840 = vrot.lane.b32.xlu0 %v2984_v27, %s3861_s10 }
 0x193   : > { %885 = vrot.lane.b32.xlu1 %v2986_v30, %s3863_s15 }
 0x196   : > { %1048 = vrot.lane.b32.xlu0 %v2987_v36, %s3861_s10 }
 0x197   : > { %1050 = vrot.lane.b32.xlu1 %v2988_v44, %s3861_s10 }
 0x19a   : > { %1057 = vrot.lane.b32.xlu0 %v2989_v39, %s3861_s10 }
 0x19b   : > { %1059 = vrot.lane.b32.xlu1 %v2990_v46, %s3861_s10 }
 0x19e   : > { %1066 = vrot.lane.b32.xlu0 %v2987_v36, %s3862_s8 }
 0x19f   : > { %1068 = vrot.lane.b32.xlu1 %v2988_v44, %s3862_s8 }
 0x1a2   : > { %1075 = vrot.lane.b32.xlu0 %v2989_v39, %s3862_s8 }
 0x1a3   : > { %1077 = vrot.lane.b32.xlu1 %v2990_v46, %s3862_s8 }
 0x1a6   : > { %1084 = vrot.lane.b32.xlu0 %v2987_v36, %s3863_s15 }
 0x1a7   : > { %1086 = vrot.lane.b32.xlu1 %v2988_v44, %s3863_s15 }
 0x1aa   : > { %1093 = vrot.lane.b32.xlu0 %v2989_v39, %s3863_s15 }
 0x1ab   : > { %1095 = vrot.lane.b32.xlu1 %v2990_v46, %s3863_s15 }
 0x1f0   : > { %v839_v47 = vpop.permute.xlu0 %838 }
 0x1f1   : > { %v848_v48 = vpop.permute.xlu1 %847  ;;  %845 = vst.msk [vmem:[#allocation2 + $0x8] sm:$0xf] %vm826_vm2, %v839_v47 }
 0x1f2   : > { %854 = vst.msk [vmem:[#allocation3 + $0x8] sm:$0xf] %vm826_vm2, %v848_v48 }
 0x1f4   : > { %v857_v49 = vpop.permute.xlu0 %856 }
 0x1f5   : > { %v850_v50 = vpop.permute.xlu1 %849  ;;  %863 = vst.msk [vmem:[#allocation2 + $0x10] sm:$0xf] %vm826_vm2, %v857_v49 }
 0x1f6   : > { %855 = vst.msk [vmem:[#allocation3 + $0xc] sm:$0xf] %vm826_vm2, %v850_v50 }
 0x1f8   : > { %v866_v51 = vpop.permute.xlu0 %865 }
 0x1f9   : > { %872 = vst.msk [vmem:[#allocation3 + $0x10] sm:$0xf] %vm826_vm2, %v866_v51  ;;  %v859_v52 = vpop.permute.xlu1 %858 }
 0x1fa   : > { %864 = vst.msk [vmem:[#allocation2 + $0x14] sm:$0xf] %vm826_vm2, %v859_v52 }
 0x1fc   : > { %v875_v53 = vpop.permute.xlu0 %874 }
 0x1fd   : > { %881 = vst.msk [vmem:[#allocation2 + $0x18] sm:$0xf] %vm826_vm2, %v875_v53  ;;  %v868_v54 = vpop.permute.xlu1 %867 }
 0x1fe   : > { %873 = vst.msk [vmem:[#allocation3 + $0x14] sm:$0xf] %vm826_vm2, %v868_v54 }
 0x200   : > { %v884_v55 = vpop.permute.xlu0 %883 }
 0x201   : > { %890 = vst.msk [vmem:[#allocation3 + $0x18] sm:$0xf] %vm826_vm2, %v884_v55  ;;  %v877_v56 = vpop.permute.xlu1 %876 }
 0x202   : > { %882 = vst.msk [vmem:[#allocation2 + $0x1c] sm:$0xf] %vm826_vm2, %v877_v56 }
 0x204   : > { %v841_v57 = vpop.permute.xlu0 %840 }
 0x205   : > { %v886_v58 = vpop.permute.xlu1 %885  ;;  %846 = vst.msk [vmem:[#allocation2 + $0xc] sm:$0xf] %vm826_vm2, %v841_v57 }
 0x206   : > { %891 = vst.msk [vmem:[#allocation3 + $0x1c] sm:$0xf] %vm826_vm2, %v886_v58 }
 0x208   : > { %v1049_v59 = vpop.permute.xlu0 %1048 }
 0x209   : > { %1055 = vst.msk [vmem:[#allocation4 + $0x8] sm:$0xf] %vm826_vm2, %v1049_v59  ;;  %v1051_v60 = vpop.permute.xlu1 %1050 }
 0x20a   : > { %1056 = vst.msk [vmem:[#allocation4 + $0xc] sm:$0xf] %vm826_vm2, %v1051_v60 }
 0x20c   : > { %v1058_v61 = vpop.permute.xlu0 %1057 }
 0x20d   : > { %1064 = vst.msk [vmem:[#allocation5 + $0x8] sm:$0xf] %vm826_vm2, %v1058_v61  ;;  %v1060_v62 = vpop.permute.xlu1 %1059 }
 0x20e   : > { %1065 = vst.msk [vmem:[#allocation5 + $0xc] sm:$0xf] %vm826_vm2, %v1060_v62 }
 0x210   : > { %v1067_v63 = vpop.permute.xlu0 %1066 }
 0x211   : > { %1073 = vst.msk [vmem:[#allocation4 + $0x10] sm:$0xf] %vm826_vm2, %v1067_v63  ;;  %v1069_v0 = vpop.permute.xlu1 %1068 }
 0x212   : > { %1074 = vst.msk [vmem:[#allocation4 + $0x14] sm:$0xf] %vm826_vm2, %v1069_v0 }
 0x214   : > { %v1076_v1 = vpop.permute.xlu0 %1075 }
 0x215   : > { %1082 = vst.msk [vmem:[#allocation5 + $0x10] sm:$0xf] %vm826_vm2, %v1076_v1  ;;  %v1078_v2 = vpop.permute.xlu1 %1077 }
 0x216   : > { %1083 = vst.msk [vmem:[#allocation5 + $0x14] sm:$0xf] %vm826_vm2, %v1078_v2 }
 0x218   : > { %v1085_v3 = vpop.permute.xlu0 %1084 }
 0x219   : > { %1091 = vst.msk [vmem:[#allocation4 + $0x18] sm:$0xf] %vm826_vm2, %v1085_v3  ;;  %v1087_v4 = vpop.permute.xlu1 %1086 }
 0x21a   : > { %1092 = vst.msk [vmem:[#allocation4 + $0x1c] sm:$0xf] %vm826_vm2, %v1087_v4 }
 0x21c   : > { %v1094_v5 = vpop.permute.xlu0 %1093 }
 0x21d   : > { %1100 = vst.msk [vmem:[#allocation5 + $0x18] sm:$0xf] %vm826_vm2, %v1094_v5  ;;  %v1096_v6 = vpop.permute.xlu1 %1095 }
 0x21e   : > { %1101 = vst.msk [vmem:[#allocation5 + $0x1c] sm:$0xf] %vm826_vm2, %v1096_v6 }
 0x21f PF: > { %v3428_v7 = vld [vmem:[#allocation11 + $0x8] sm:$0xff]   ;;  %s4659_s29 = sld [smem:[#allocation28_spill]]  ;;  %v3864_v8 = vmov 0.0   ;;  %v3429_v9 = vld [vmem:[#allocation11] sm:$0xff]   ;;  %vm3865_vm3 = vmmov 0   ;;  %s1102_s9 = sshra.s32 %s2880_s6, 3  ;;  %v1107_v30 = vlaneseq  ;;  %v1109_v34 = vstv %s2880_s6 }
 0x220   : > { %3087 = vmatprep.subr.bf16.mxu0 %v3864_v8  ;;  %3095 = vmatprep.subr.bf16.mxu1 %v3864_v8  ;;  %s2908_s2 = sshll.u32 %s1102_s9, 2  ;;  %vm1148_vm4 = vcmask 261120   ;;  %v3430_v11 = vld [vmem:[#allocation2] sm:$0xff]   ;;  %vm1214_vm5 = vcmask 64512   ;;  %v3431_v13 = vld [vmem:[#allocation2 + $0x8] sm:$0xff]   ;;  %s4660_s12 = sld [smem:[#allocation36_spill]] }
 0x221   : > { %3088 = vmatpush3.bf16.msra.mxu0 %v3428_v7  ;;  %3091 = vmatprep.mubr.msk.bf16.mxu0 %vm3865_vm3, %v3864_v8  ;;  %s1105_s14 = scalar_lea.vmem %s4208_s17, %s2908_s2  ;;  %v1219_v12 = vsel %vm1214_vm5, %v3430_v11, 0  ;;  %v1270_v14 = vsel %vm1214_vm5, %v3431_v13, 0  ;;  %v3432_v19 = vld [vmem:[#allocation2 + $0x10] sm:$0xff]   ;;  %s3866_s24 = smov 104   ;;  %v3433_v25 = vld [vmem:[#allocation2 + $0x18] sm:$0xff]   ;;  %v4329_v32 = vshrl.u32 %v1107_v30, 7 }
 0x222   : > { %3089 = vmatprep.subr.bf16.mxu0 %v3864_v8  ;;  %3097 = vmatprep.mubr.msk.bf16.mxu1 %vm3865_vm3, %v3864_v8  ;;  %v4294_v10 = vld [vmem:[%s1105_s14] sm:$0xf]  ;;  %v1321_v24 = vsel %vm1214_vm5, %v3432_v19, 0  ;;  %s3867_s21 = smov 120   ;;  %s3868_s16 = smov 112   ;;  %v1372_v26 = vsel %vm1214_vm5, %v3433_v25, 0 }
 0x223   : > { %3096 = vmatpush3.bf16.xpose.msra.mxu1 %v1219_v12  ;;  %s4661_s10 = scalar_lea.vmem [#allocation6], %s4171_s4  ;;  %v1119_v33 = vsub.s32 0, %v4329_v32  ;;  %v3869_v35 = vmov 0   ;;  %v1110_v37 = vadd.s32 %v1109_v34, %v4329_v32  ;;  %v1112_v38 = vand.u32 127, %v1107_v30  ;;  %v3434_v7 = vld [vmem:[#allocation3] sm:$0xff]   ;;  %v3435_v25 = vld [vmem:[#allocation3 + $0x8] sm:$0xff]  }
 0x224   : > { %3107 = vmatprep.subr.bf16.mxu1 %v3864_v8  ;;  %v1114_v31 = vld [vmem:[%s4661_s10] sm:$0x1]  ;;  %v3870_v40 = vmov -1e+10   ;;  %vm1414_vm10 = vcmask 130048   ;;  %s3871_s6 = smov 8  }
 0x225   : > { %3090 = vmatpush3.bf16.msra.mxu0 %v3429_v9  ;;  %vm1115_vm6 = vcmp.ne.f32.partialorder %v1114_v31, 0.0  ;;  %vm1113_vm7 = vcmp.ge.s32.totalorder %v1110_v37, %v1112_v38  ;;  %v3437_v38 = vld [vmem:[#allocation3 + $0x18] sm:$0xff]   ;;  %s3872_s8 = smov 16   ;;  %s3873_s15 = smov 24   ;;  %vm1681_vm11 = vcmask 195584   ;;  %vm2117_vm13 = vcmask 125952  }
 0x226   : > { %3101 = vmatprep.subr.bf16.mxu0 %v3864_v8  ;;  %v2909_v15 = vld [vmem:[%s4660_s12] ss:$0 sm:$0xff]  ;;  %v1116_v36 = vsel %vm1115_vm6, 1, %v3869_v35  ;;  %s4662_s14 = scalar_lea.vmem [#allocation9], %s4171_s4  ;;  %s4663_s13 = sld [smem:[#allocation41_spill]]  ;;  %vm2541_vm14 = vcmask 523264  }
 0x227   : > { %v1120_v39 = vrot.slane %v1116_v36, %v1119_v33  ;;  %s4664_s10 = sld [smem:[#allocation43_spill]]  ;;  %s2647_s9 = sshll.u32 %s4217_s27, 4  ;;  %s4501_s9 = int_to_ptr.vmem [resolvable:$true] %s2647_s9 }
 0x228   : > { %3092 = vmatmul.mubr.msk.bf16.vlgmr.msra.gmra.mxu0 %vm1148_vm4, %v4294_v10  ;;  %s4667_s4 = sld [smem:[#allocation46_spill]] }
 0x229   : > { %3103 = vmatprep.mubr.msk.bf16.mxu0 %vm3865_vm3, %v3864_v8  ;;  %3102 = vmatpush3.bf16.xpose.msra.mxu0 %v1270_v14  ;;  %vm1121_vm8 = vcmp.eq.s32.totalorder %v1120_v39, 1 }
 0x22a   : > { %3113 = vmatprep.subr.bf16.mxu0 %v3864_v8  ;;  %vm1122_vm9 = vmand %vm1113_vm7, %vm1121_vm8 }
 0x22b   : > { %v1123_v41 = vsel %vm1122_vm9, 0.0, %v3870_v40 }
 0x2e8   : > { %v1186_v16 = vpop.f32.mrf.mxu0 }
 0x2e9   : > { %v1187_v17 = vadd.f32 %v2909_v15, %v1186_v16 }
 0x2ea   : > { %v3093_v18 = vpop.f32.mrf.mxu0 }
 0x2eb   : > { %v1192_v20 = vmul.f32 0.35355338, %v1187_v17 }
 0x2ec   : > { %v1189_v21 = vpop.f32.mrf.mxu0 }
 0x2ed   : > { %v1193_v22 = vpack.c.bf16 %v1192_v20, %v1192_v20 }
 0x2ee   : > { %v3094_v23 = vpop.f32.mrf.mxu0 }
 0x2ef   : > { %1199 = vrot.lane.b32.xlu1 %v1193_v22, %s3866_s24  ;;  %1195 = vrot.lane.b32.xlu0 %v1193_v22, %s3867_s21 }
 0x2f0   : > { %3098 = vmatmul.mubr.msk.bf16.vlgmr.msra.gmra.mxu1 %vm1214_vm5, %v1193_v22 }
 0x2f1   : > { %3108 = vmatpush3.bf16.xpose.msra.mxu1 %v1321_v24  ;;  %3109 = vmatprep.mubr.msk.bf16.mxu1 %vm3865_vm3, %v3864_v8 }
 0x2f2   : > { %3119 = vmatprep.subr.bf16.mxu1 %v3864_v8 }
 0x2f3   : > { %1197 = vrot.lane.b32.xlu0 %v1193_v22, %s3868_s16 }
 0x361   : > { %v1196_v27 = vpop.permute.xlu0 %1195  ;;  %v1200_v29 = vpop.permute.xlu1 %1199 }
 0x362   : > { %3104 = vmatmul.mubr.msk.bf16.vlgmr.msra.gmra.mxu0 %vm1214_vm5, %v1196_v27 }
 0x363   : > { %3114 = vmatpush3.bf16.xpose.msra.mxu0 %v1372_v26  ;;  %3115 = vmatprep.mubr.msk.bf16.mxu0 %vm3865_vm3, %v3864_v8 }
 0x364   : > { %3125 = vmatprep.subr.bf16.mxu0 %v3864_v8 }
 0x365   : > { %v1198_v28 = vpop.permute.xlu0 %1197 }
 0x366   : > { %3110 = vmatmul.mubr.msk.bf16.vlgmr.msra.gmra.mxu1 %vm1214_vm5, %v1198_v28 }
 0x367   : > { %3121 = vmatprep.mubr.msk.bf16.mxu1 %vm3865_vm3, %v3864_v8  ;;  %3120 = vmatpush3.bf16.msra.mxu1 %v3434_v7 }
 0x368   : > { %3131 = vmatprep.subr.bf16.mxu1 %v3864_v8 }
 0x36a   : > { %3116 = vmatmul.mubr.msk.bf16.vlgmr.msra.gmra.mxu0 %vm1214_vm5, %v1200_v29  ;;  %v3436_v29 = vld [vmem:[#allocation3 + $0x10] sm:$0xff]  }
 0x36b   : > { %3127 = vmatprep.mubr.msk.bf16.mxu0 %vm3865_vm3, %v3864_v8  ;;  %3126 = vmatpush3.bf16.msra.mxu0 %v3435_v25  ;;  %v3441_v25 = vld [vmem:[#allocation12] sm:$0xff]  }
 0x36c   : > { %3137 = vmatprep.subr.bf16.mxu0 %v3864_v8 }
 0x3b0   : > { %v1255_v42 = vpop.f32.mrf.mxu1 }
 0x3b1   : > { %v1256_v43 = vadd.f32 %v1255_v42, %v1123_v41 }
 0x3b2   : > { %v3099_v44 = vpop.f32.mrf.mxu1 }
 0x3b3   : > { %v1415_v45 = vsel %vm1414_vm10, %v1256_v43, -inf }
 0x3b4   : > { %1416 = vmax.xlane.f32.xlu1 %v1415_v45  ;;  %v1258_v46 = vpop.f32.mrf.mxu1 }
 0x3b6   : > { %v3100_v47 = vpop.f32.mrf.mxu1 }
 0x422   : > { %v1306_v48 = vpop.f32.mrf.mxu0 }
 0x423   : > { %v1307_v49 = vadd.f32 %v1306_v48, %v1123_v41 }
 0x424   : > { %v3105_v50 = vpop.f32.mrf.mxu0 }
 0x425   : > { %v1418_v51 = vsel %vm1414_vm10, %v1307_v49, -inf }
 0x426   : > { %v1357_v52 = vpop.f32.mrf.mxu1  ;;  %1419 = vmax.xlane.f32.xlu0 %v1418_v51  ;;  %v1309_v53 = vpop.f32.mrf.mxu0  ;;  %v3438_v51 = vld [vmem:[#allocation11 + $0x38] sm:$0xff]  }
 0x427   : > { %v1358_v54 = vadd.f32 %v1357_v52, %v1123_v41  ;;  %v3439_v52 = vld [vmem:[#allocation11 + $0x30] sm:$0xff]  }
 0x428   : > { %v3106_v55 = vpop.f32.mrf.mxu0  ;;  %v3111_v56 = vpop.f32.mrf.mxu1 }
 0x429   : > { %v1421_v57 = vsel %vm1414_vm10, %v1358_v54, -inf }
 0x42a   : > { %v1360_v58 = vpop.f32.mrf.mxu1  ;;  %1422 = vmax.xlane.f32.xlu0 %v1421_v57  ;;  %v1408_v59 = vpop.f32.mrf.mxu0 }
 0x42b   : > { %v1409_v60 = vadd.f32 %v1408_v59, %v1123_v41 }
 0x42c   : > { %v3112_v61 = vpop.f32.mrf.mxu1  ;;  %v3117_v62 = vpop.f32.mrf.mxu0 }
 0x42d   : > { %v1424_v63 = vsel %vm1414_vm10, %v1409_v60, -inf }
 0x42e   : > { %1425 = vmax.xlane.f32.xlu1 %v1424_v63  ;;  %v1411_v0 = vpop.f32.mrf.mxu0 }
 0x430   : > { %v3118_v1 = vpop.f32.mrf.mxu0 }
 0x43d   : > { %v1417_v2 = vpop.xlane.xlu1 %1416 }
 0x43e   : > { %v1427_v3 = vsub.f32 %v1256_v43, %v1417_v2 }
 0x440   : > { %v1431_v4 = vmul.f32 1.442695, %v1427_v3 }
 0x442   : > { %3458 = vpow2.f32 %v1431_v4 }
 0x44f   : > { %v3459_v5 = vpop.eup %3458 }
 0x450   : > { %v1439_v6 = vsel %vm1414_vm10, %v3459_v5, 0.0 }
 0x451   : > { %1440 = vadd.xlane.f32.xlu0 %v1439_v6 }
 0x4af   : > { %v1420_v9 = vpop.xlane.xlu0 %1419 }
 0x4b0   : > { %v1428_v11 = vsub.f32 %v1307_v49, %v1420_v9  ;;  %v2929_v9 = vld [vmem:[%s4660_s12 + $0x3] ss:$0 sm:$0xff]  ;;  %s4665_s12 = sld [smem:[#allocation42_spill]] }
 0x4b2   : > { %v1433_v12 = vmul.f32 1.442695, %v1428_v11  ;;  %v1749_v11 = vunpack.c.l.bf16 %v4294_v10 }
 0x4b3   : > { %v1423_v13 = vpop.xlane.xlu0 %1422 }
 0x4b4   : > { %3460 = vpow2.f32 %v1433_v12  ;;  %v1429_v14 = vsub.f32 %v1358_v54, %v1423_v13 }
 0x4b6   : > { %v1435_v15 = vmul.f32 1.442695, %v1429_v14 }
 0x4b7   : > { %v1426_v16 = vpop.xlane.xlu1 %1425 }
 0x4b8   : > { %3462 = vpow2.f32 %v1435_v15  ;;  %v1430_v17 = vsub.f32 %v1409_v60, %v1426_v16 }
 0x4ba   : > { %v1437_v18 = vmul.f32 1.442695, %v1430_v17 }
 0x4bc   : > { %3464 = vpow2.f32 %v1437_v18 }
 0x4c1   : > { %v3461_v19 = vpop.eup %3460 }
 0x4c2   : > { %v1442_v20 = vsel %vm1414_vm10, %v3461_v19, 0.0 }
 0x4c3   : > { %1443 = vadd.xlane.f32.xlu1 %v1442_v20 }
 0x4c5   : > { %v3463_v21 = vpop.eup %3462 }
 0x4c6   : > { %v1445_v22 = vsel %vm1414_vm10, %v3463_v21, 0.0 }
 0x4c7   : > { %1446 = vadd.xlane.f32.xlu0 %v1445_v22 }
 0x4c9   : > { %v3465_v23 = vpop.eup %3464 }
 0x4ca   : > { %v1448_v24 = vsel %vm1414_vm10, %v3465_v23, 0.0 }
 0x4cb   : > { %1449 = vadd.xlane.f32.xlu1 %v1448_v24  ;;  %v3440_v24 = vld [vmem:[#allocation12 + $0x8] sm:$0xff]  }
 0x4da   : > { %v1441_v26 = vpop.xlane.xlu0 %1440 }
 0x4db   : > { %3466 = vrcp.f32 %v1441_v26 }
 0x4e8   : > { %v3467_v27 = vpop.eup %3466 }
 0x4e9   : > { %v1455_v28 = vmul.f32 %v3467_v27, %v3459_v5 }
 0x4eb   : > { %v1459_v30 = vpack.c.bf16 %v1455_v28, %v1455_v28 }
 0x4ed   : > { %3122 = vmatmul.mubr.msk.bf16.vlgmr.msra.gmra.mxu1 %vm1414_vm10, %v1459_v30 }
 0x4ee   : > { %3132 = vmatpush3.bf16.msra.mxu1 %v3436_v29  ;;  %3133 = vmatprep.mubr.msk.bf16.mxu1 %vm3865_vm3, %v3864_v8  ;;  %v2933_v29 = vld [vmem:[#allocation15] ss:$0 sm:$0xff] }
 0x4ef   : > { %3143 = vmatprep.subr.bf16.mxu1 %v3864_v8 }
 0x54c   : > { %v1444_v31 = vpop.xlane.xlu1 %1443 }
 0x54d   : > { %3468 = vrcp.f32 %v1444_v31  ;;  %v2934_v31 = vld [vmem:[#allocation17] ss:$0 sm:$0xff] }
 0x550   : > { %v1447_v34 = vpop.xlane.xlu0 %1446 }
 0x551   : > { %3470 = vrcp.f32 %v1447_v34 }
 0x554   : > { %v1450_v35 = vpop.xlane.xlu1 %1449 }
 0x555   : > { %3472 = vrcp.f32 %v1450_v35 }
 0x55a   : > { %v3469_v36 = vpop.eup %3468 }
 0x55b   : > { %v1456_v37 = vmul.f32 %v3469_v36, %v3461_v19 }
 0x55d   : > { %v1460_v39 = vpack.c.bf16 %v1456_v37, %v1456_v37  ;;  %v3442_v37 = vld [vmem:[#allocation4] sm:$0xff]  }
 0x55e   : > { %v3471_v41 = vpop.eup %3470 }
 0x55f   : > { %3128 = vmatmul.mubr.msk.bf16.vlgmr.msra.gmra.mxu0 %vm1414_vm10, %v1460_v39  ;;  %v1457_v42 = vmul.f32 %v3471_v41, %v3463_v21  ;;  %v3443_v39 = vld [vmem:[#allocation4 + $0x8] sm:$0xff]  }
 0x560   : > { %3138 = vmatpush3.bf16.msra.mxu0 %v3437_v38  ;;  %3139 = vmatprep.mubr.msk.bf16.mxu0 %vm3865_vm3, %v3864_v8  ;;  %v1874_v38 = vsel %vm1214_vm5, %v3442_v37, 0  ;;  %v1925_v41 = vsel %vm1214_vm5, %v3443_v39, 0 }
 0x561   : > { %v1461_v43 = vpack.c.bf16 %v1457_v42, %v1457_v42  ;;  %3151 = vmatprep.subr.bf16.mxu0 %v3864_v8  ;;  %v2935_v42 = vld [vmem:[#allocation14] ss:$0 sm:$0xff] }
 0x562   : > { %v3473_v44 = vpop.eup %3472 }
 0x563   : > { %3134 = vmatmul.mubr.msk.bf16.vlgmr.msra.gmra.mxu1 %vm1414_vm10, %v1461_v43  ;;  %v1458_v45 = vmul.f32 %v3473_v44, %v3465_v23 }
 0x564   : > { %3147 = vmatprep.mubr.msk.bf16.mxu1 %vm3865_vm3, %v3864_v8  ;;  %3144 = vmatpush3.bf16.msra.mxu1 %v3438_v51 }
 0x565   : > { %v1462_v46 = vpack.c.bf16 %v1458_v45, %v1458_v45  ;;  %3145 = vmatprep.subr.bf16.mxu1 %v3864_v8 }
 0x567   : > { %3140 = vmatmul.mubr.msk.bf16.vlgmr.msra.gmra.mxu0 %vm1414_vm10, %v1462_v46  ;;  %v3444_v46 = vld [vmem:[#allocation4 + $0x10] sm:$0xff]  }
 0x568   : > { %3155 = vmatprep.mubr.msk.bf16.mxu0 %vm3865_vm3, %v3864_v8  ;;  %3146 = vmatpush3.bf16.msra.mxu1 %v3439_v52  ;;  %v1976_v51 = vsel %vm1214_vm5, %v3444_v46, 0  ;;  %v3445_v52 = vld [vmem:[#allocation4 + $0x18] sm:$0xff]  }
 0x569   : > { %3159 = vmatprep.subr.bf16.mxu1 %v3864_v8  ;;  %3152 = vmatpush3.bf16.msra.mxu0 %v3440_v24  ;;  %v3446_v24 = vld [vmem:[#allocation5] sm:$0xff]  }
 0x56a   : > { %3153 = vmatprep.subr.bf16.mxu0 %v3864_v8 }
 0x56d   : > { %3154 = vmatpush3.bf16.msra.mxu0 %v3441_v25 }
 0x56e   : > { %3165 = vmatprep.subr.bf16.mxu0 %v3864_v8 }
 0x5ad   : > { %v1514_v47 = vpop.f32.mrf.mxu1 }
 0x5af   : > { %v3123_v48 = vpop.f32.mrf.mxu1 }
 0x5b1   : > { %v1517_v49 = vpop.f32.mrf.mxu1 }
 0x5b3   : > { %v3124_v50 = vpop.f32.mrf.mxu1 }
 0x61f   : > { %v1563_v53 = vpop.f32.mrf.mxu0 }
 0x620   : > { %1668 = vrot.lane.b32.xlu0 %v1563_v53, %s3871_s6  ;;  %v2027_v53 = vsel %vm1214_vm5, %v3445_v52, 0 }
 0x621   : > { %v3129_v54 = vpop.f32.mrf.mxu0 }
 0x623   : > { %v1566_v55 = vpop.f32.mrf.mxu0  ;;  %v1612_v56 = vpop.f32.mrf.mxu1 }
 0x624   : > { %1672 = vrot.lane.b32.xlu1 %v1612_v56, %s3872_s8 }
 0x625   : > { %v3130_v57 = vpop.f32.mrf.mxu0  ;;  %v3135_v58 = vpop.f32.mrf.mxu1 }
 0x626   : > { %v1124_v57 = vld [vmem:[%s4662_s14] sm:$0x1] }
 0x627   : > { %v1615_v59 = vpop.f32.mrf.mxu1  ;;  %v1661_v60 = vpop.f32.mrf.mxu0  ;;  %vm1125_vm12 = vcmp.ne.f32.partialorder %v1124_v57, 0.0 }
 0x628   : > { %1676 = vrot.lane.b32.xlu1 %v1661_v60, %s3873_s15  ;;  %v1126_v58 = vsel %vm1125_vm12, 0.0, %v3870_v40 }
 0x629   : > { %v3136_v61 = vpop.f32.mrf.mxu1  ;;  %v3141_v62 = vpop.f32.mrf.mxu0  ;;  %v1863_v59 = vrot.slane %v1126_v58, %v1119_v33 }
 0x62b   : > { %v1664_v63 = vpop.f32.mrf.mxu0 }
 0x62d   : > { %v3142_v0 = vpop.f32.mrf.mxu0 }
 0x692   : > { %v1669_v1 = vpop.permute.xlu0 %1668 }
 0x693   : > { %v1679_v3 = vsel %vm1214_vm5, %v1514_v47, %v1669_v1 }
 0x696   : > { %v1673_v2 = vpop.permute.xlu1 %1672 }
 0x697   : > { %v1680_v4 = vsel %vm1414_vm10, %v1679_v3, %v1673_v2 }
 0x69a   : > { %v1677_v5 = vpop.permute.xlu1 %1676 }
 0x69b   : > { %v1682_v6 = vsel %vm1681_vm11, %v1680_v4, %v1677_v5 }
 0x69c   : > { %v1683_v7 = vpack.c.bf16 %v1682_v6, %v1682_v6 }
 0x69e   : > { %3148 = vmatmul.mubr.msk.bf16.vlgmr.msra.gmra.mxu1 %vm1148_vm4, %v1683_v7 }
 0x69f   : > { %3161 = vmatprep.mubr.msk.bf16.mxu1 %vm3865_vm3, %v3864_v8  ;;  %3160 = vmatpush3.bf16.xpose.msra.mxu1 %v1874_v38 }
 0x6a0   : > { %3171 = vmatprep.subr.bf16.mxu1 %v3864_v8 }
 0x75e   : > { %v1743_v12 = vpop.f32.mrf.mxu1 }
 0x75f   : > { %v1744_v13 = vadd.f32 %v2929_v9, %v1743_v12 }
 0x760   : > { %v3149_v14 = vpop.f32.mrf.mxu1 }
 0x761   : > { %v1750_v15 = vadd.f32 %v1749_v11, %v1744_v13 }
 0x762   : > { %v1746_v16 = vpop.f32.mrf.mxu1 }
 0x763   : > { %v1753_v17 = vsel %vm1148_vm4, %v1750_v15, 0.0 }
 0x764   : > { %1754 = vadd.xlane.f32.xlu0 %v1753_v17  ;;  %v3150_v18 = vpop.f32.mrf.mxu1 }
 0x7ed   : > { %v1755_v19 = vpop.xlane.xlu0 %1754 }
 0x7ee   : > { %v1757_v20 = vmul.f32 0.03125, %v1755_v19 }
 0x7f0   : > { %v1758_v21 = vsub.f32 %v1750_v15, %v1757_v20 }
 0x7f2   : > { %v1759_v22 = vmul.f32 %v1758_v21, %v1758_v21 }
 0x7f4   : > { %v1760_v23 = vsel %vm1148_vm4, %v1759_v22, 0.0 }
 0x7f5   : > { %1761 = vadd.xlane.f32.xlu1 %v1760_v23 }
 0x87e   : > { %v1762_v10 = vpop.xlane.xlu1 %1761 }
 0x87f   : > { %v1763_v26 = vmul.f32 0.03125, %v1762_v10 }
 0x881   : > { %v1764_v27 = vadd.f32 1e-05, %v1763_v26 }
 0x883   : > { %3474 = vrsqrt.f32 %v1764_v27 }
 0x890   : > { %v3475_v28 = vpop.eup %3474 }
 0x891   : > { %v1766_v30 = vmul.f32 %v3475_v28, %v1758_v21 }
 0x893   : > { %v1771_v34 = vmul.f32 %v2933_v29, %v1766_v30 }
 0x895   : > { %v4381_v35 = vadd.f32 %v2934_v31, %v1771_v34 }
 0x897   : > { %v1777_v36 = vpack.c.bf16 %v4381_v35, %v4381_v35 }
 0x899   : > { %3156 = vmatmul.mubr.msk.bf16.vlgmr.msra.gmra.mxu0 %vm1148_vm4, %v1777_v36 }
 0x89a   : > { %3167 = vmatprep.mubr.msk.bf16.mxu0 %vm3865_vm3, %v3864_v8  ;;  %3166 = vmatpush3.bf16.xpose.msra.mxu0 %v1925_v41 }
 0x89b   : > { %3177 = vmatprep.subr.bf16.mxu0 %v3864_v8 }
 0x959   : > { %v1836_v43 = vpop.f32.mrf.mxu0 }
 0x95a   : > { %v1837_v44 = vadd.f32 %v2935_v42, %v1836_v43  ;;  %v3447_v43 = vld [vmem:[#allocation5 + $0x8] sm:$0xff]  }
 0x95b   : > { %v3157_v45 = vpop.f32.mrf.mxu0 }
 0x95c   : > { %v1842_v47 = vmul.f32 0.35355338, %v1837_v44 }
 0x95d   : > { %v1839_v48 = vpop.f32.mrf.mxu0 }
 0x95e   : > { %v1843_v49 = vpack.c.bf16 %v1842_v47, %v1842_v47  ;;  %v3448_v47 = vld [vmem:[#allocation5 + $0x10] sm:$0xff]  }
 0x95f   : > { %v3158_v50 = vpop.f32.mrf.mxu0 }
 0x960   : > { %1847 = vrot.lane.b32.xlu1 %v1843_v49, %s3868_s16  ;;  %1845 = vrot.lane.b32.xlu0 %v1843_v49, %s3867_s21  ;;  %s4666_s16 = sld [smem:[#allocation44_spill]]  ;;  %s3874_s21 = smov [#allocation19]  }
 0x961   : > { %3162 = vmatmul.mubr.msk.bf16.vlgmr.msra.gmra.mxu1 %vm1214_vm5, %v1843_v49 }
 0x962   : > { %3172 = vmatpush3.bf16.xpose.msra.mxu1 %v1976_v51  ;;  %3173 = vmatprep.mubr.msk.bf16.mxu1 %vm3865_vm3, %v3864_v8 }
 0x963   : > { %3183 = vmatprep.subr.bf16.mxu1 %v3864_v8 }
 0x964   : > { %1849 = vrot.lane.b32.xlu0 %v1843_v49, %s3866_s24  ;;  %s3682_s24 = scalar_lea.vmem %s4501_s9, 256 }
 0x965   : > { %p3683_p5 = scmp.ne.s32.totalorder %s4501_s9, %s3682_s24 }
 0x967   : > { %p3684_p8 = pnand %p3683_p5, %p4123_p12 }
 0x969   : > { %p3685_p9 = pneg %p3684_p8 }
 0x9d2   : > { %v1848_v54 = vpop.permute.xlu1 %1847  ;;  %v1846_v55 = vpop.permute.xlu0 %1845 }
 0x9d3   : > { %3168 = vmatmul.mubr.msk.bf16.vlgmr.msra.gmra.mxu0 %vm1214_vm5, %v1846_v55  ;;  %3174 = vmatmul.mubr.msk.bf16.vlgmr.msra.gmra.mxu1 %vm1214_vm5, %v1848_v54  ;;  %v3449_v54 = vld [vmem:[#allocation5 + $0x18] sm:$0xff]  }
 0x9d4   : > { %3178 = vmatpush3.bf16.xpose.msra.mxu0 %v2027_v53  ;;  %3179 = vmatprep.mubr.msk.bf16.mxu0 %vm3865_vm3, %v3864_v8 }
 0x9d5   : > { %3185 = vmatprep.mubr.msk.bf16.mxu1 %vm3865_vm3, %v3864_v8  ;;  %3189 = vmatprep.subr.bf16.mxu0 %v3864_v8 }
 0x9d6   : > { %v1850_v56 = vpop.permute.xlu0 %1849  ;;  %3184 = vmatpush3.bf16.msra.mxu1 %v3446_v24 }
 0x9d7   : > { %3195 = vmatprep.subr.bf16.mxu1 %v3864_v8 }
 0x9db   : > { %3180 = vmatmul.mubr.msk.bf16.vlgmr.msra.gmra.mxu0 %vm1214_vm5, %v1850_v56 }
 0x9dc   : > { %3191 = vmatprep.mubr.msk.bf16.mxu0 %vm3865_vm3, %v3864_v8  ;;  %3190 = vmatpush3.bf16.msra.mxu0 %v3447_v43 }
 0x9dd   : > { %3201 = vmatprep.subr.bf16.mxu0 %v3864_v8 }
 0xa21   : > { %v1910_v60 = vpop.f32.mrf.mxu1 }
 0xa22   : > { %v1911_v61 = vadd.f32 %v1910_v60, %v1863_v59 }
 0xa23   : > { %v3163_v62 = vpop.f32.mrf.mxu1 }
 0xa24   : > { %v2069_v63 = vsel %vm1414_vm10, %v1911_v61, -inf }
 0xa25   : > { %2070 = vmax.xlane.f32.xlu1 %v2069_v63  ;;  %v1913_v0 = vpop.f32.mrf.mxu1 }
 0xa27   : > { %v3164_v1 = vpop.f32.mrf.mxu1 }
 0xa93   : > { %v1961_v2 = vpop.f32.mrf.mxu0  ;;  %v2012_v3 = vpop.f32.mrf.mxu1 }
 0xa94   : > { %v1962_v4 = vadd.f32 %v1961_v2, %v1863_v59  ;;  %v2013_v7 = vadd.f32 %v2012_v3, %v1863_v59  ;;  %v3450_v2 = vld [vmem:[#allocation12 + $0x38] sm:$0xff]   ;;  %v3451_v3 = vld [vmem:[#allocation12 + $0x30] sm:$0xff]  }
 0xa95   : > { %v3169_v5 = vpop.f32.mrf.mxu0  ;;  %v3175_v6 = vpop.f32.mrf.mxu1 }
 0xa96   : > { %v2072_v9 = vsel %vm1414_vm10, %v1962_v4, -inf  ;;  %v2075_v12 = vsel %vm1414_vm10, %v2013_v7, -inf }
 0xa97   : > { %v2015_v40 = vpop.f32.mrf.mxu1  ;;  %2073 = vmax.xlane.f32.xlu0 %v2072_v9  ;;  %v1964_v32 = vpop.f32.mrf.mxu0 }
 0xa99   : > { %v3170_v33 = vpop.f32.mrf.mxu0  ;;  %v3176_v11 = vpop.f32.mrf.mxu1 }
 0xa9b   : > { %2076 = vmax.xlane.f32.xlu0 %v2075_v12  ;;  %v2063_v13 = vpop.f32.mrf.mxu0 }
 0xa9c   : > { %v2064_v14 = vadd.f32 %v2063_v13, %v1863_v59 }
 0xa9d   : > { %v3181_v15 = vpop.f32.mrf.mxu0 }
 0xa9e   : > { %v2078_v16 = vsel %vm1414_vm10, %v2064_v14, -inf }
 0xa9f   : > { %2079 = vmax.xlane.f32.xlu1 %v2078_v16  ;;  %v2066_v17 = vpop.f32.mrf.mxu0 }
 0xaa1   : > { %v3182_v18 = vpop.f32.mrf.mxu0 }
 0xaae   : > { %v2071_v19 = vpop.xlane.xlu1 %2070 }
 0xaaf   : > { %v2081_v20 = vsub.f32 %v1911_v61, %v2071_v19 }
 0xab1   : > { %v2085_v21 = vmul.f32 1.442695, %v2081_v20 }
 0xab3   : > { %3476 = vpow2.f32 %v2085_v21 }
 0xac0   : > { %v3477_v22 = vpop.eup %3476 }
 0xac1   : > { %v2093_v23 = vsel %vm1414_vm10, %v3477_v22, 0.0 }
 0xac2   : > { %2094 = vadd.xlane.f32.xlu0 %v2093_v23 }
 0xb20   : > { %v2074_v25 = vpop.xlane.xlu0 %2073 }
 0xb21   : > { %v2082_v10 = vsub.f32 %v1962_v4, %v2074_v25 }
 0xb23   : > { %v2087_v26 = vmul.f32 1.442695, %v2082_v10 }
 0xb24   : > { %v2077_v27 = vpop.xlane.xlu0 %2076 }
 0xb25   : > { %3478 = vpow2.f32 %v2087_v26  ;;  %v2083_v28 = vsub.f32 %v2013_v7, %v2077_v27 }
 0xb27   : > { %v2089_v29 = vmul.f32 1.442695, %v2083_v28 }
 0xb28   : > { %v2080_v30 = vpop.xlane.xlu1 %2079 }
 0xb29   : > { %3480 = vpow2.f32 %v2089_v29  ;;  %v2084_v31 = vsub.f32 %v2064_v14, %v2080_v30 }
 0xb2b   : > { %v2091_v34 = vmul.f32 1.442695, %v2084_v31 }
 0xb2d   : > { %3482 = vpow2.f32 %v2091_v34 }
 0xb32   : > { %v3479_v36 = vpop.eup %3478 }
 0xb33   : > { %v2096_v37 = vsel %vm1414_vm10, %v3479_v36, 0.0 }
 0xb34   : > { %2097 = vadd.xlane.f32.xlu1 %v2096_v37  ;;  %v3452_v37 = vld [vmem:[%s4663_s13 + $0x8] sm:$0xff]  }
 0xb36   : > { %v3481_v38 = vpop.eup %3480 }
 0xb37   : > { %v2099_v39 = vsel %vm1414_vm10, %v3481_v38, 0.0 }
 0xb38   : > { %2100 = vadd.xlane.f32.xlu0 %v2099_v39  ;;  %v3455_v39 = vld [vmem:[%s4664_s10 + $0x10] sm:$0xff]  }
 0xb3a   : > { %v3483_v41 = vpop.eup %3482 }
 0xb3b   : > { %v2102_v42 = vsel %vm1414_vm10, %v3483_v41, 0.0 }
 0xb3c   : > { %2103 = vadd.xlane.f32.xlu1 %v2102_v42 }
 0xb4b   : > { %v2095_v44 = vpop.xlane.xlu0 %2094 }
 0xb4c   : > { %3484 = vrcp.f32 %v2095_v44 }
 0xb59   : > { %v3485_v45 = vpop.eup %3484 }
 0xb5a   : > { %v2109_v46 = vmul.f32 %v3485_v45, %v3477_v22  ;;  %v2955_v22 = vld [vmem:[#allocation14 + $0x3] ss:$0 sm:$0xff]  ;;  %v2959_v45 = vld [vmem:[#allocation15 + $0x1] ss:$0 sm:$0xff] }
 0xb5c   : > { %v2113_v48 = vpack.c.bf16 %v2109_v46, %v2109_v46 }
 0xb5e   : > { %2118 = vst.msk [vmem:[%s4217_s27] sm:$0xf] %vm2117_vm13, %v2113_v48  ;;  %3186 = vmatmul.mubr.msk.bf16.vlgmr.msra.gmra.mxu1 %vm1414_vm10, %v2113_v48 }
 0xb5f   : > { %3196 = vmatpush3.bf16.msra.mxu1 %v3448_v47  ;;  %3197 = vmatprep.mubr.msk.bf16.mxu1 %vm3865_vm3, %v3864_v8  ;;  %v2960_v47 = vld [vmem:[#allocation17 + $0x1] ss:$0 sm:$0xff] }
 0xb60   : > { %3207 = vmatprep.subr.bf16.mxu1 %v3864_v8 }
 0xbbd   : > { %v2098_v49 = vpop.xlane.xlu1 %2097 }
 0xbbe   : > { %3486 = vrcp.f32 %v2098_v49 }
 0xbc1   : > { %v2101_v50 = vpop.xlane.xlu0 %2100 }
 0xbc2   : > { %3488 = vrcp.f32 %v2101_v50 }
 0xbc5   : > { %v2104_v51 = vpop.xlane.xlu1 %2103 }
 0xbc6   : > { %3490 = vrcp.f32 %v2104_v51  ;;  %v3456_v51 = vld [vmem:[%s4664_s10 + $0x8] sm:$0xff]  }
 0xbcb   : > { %v3487_v52 = vpop.eup %3486 }
 0xbcc   : > { %v2110_v53 = vmul.f32 %v3487_v52, %v3479_v36  ;;  %v3457_v52 = vld [vmem:[%s4664_s10] sm:$0xff]  }
 0xbce   : > { %v2114_v55 = vpack.c.bf16 %v2110_v53, %v2110_v53  ;;  %v2961_v53 = vld [vmem:[%s4665_s12] ss:$0 sm:$0xff]  ;;  %s2618_s12 = scalar_lea.sflag [#allocation20], %s4198_s11 }
 0xbcf   : > { %v3489_v56 = vpop.eup %3488 }
 0xbd0   : > { %2119 = vst.msk [vmem:[%s4217_s27 + $0x4] sm:$0xf] %vm2117_vm13, %v2114_v55  ;;  %3192 = vmatmul.mubr.msk.bf16.vlgmr.msra.gmra.mxu0 %vm1414_vm10, %v2114_v55  ;;  %v2111_v57 = vmul.f32 %v3489_v56, %v3481_v38  ;;  %v3454_v38 = vld [vmem:[%s4664_s10 + $0x18] sm:$0xff]  }
 0xbd1   : > { %3202 = vmatpush3.bf16.msra.mxu0 %v3449_v54  ;;  %3203 = vmatprep.mubr.msk.bf16.mxu0 %vm3865_vm3, %v3864_v8 }
 0xbd2   : > { %v2115_v58 = vpack.c.bf16 %v2111_v57, %v2111_v57  ;;  %3215 = vmatprep.subr.bf16.mxu0 %v3864_v8 }
 0xbd3   : > { %v3491_v59 = vpop.eup %3490 }
 0xbd4   : > { %2120 = vst.msk [vmem:[%s4217_s27 + $0x8] sm:$0xf] %vm2117_vm13, %v2115_v58  ;;  %3198 = vmatmul.mubr.msk.bf16.vlgmr.msra.gmra.mxu1 %vm1414_vm10, %v2115_v58  ;;  %v2112_v60 = vmul.f32 %v3491_v59, %v3483_v41 }
 0xbd5   : > { %3211 = vmatprep.mubr.msk.bf16.mxu1 %vm3865_vm3, %v3864_v8  ;;  %3208 = vmatpush3.bf16.msra.mxu1 %v3450_v2 }
 0xbd6   : > { %v2116_v61 = vpack.c.bf16 %v2112_v60, %v2112_v60  ;;  %3209 = vmatprep.subr.bf16.mxu1 %v3864_v8 }
 0xbd8   : > { %2121 = vst.msk [vmem:[%s4217_s27 + $0xc] sm:$0xf] %vm2117_vm13, %v2116_v61  ;;  %3204 = vmatmul.mubr.msk.bf16.vlgmr.msra.gmra.mxu0 %vm1414_vm10, %v2116_v61 }
 0xbd9   : > { %3219 = vmatprep.mubr.msk.bf16.mxu0 %vm3865_vm3, %v3864_v8  ;;  %3210 = vmatpush3.bf16.msra.mxu1 %v3451_v3 }
 0xbda   : > { %3223 = vmatprep.subr.bf16.mxu1 %v3864_v8  ;;  %3216 = vmatpush3.bf16.msra.mxu0 %v3452_v37 }
 0xbdb   : > { %3217 = vmatprep.subr.bf16.mxu0 %v3864_v8 }
 0xc1e   : > { %v2173_v62 = vpop.f32.mrf.mxu1 }
 0xc20   : > { %v3187_v63 = vpop.f32.mrf.mxu1 }
 0xc22   : > { %v2176_v0 = vpop.f32.mrf.mxu1 }
 0xc24   : > { %v3188_v1 = vpop.f32.mrf.mxu1 }
 0xc90   : > { %v2222_v4 = vpop.f32.mrf.mxu0 }
 0xc91   : > { %2327 = vrot.lane.b32.xlu0 %v2222_v4, %s3871_s6  ;;  %s2977_s6 = sshll.u32 %s3836_s25, 3 }
 0xc92   : > { %v3193_v5 = vpop.f32.mrf.mxu0 }
 0xc94   : > { %v2225_v6 = vpop.f32.mrf.mxu0  ;;  %v2271_v7 = vpop.f32.mrf.mxu1 }
 0xc95   : > { %2331 = vrot.lane.b32.xlu1 %v2271_v7, %s3872_s8  ;;  %s2644_s8 = sadd.s32 %s4659_s29, %s2977_s6 }
 0xc96   : > { %v3194_v9 = vpop.f32.mrf.mxu0  ;;  %v3199_v40 = vpop.f32.mrf.mxu1 }
 0xc98   : > { %v2274_v32 = vpop.f32.mrf.mxu1  ;;  %v2320_v33 = vpop.f32.mrf.mxu0 }
 0xc99   : > { %2335 = vrot.lane.b32.xlu1 %v2320_v33, %s3873_s15  ;;  %s2978_s15 = sshll.u32 %s2644_s8, 6 }
 0xc9a   : > { %v3200_v11 = vpop.f32.mrf.mxu1  ;;  %v3205_v12 = vpop.f32.mrf.mxu0  ;;  %s4499_s17 = scalar_lea.hbm %s4667_s4, %s2978_s15 }
 0xc9c   : > { %v2323_v13 = vpop.f32.mrf.mxu0 }
 0xc9e   : > { %v3206_v14 = vpop.f32.mrf.mxu0 }
 0xd03   : > { %v2328_v15 = vpop.permute.xlu0 %2327 }
 0xd04   : > { %v2338_v17 = vsel %vm1214_vm5, %v2173_v62, %v2328_v15 }
 0xd07   : > { %v2332_v16 = vpop.permute.xlu1 %2331 }
 0xd08   : > { %v2339_v18 = vsel %vm1414_vm10, %v2338_v17, %v2332_v16 }
 0xd0b   : > { %v2336_v19 = vpop.permute.xlu1 %2335 }
 0xd0c   : > { %v2340_v20 = vsel %vm1681_vm11, %v2339_v18, %v2336_v19 }
 0xd0d   : > { %v2341_v21 = vpack.c.bf16 %v2340_v20, %v2340_v20 }
 0xd0f   : > { %3212 = vmatmul.mubr.msk.bf16.vlgmr.msra.gmra.mxu1 %vm1148_vm4, %v2341_v21 }
 0xd10   : > { %3231 = vmatprep.mubr.msk.bf16.mxu1 %vm3865_vm3, %v3864_v8  ;;  %3224 = vmatpush3.bf16.msra.mxu1 %v3454_v38 }
 0xd11   : > { %3225 = vmatprep.subr.bf16.mxu1 %v3864_v8 }
 0xd14   : > { %3226 = vmatpush3.bf16.msra.mxu1 %v3455_v39 }
 0xd15   : > { %3227 = vmatprep.subr.bf16.mxu1 %v3864_v8 }
 0xd18   : > { %3228 = vmatpush3.bf16.msra.mxu1 %v3456_v51 }
 0xd19   : > { %3229 = vmatprep.subr.bf16.mxu1 %v3864_v8  ;;  %v2965_v8 = vld [vmem:[%s4666_s16] ss:$0 sm:$0xff]  ;;  %s3686_s16 = sshll.u32 %s3874_s21, 4  ;;  %s3687_s16 = int_to_ptr.vmem [resolvable:$false] %s3686_s16 }
 0xd1a   : > { %s3688_s27 = scalar_lea.vmem %s3687_s16, 512  ;;  %p3689_p10 = scmp.lt.s32.totalorder %s4501_s9, %s3687_s16 }
 0xd1b   : > { %p3690_p6 = scmp.lt.s32.totalorder %s3688_s27, %s3682_s24 }
 0xd1c   : > { %3230 = vmatpush3.bf16.msra.mxu1 %v3457_v52 }
 0xd1d   : > { %p3691_p7 = por %p3690_p6, %p3689_p10 }
 0xd1f   : > { %p3692_p11 = pnand %p3691_p7, %p3685_p9 }
 0xdcf   : > { %v2401_v23 = vpop.f32.mrf.mxu1 }
 0xdd0   : > { %v2402_v24 = vadd.f32 %v2955_v22, %v2401_v23 }
 0xdd1   : > { %v3213_v25 = vpop.f32.mrf.mxu1 }
 0xdd2   : > { %v2407_v10 = vadd.f32 %v2402_v24, %v4381_v35  ;;  %v3453_v35 = vld [vmem:[%s4663_s13] sm:$0xff]  }
 0xdd3   : > { %v2404_v26 = vpop.f32.mrf.mxu1  ;;  %3218 = vmatpush3.bf16.msra.mxu0 %v3453_v35 }
 0xdd4   : > { %v2410_v27 = vsel %vm1148_vm4, %v2407_v10, 0.0 }
 0xdd5   : > { %2411 = vadd.xlane.f32.xlu0 %v2410_v27  ;;  %v3214_v28 = vpop.f32.mrf.mxu1 }
 0xe5e   : > { %v2412_v29 = vpop.xlane.xlu0 %2411 }
 0xe5f   : > { %v2413_v30 = vmul.f32 0.03125, %v2412_v29 }
 0xe61   : > { %v2414_v31 = vsub.f32 %v2407_v10, %v2413_v30 }
 0xe63   : > { %v2415_v34 = vmul.f32 %v2414_v31, %v2414_v31 }
 0xe65   : > { %v2416_v36 = vsel %vm1148_vm4, %v2415_v34, 0.0 }
 0xe66   : > { %2417 = vadd.xlane.f32.xlu1 %v2416_v36 }
 0xeef   : > { %v2418_v41 = vpop.xlane.xlu1 %2417 }
 0xef0   : > { %v2419_v42 = vmul.f32 0.03125, %v2418_v41 }
 0xef2   : > { %v2420_v43 = vadd.f32 1e-05, %v2419_v42 }
 0xef4   : > { %3492 = vrsqrt.f32 %v2420_v43 }
 0xf01   : > { %v3493_v44 = vpop.eup %3492 }
 0xf02   : > { %v2422_v46 = vmul.f32 %v3493_v44, %v2414_v31 }
 0xf04   : > { %v2427_v48 = vmul.f32 %v2959_v45, %v2422_v46 }
 0xf06   : > { %v2432_v49 = vadd.f32 %v2960_v47, %v2427_v48 }
 0xf08   : > { %v2433_v50 = vpack.c.bf16 %v2432_v49, %v2432_v49 }
 0xf0a   : > { %3220 = vmatmul.mubr.msk.bf16.vlgmr.msra.gmra.mxu0 %vm1148_vm4, %v2433_v50 }
 0xfca   : > { %v2494_v54 = vpop.f32.mrf.mxu0 }
 0xfcb   : > { %v2495_v55 = vadd.f32 %v2961_v53, %v2494_v54 }
 0xfcc   : > { %v3221_v56 = vpop.f32.mrf.mxu0 }
 0xfcd   : > { %v2500_v57 = vmax.f32 %v2495_v55, 0.0 }
 0xfce   : > { %v2497_v58 = vpop.f32.mrf.mxu0 }
 0xfcf   : > { %v2501_v59 = vpack.c.bf16 %v2500_v57, %v2500_v57 }
 0xfd0   : > { %v3222_v60 = vpop.f32.mrf.mxu0 }
 0xfd1   : > { %3232 = vmatmul.mubr.msk.bf16.vlgmr.msra.gmra.mxu1 %vm2541_vm14, %v2501_v59 }
0x1091   : > { %v2579_v61 = vpop.f32.mrf.mxu1 }
0x1092   : > { %v2580_v62 = vadd.f32 %v2965_v8, %v2579_v61 }
0x1093   : > { %v3233_v63 = vpop.f32.mrf.mxu1 }
0x1094   : > { %v2585_v0 = vadd.f32 %v2580_v62, %v2432_v49 }
0x1095   : > { %v2582_v1 = vpop.f32.mrf.mxu1 }
0x1096   : > { %v2588_v2 = vsel %vm1148_vm4, %v2585_v0, 0.0 }
0x1097   : > { %2589 = vadd.xlane.f32.xlu0 %v2588_v2  ;;  %v3234_v3 = vpop.f32.mrf.mxu1 }
0x1120   : > { %v2590_v4 = vpop.xlane.xlu0 %2589 }
0x1121   : > { %v2591_v5 = vmul.f32 0.03125, %v2590_v4 }
0x1123   : > { %v2592_v6 = vsub.f32 %v2585_v0, %v2591_v5 }
0x1125   : > { %v2593_v7 = vmul.f32 %v2592_v6, %v2592_v6 }
0x1127   : > { %v2594_v9 = vsel %vm1148_vm4, %v2593_v7, 0.0 }
0x1128   : > { %2595 = vadd.xlane.f32.xlu0 %v2594_v9 }
0x1129   : > { %3695 = shalt.err (!%p3692_p11)
}
0x112a   : > { %s3696_s6 = scalar_lea.hbm %s4499_s17, 256  ;;  %s3700_s2 = scalar_lea.hbm %s4667_s4, 1024 }
0x112b   : > { %p3697_p1 = scmp.ne.s32.totalorder %s4499_s17, %s3696_s6  ;;  %p3701_p3 = scmp.lt.s32.totalorder %s4499_s17, %s4667_s4 }
0x112c   : > { %p3702_p13 = scmp.lt.s32.totalorder %s3700_s2, %s3696_s6 }
0x112d   : > { %p3698_p2 = pnand %p3697_p1, %p4123_p12 }
0x112e   : > { %p3703_p5 = por %p3702_p13, %p3701_p3 }
0x112f   : > { %p3699_p0 = pneg %p3698_p2 }
0x1131   : > { %p3704_p8 = pnand %p3703_p5, %p3699_p0 }
0x1133   : > { %3707 = shalt.err (!%p3704_p8)
}
0x1134   : > { %s3875_s24 = smov 64   ;;  %s3876_s16 = smov 128   ;;  %v2971_v12 = vld [vmem:[#allocation15 + $0x2] ss:$0 sm:$0xff]  ;;  %v2972_v14 = vld [vmem:[#allocation17 + $0x2] ss:$0 sm:$0xff] }
0x1135   : > { %s3877_s27 = smov 4   ;;  %s2975_s6 = sshll.u32 %s3836_s25, 1 }
0x1136   : > { %3260 = dma.vmem_to_hbm [thread:$0]  (%p4123_p12), %s4501_s9, 256, %s4499_s17, %s2618_s12, %s3875_s24, %s3876_s16, %s3877_s27  }
0x1137   : > { %s2629_s8 = sadd.s32 %s4659_s29, %s2975_s6  ;;  %s2633_s2 = sshll.u32 %s4215_s30, 4  ;;  %s2634_s2 = int_to_ptr.vmem [resolvable:$true] %s2633_s2 }
0x1138   : > { %s2976_s15 = sshll.u32 %s2629_s8, 7  ;;  %s4668_s9 = sld [smem:[#allocation45_spill]] }
0x1139   : > { %s2613_s12 = scalar_lea.sflag [#allocation8], %s4198_s11  ;;  %s3708_s24 = scalar_lea.vmem %s2634_s2, 128 }
0x113a   : > { %p3709_p9 = scmp.ne.s32.totalorder %s2634_s2, %s3708_s24  ;;  %s3878_s25 = smov [#allocation18]  }
0x113b   : > { %s3712_s29 = sshll.u32 %s3878_s25, 4  ;;  %s3713_s29 = int_to_ptr.vmem [resolvable:$false] %s3712_s29 }
0x113c   : > { %p3710_p10 = pnand %p3709_p9, %p4123_p12  ;;  %s3714_s16 = scalar_lea.vmem %s3713_s29, 256 }
0x113d   : > { %p3715_p7 = scmp.lt.s32.totalorder %s2634_s2, %s3713_s29  ;;  %p3716_p11 = scmp.lt.s32.totalorder %s3714_s16, %s3708_s24 }
0x113e   : > { %s2631_s17 = scalar_lea.hbm %s4668_s9, %s2976_s15  ;;  %p3711_p6 = pneg %p3710_p10 }
0x113f   : > { %p3717_p1 = por %p3716_p11, %p3715_p7 }
0x1141   : > { %p3718_p2 = pnand %p3717_p1, %p3711_p6 }
0x11b1   : > { %v2596_v40 = vpop.xlane.xlu0 %2595 }
0x11b2   : > { %v2597_v32 = vmul.f32 0.03125, %v2596_v40 }
0x11b4   : > { %v2598_v33 = vadd.f32 1e-05, %v2597_v32 }
0x11b6   : > { %3494 = vrsqrt.f32 %v2598_v33 }
0x11c3   : > { %v3495_v11 = vpop.eup %3494 }
0x11c4   : > { %v2600_v13 = vmul.f32 %v3495_v11, %v2592_v6 }
0x11c6   : > { %v2605_v15 = vmul.f32 %v2971_v12, %v2600_v13 }
0x11c8   : > { %v2610_v16 = vadd.f32 %v2972_v14, %v2605_v15 }
0x11ca   : > { %2611 = vst.msk [vmem:[%s4215_s30] sm:$0xff] %vm1148_vm4, %v2610_v16 }
0x11cb   : > { %3721 = shalt.err (!%p3718_p2)
}
0x11cc   : > { %s3722_s27 = scalar_lea.hbm %s2631_s17, 128  ;;  %s3726_s6 = scalar_lea.hbm %s4668_s9, 512 }
0x11cd   : > { %p3723_p0 = scmp.ne.s32.totalorder %s2631_s17, %s3722_s27  ;;  %p3727_p5 = scmp.lt.s32.totalorder %s2631_s17, %s4668_s9 }
0x11ce   : > { %p3728_p8 = scmp.lt.s32.totalorder %s3726_s6, %s3722_s27 }
0x11cf   : > { %p3724_p3 = pnand %p3723_p0, %p4123_p12 }
0x11d0   : > { %p3729_p9 = por %p3728_p8, %p3727_p5 }
0x11d1   : > { %p3725_p13 = pneg %p3724_p3 }
0x11d3   : > { %p3730_p10 = pnand %p3729_p9, %p3725_p13 }
0x11d5   : > { %3733 = shalt.err (!%p3730_p10)
}
0x11d6   : > { %3259 = dma.vmem_to_hbm [thread:$0]  (%p4123_p12), %s2634_s2, 128, %s2631_s17, %s2613_s12  }
0x11d7 PF: > { %p3304_p6 = scmp.ge.s32.totalorder %s3848_s28, 2  ;;  %s2662_s14 = sand.u32 1, %s3808_s18  }
0x11d8   : > { %s2663_s21 = scalar_lea.sflag [#allocation8], %s2662_s14 }
0x11d9   : > { %p3287_p7 = pnand %p3304_p6, %p4136_p4 }
0x11db   : > { %p3288_p11 = pneg %p3287_p7 }
0x11dd   : > { %3799 = dma.done.wait (%p3288_p11), %s2663_s21, 128  }
0x11de   : > { %3801 = vsyncadd (%p3288_p11), %s2663_s21, 4294967168  ;;  %s2672_s24 = scalar_lea.sflag [#allocation20], %s2662_s14 }
0x11df   : > { %3803 = dma.done.wait (%p3288_p11), %s2672_s24, 256  }
0x11e0   : > { %3805 = vsyncadd (%p3288_p11), %s2672_s24, 4294967040  ;;  %s40_s28 = sadd.s32 1, %s3848_s28   ;;  %s4669_s25 = sld [smem:[#allocation29_spill]] }
0x11e1   : > { %p37_p1 = scmp.ge.s32.totalorder %s40_s28, 6   ;;  %s4670_s7 = sld [smem:[#allocation30_spill]] }
0x11e2   : > { %s4671_s27 = sld [smem:[#allocation31_spill]]  ;;  %s4672_s18 = smov %s3812_s19 }
0x11e3   : > { %s4673_s19 = smov %s3816_s20  ;;  %s4674_s20 = smov %s4131_s5 }
0x11e4   : > { %s4675_s21 = smov %s3824_s22  ;;  %s4676_s22 = smov %s3828_s23 }
0x11e5   : > { %s4677_s23 = smov %s4128_s0  ;;  %s4678_s24 = smov %s3840_s26 }
0x11e6   :  { %39 = sbr.rel (!%p37_p1) target bundleno = 31 (0x1f), region = 200 }
0x11e7   : > { %s4679_s26 = smov %s4670_s7 }
0x11eb   :  { %2677 = vsyncpa [#allocation7], 1 }
0x11ec   :  { %2679 = vsyncpa [#allocation7 + $0x1], 1 }
0x11ed   :  { %2680 = vsyncpa [#allocation10], 1 }
0x11ee   :  { %2682 = vsyncpa [#allocation10 + $0x1], 1 }
0x11ef   :  { %2683 = vsyncpa [#allocation13], 1 }
0x11f0   :  { %2684 = vsyncpa [#allocation16], 1 }
0x11f1   :  { %2685 = vsyncpa [#allocation8], 1 }
0x11f2   :  { %2687 = vsyncpa [#allocation8 + $0x1], 1 }
0x11f3   :  { %2688 = vsyncpa [#allocation20], 1 }
0x11f4   :  { %2690 = vsyncpa [#allocation20 + $0x1], 1 }

</bundles_post_ra>
